<compile_context>
chip_gen: v7x
topology: tpu7x:2x2x1
jax: 0.10.0
libtpu: 0.0.40
codegen_flags: <defaults>
</compile_context>

<pallas_src>
import functools
import math

import jax
import jax.numpy as jnp
from jax.experimental import pallas as pl
from jax.experimental.pallas import tpu as pltpu


_LANES = 128


def _mixconv_dw_kernel(x_ref, w_ref, b_ref, o_ref, xpad_ref,
                       *, kh, kw, H, W, use_bias):
    """Fused depthwise 'same' conv for one (batch, channel-tile) block.

    x_ref   : (1, H, W, tC)               unpadded input slab (C on lanes)
    w_ref   : (kh, kw, tC)                fused depthwise filters
    b_ref   : (1, 1, tC)                  fused bias
    o_ref   : (1, H, W, tC)               output slab
    xpad_ref: (H+kh-1, W+kw-1, tC) f32    VMEM scratch: 'same'-padded tile
    """
    tC = x_ref.shape[-1]
    ph_l = (kh - 1) // 2          # PyTorch padding='same' left pad (stride=1)
    ph_r = (kh - 1) - ph_l
    pw_l = (kw - 1) // 2
    pw_r = (kw - 1) - pw_l
    Wp = W + kw - 1

    # Build the padded tile in VMEM. Zero only the halo frame -- the interior
    # is fully overwritten by the input copy right below.
    if ph_l > 0:
        xpad_ref[0:ph_l, :, :] = jnp.zeros((ph_l, Wp, tC), jnp.float32)
    if ph_r > 0:
        xpad_ref[ph_l + H:ph_l + H + ph_r, :, :] = jnp.zeros(
            (ph_r, Wp, tC), jnp.float32)
    if pw_l > 0:
        xpad_ref[ph_l:ph_l + H, 0:pw_l, :] = jnp.zeros((H, pw_l, tC), jnp.float32)
    if pw_r > 0:
        xpad_ref[ph_l:ph_l + H, pw_l + W:pw_l + W + pw_r, :] = jnp.zeros(
            (H, pw_r, tC), jnp.float32)
    xpad_ref[ph_l:ph_l + H, pw_l:pw_l + W, :] = x_ref[0].astype(jnp.float32)

    w = w_ref[...].astype(jnp.float32)                       # (kh, kw, tC)

    # Static tap unroll: dh is an address offset, dw a sublane shift,
    # multiply-accumulate on the VPU. Accumulate in a traced f32 value and
    # write the output block exactly once.
    acc = None
    for dh in range(kh):
        for dw in range(kw):
            term = xpad_ref[dh:dh + H, dw:dw + W, :] * w[dh, dw]  # (tC,) lane bcast
            acc = term if acc is None else acc + term
    if use_bias:
        acc = acc + b_ref[...].astype(jnp.float32)            # (1,1,tC) bcast
    o_ref[0] = acc.astype(o_ref.dtype)


def mixconv_depthwise_same(x_nhwc, w_fused, b_fused, *, use_bias=True):
    """One fused depthwise conv2d (stride 1, PyTorch padding='same')."""
    N, H, W, C = x_nhwc.shape
    kh, kw, Cw = w_fused.shape
    assert Cw == C

    # Channel tiling: 128-lane tiles when C is large, otherwise a single
    # full-channel block (full-extent last dim is always legal).
    if C <= _LANES:
        tC, C_pad = C, C
    else:
        C_pad = pl.cdiv(C, _LANES) * _LANES
        tC = _LANES
        if C_pad != C:
            x_nhwc = jnp.pad(x_nhwc, ((0, 0), (0, 0), (0, 0), (0, C_pad - C)))
            w_fused = jnp.pad(w_fused, ((0, 0), (0, 0), (0, C_pad - C)))
            b_fused = jnp.pad(b_fused, ((0, C_pad - C),))

    # TODO(synk): add an H-tile grid axis with a (k_max-1) halo (manual DMA or
    # pl.Element indexing) for resolutions where a whole image per block no
    # longer fits v7x's 64 MiB VMEM.
    kernel = functools.partial(_mixconv_dw_kernel, kh=kh, kw=kw, H=H, W=W,
                               use_bias=use_bias)

    itemsize = jnp.dtype(x_nhwc.dtype).itemsize
    blk_bytes = H * W * tC * itemsize
    scratch_bytes = (H + kh - 1) * (W + kw - 1) * tC * 4
    w_bytes = (kh * kw + 1) * tC * 4
    vmem_est = 4 * blk_bytes + scratch_bytes + 2 * w_bytes + (2 << 20)
    vmem_limit = int(min(max(vmem_est, 32 << 20), 64 << 20))

    cost = pl.CostEstimate(
        flops=2 * N * H * W * C_pad * kh * kw,
        transcendentals=0,
        bytes_accessed=2 * N * H * W * C_pad * itemsize
        + (kh * kw + 1) * C_pad * 4)

    out = pl.pallas_call(
        kernel,
        out_shape=jax.ShapeDtypeStruct((N, H, W, C_pad), x_nhwc.dtype),
        grid=(N, C_pad // tC),
        in_specs=[
            pl.BlockSpec((1, H, W, tC), lambda n, c: (n, 0, 0, c)),
            pl.BlockSpec((kh, kw, tC), lambda n, c: (0, 0, c)),
            pl.BlockSpec((1, 1, tC), lambda n, c: (0, 0, c)),
        ],
        out_specs=pl.BlockSpec((1, H, W, tC), lambda n, c: (n, 0, 0, c)),
        scratch_shapes=[
            pltpu.VMEM((H + kh - 1, W + kw - 1, tC), jnp.float32),
        ],
        compiler_params=pltpu.CompilerParams(
            dimension_semantics=("parallel", "parallel"),
            vmem_limit_bytes=vmem_limit),
        cost_estimate=cost,
    )(x_nhwc, w_fused, b_fused.reshape(1, 1, C_pad))

    return out[..., :C] if C_pad != C else out


class MixConvPallas:
    """Mirror of the PyTorch MixConv module (deterministic in-script init)."""

    def __init__(self, input_channels, kernels_size, bias=True, seed=0):
        assert len(input_channels) == len(kernels_size)
        self.input_channels = list(input_channels)
        self.kernels_size = list(kernels_size)
        self.use_bias = bias
        self.k_max = max(self.kernels_size)

        self.weights = []   # per group: (k, k, C_g)  (kept for the reference)
        self.biases = []    # per group: (C_g,)
        key = jax.random.PRNGKey(seed)
        for c, k in zip(self.input_channels, self.kernels_size):
            key, kw_key, kb_key = jax.random.split(key, 3)
            # PyTorch Conv2d init: kaiming_uniform(a=sqrt(5)) -> U(-1/sqrt(fan_in), +)
            fan_in = 1 * k * k  # depthwise: in_channels/groups == 1
            bound = 1.0 / math.sqrt(fan_in)
            w = jax.random.uniform(kw_key, (k, k, c), jnp.float32, -bound, bound)
            b = (jax.random.uniform(kb_key, (c,), jnp.float32, -bound, bound)
                 if bias else jnp.zeros((c,), jnp.float32))
            self.weights.append(w)
            self.biases.append(b)

        # Fuse: embed each k x k filter into k_max x k_max with the offset
        # that preserves PyTorch padding='same' alignment, then concat on C.
        km = self.k_max
        fused_w = []
        for w, k in zip(self.weights, self.kernels_size):
            off = (km - 1) // 2 - (k - 1) // 2
            wp = jnp.zeros((km, km, w.shape[-1]), jnp.float32)
            wp = wp.at[off:off + k, off:off + k, :].set(w)
            fused_w.append(wp)
        self.fused_w = jnp.concatenate(fused_w, axis=-1)       # (km, km, C_total)
        self.fused_b = jnp.concatenate(self.biases, axis=0)    # (C_total,)

    def __call__(self, x_nchw):
        # torch.split + per-group depthwise conv + torch.cat is equivalent to
        # one fused depthwise conv over all channels (zero-embedded filters).
        x_nhwc = jnp.transpose(x_nchw, (0, 2, 3, 1))           # one transpose in
        out_nhwc = mixconv_depthwise_same(
            x_nhwc, self.fused_w, self.fused_b, use_bias=self.use_bias)
        return jnp.transpose(out_nhwc, (0, 3, 1, 2))           # one transpose out


def _reference_mixconv(x_nchw, module):
    """Pure-JAX (lax.conv) per-group reference for correctness checking."""
    outs = []
    start = 0
    for idx, c in enumerate(module.input_channels):
        xg = x_nchw[:, start:start + c, :, :]
        start += c
        k = module.kernels_size[idx]
        pt = k - 1
        pl_, pr_ = pt // 2, pt - pt // 2
        w_oihw = jnp.transpose(module.weights[idx], (2, 0, 1))[:, None, :, :]
        og = jax.lax.conv_general_dilated(
            xg, w_oihw, window_strides=(1, 1),
            padding=((pl_, pr_), (pl_, pr_)),
            feature_group_count=c,
            dimension_numbers=("NCHW", "OIHW", "NCHW"))
        og = og + module.biases[idx][None, :, None, None]
        outs.append(og)
    return jnp.concatenate(outs, axis=1)


if __name__ == "__main__":
    # Small shapes: batch=2, total channels=4 (two groups of 2), spatial=16.
    input_channels = [2, 2]
    kernels_size = [3, 5]
    N, C, H, W = 2, sum(input_channels), 16, 16

    key = jax.random.PRNGKey(0)
    x = jax.random.normal(key, (N, C, H, W), jnp.float32)

    mixconv = MixConvPallas(input_channels, kernels_size, bias=True, seed=0)

    forward = jax.jit(mixconv.__call__)   # fuse transposes around the kernel
    out = jax.block_until_ready(forward(x))

    ref = jax.block_until_ready(_reference_mixconv(x, mixconv))
    assert out.shape == (N, C, H, W), out.shape
    assert jnp.allclose(out, ref, atol=1e-5, rtol=1e-5), \
        float(jnp.max(jnp.abs(out - ref)))

    print("KERNEL_OK")
</pallas_src>

<mosaic_0001>
module attributes {stable_mosaic.version = 11 : i64} {
  func.func @_mixconv_dw_kernel(%arg0: i32, %arg1: i32, %arg2: memref<1x16x16x4xf32, #tpu.memory_space<vmem>>, %arg3: memref<5x5x4xf32, #tpu.memory_space<vmem>>, %arg4: memref<1x1x4xf32, #tpu.memory_space<vmem>>, %arg5: memref<1x16x16x4xf32, #tpu.memory_space<vmem>>, %arg6: memref<20x20x4xf32, #tpu.memory_space<vmem>>) attributes {dimension_semantics = [#tpu.dimension_semantics<parallel>, #tpu.dimension_semantics<parallel>], iteration_bounds = array<i64: 2, 1>, scalar_prefetch = 0 : i64, scratch_operands = 1 : i64, tpu.core_type = #tpu.core_type<tc>, window_params = [{transform_indices = @transform_0, window_bounds = array<i64: 1, 16, 16, 4>}, {transform_indices = @transform_1, window_bounds = array<i64: 5, 5, 4>}, {transform_indices = @transform_2, window_bounds = array<i64: 1, 1, 4>}, {transform_indices = @transform_3, window_bounds = array<i64: 1, 16, 16, 4>}]} {
    %cst = arith.constant 0.000000e+00 : f32
    %0 = vector.broadcast %cst : f32 to vector<2x20x4xf32>
    %c0 = arith.constant 0 : index
    %c0_0 = arith.constant 0 : index
    %c0_1 = arith.constant 0 : index
    %1 = vector.load %arg6[%c0, %c0_0, %c0_1] : memref<20x20x4xf32, #tpu.memory_space<vmem>>, vector<2x20x4xf32>
    tpu.vector_store %arg6[%c0, %c0_0, %c0_1], %0 {strides = array<i32>} : memref<20x20x4xf32, #tpu.memory_space<vmem>>, vector<2x20x4xf32>,
    %cst_2 = arith.constant 0.000000e+00 : f32
    %2 = vector.broadcast %cst_2 : f32 to vector<2x20x4xf32>
    %c18 = arith.constant 18 : index
    %c0_3 = arith.constant 0 : index
    %c0_4 = arith.constant 0 : index
    %3 = vector.load %arg6[%c18, %c0_3, %c0_4] : memref<20x20x4xf32, #tpu.memory_space<vmem>>, vector<2x20x4xf32>
    tpu.vector_store %arg6[%c18, %c0_3, %c0_4], %2 {strides = array<i32>} : memref<20x20x4xf32, #tpu.memory_space<vmem>>, vector<2x20x4xf32>,
    %cst_5 = arith.constant 0.000000e+00 : f32
    %4 = vector.broadcast %cst_5 : f32 to vector<16x2x4xf32>
    %c2 = arith.constant 2 : index
    %c0_6 = arith.constant 0 : index
    %c0_7 = arith.constant 0 : index
    %5 = vector.load %arg6[%c2, %c0_6, %c0_7] : memref<20x20x4xf32, #tpu.memory_space<vmem>>, vector<16x2x4xf32>
    tpu.vector_store %arg6[%c2, %c0_6, %c0_7], %4 {strides = array<i32>} : memref<20x20x4xf32, #tpu.memory_space<vmem>>, vector<16x2x4xf32>,
    %cst_8 = arith.constant 0.000000e+00 : f32
    %6 = vector.broadcast %cst_8 : f32 to vector<16x2x4xf32>
    %c2_9 = arith.constant 2 : index
    %c18_10 = arith.constant 18 : index
    %c0_11 = arith.constant 0 : index
    %7 = vector.load %arg6[%c2_9, %c18_10, %c0_11] : memref<20x20x4xf32, #tpu.memory_space<vmem>>, vector<16x2x4xf32>
    tpu.vector_store %arg6[%c2_9, %c18_10, %c0_11], %6 {strides = array<i32>} : memref<20x20x4xf32, #tpu.memory_space<vmem>>, vector<16x2x4xf32>,
    %c0_12 = arith.constant 0 : index
    %c0_13 = arith.constant 0 : index
    %c0_14 = arith.constant 0 : index
    %c0_15 = arith.constant 0 : index
    %8 = vector.load %arg2[%c0_12, %c0_13, %c0_14, %c0_15] : memref<1x16x16x4xf32, #tpu.memory_space<vmem>>, vector<1x16x16x4xf32>
    %9 = vector.shape_cast %8 : vector<1x16x16x4xf32> to vector<16x16x4xf32>
    %c2_16 = arith.constant 2 : index
    %c2_17 = arith.constant 2 : index
    %c0_18 = arith.constant 0 : index
    %10 = vector.load %arg6[%c2_16, %c2_17, %c0_18] : memref<20x20x4xf32, #tpu.memory_space<vmem>>, vector<16x16x4xf32>
    tpu.vector_store %arg6[%c2_16, %c2_17, %c0_18], %9 {strides = array<i32>} : memref<20x20x4xf32, #tpu.memory_space<vmem>>, vector<16x16x4xf32>,
    %c0_19 = arith.constant 0 : index
    %c0_20 = arith.constant 0 : index
    %c0_21 = arith.constant 0 : index
    %11 = vector.load %arg3[%c0_19, %c0_20, %c0_21] : memref<5x5x4xf32, #tpu.memory_space<vmem>>, vector<5x5x4xf32>
    %c0_22 = arith.constant 0 : index
    %c0_23 = arith.constant 0 : index
    %c0_24 = arith.constant 0 : index
    %12 = vector.load %arg6[%c0_22, %c0_23, %c0_24] : memref<20x20x4xf32, #tpu.memory_space<vmem>>, vector<16x16x4xf32>
    %13 = vector.extract_strided_slice %11 {offsets = [0, 0, 0], sizes = [1, 1, 4], strides = [1, 1, 1]} : vector<5x5x4xf32> to vector<1x1x4xf32>
    %14 = vector.shape_cast %13 : vector<1x1x4xf32> to vector<4xf32>
    %15 = vector.shape_cast %14 : vector<4xf32> to vector<1x1x4xf32>
    %16 = vector.broadcast %15 : vector<1x1x4xf32> to vector<16x16x4xf32>
    %17 = arith.mulf %12, %16 : vector<16x16x4xf32>
    %c0_25 = arith.constant 0 : index
    %c1 = arith.constant 1 : index
    %c0_26 = arith.constant 0 : index
    %18 = vector.load %arg6[%c0_25, %c1, %c0_26] : memref<20x20x4xf32, #tpu.memory_space<vmem>>, vector<16x16x4xf32>
    %19 = vector.extract_strided_slice %11 {offsets = [0, 1, 0], sizes = [1, 1, 4], strides = [1, 1, 1]} : vector<5x5x4xf32> to vector<1x1x4xf32>
    %20 = vector.shape_cast %19 : vector<1x1x4xf32> to vector<4xf32>
    %21 = vector.shape_cast %20 : vector<4xf32> to vector<1x1x4xf32>
    %22 = vector.broadcast %21 : vector<1x1x4xf32> to vector<16x16x4xf32>
    %23 = arith.mulf %18, %22 : vector<16x16x4xf32>
    %24 = arith.addf %17, %23 : vector<16x16x4xf32>
    %c0_27 = arith.constant 0 : index
    %c2_28 = arith.constant 2 : index
    %c0_29 = arith.constant 0 : index
    %25 = vector.load %arg6[%c0_27, %c2_28, %c0_29] : memref<20x20x4xf32, #tpu.memory_space<vmem>>, vector<16x16x4xf32>
    %26 = vector.extract_strided_slice %11 {offsets = [0, 2, 0], sizes = [1, 1, 4], strides = [1, 1, 1]} : vector<5x5x4xf32> to vector<1x1x4xf32>
    %27 = vector.shape_cast %26 : vector<1x1x4xf32> to vector<4xf32>
    %28 = vector.shape_cast %27 : vector<4xf32> to vector<1x1x4xf32>
    %29 = vector.broadcast %28 : vector<1x1x4xf32> to vector<16x16x4xf32>
    %30 = arith.mulf %25, %29 : vector<16x16x4xf32>
    %31 = arith.addf %24, %30 : vector<16x16x4xf32>
    %c0_30 = arith.constant 0 : index
    %c3 = arith.constant 3 : index
    %c0_31 = arith.constant 0 : index
    %32 = vector.load %arg6[%c0_30, %c3, %c0_31] : memref<20x20x4xf32, #tpu.memory_space<vmem>>, vector<16x16x4xf32>
    %33 = vector.extract_strided_slice %11 {offsets = [0, 3, 0], sizes = [1, 1, 4], strides = [1, 1, 1]} : vector<5x5x4xf32> to vector<1x1x4xf32>
    %34 = vector.shape_cast %33 : vector<1x1x4xf32> to vector<4xf32>
    %35 = vector.shape_cast %34 : vector<4xf32> to vector<1x1x4xf32>
    %36 = vector.broadcast %35 : vector<1x1x4xf32> to vector<16x16x4xf32>
    %37 = arith.mulf %32, %36 : vector<16x16x4xf32>
    %38 = arith.addf %31, %37 : vector<16x16x4xf32>
    %c0_32 = arith.constant 0 : index
    %c4 = arith.constant 4 : index
    %c0_33 = arith.constant 0 : index
    %39 = vector.load %arg6[%c0_32, %c4, %c0_33] : memref<20x20x4xf32, #tpu.memory_space<vmem>>, vector<16x16x4xf32>
    %40 = vector.extract_strided_slice %11 {offsets = [0, 4, 0], sizes = [1, 1, 4], strides = [1, 1, 1]} : vector<5x5x4xf32> to vector<1x1x4xf32>
    %41 = vector.shape_cast %40 : vector<1x1x4xf32> to vector<4xf32>
    %42 = vector.shape_cast %41 : vector<4xf32> to vector<1x1x4xf32>
    %43 = vector.broadcast %42 : vector<1x1x4xf32> to vector<16x16x4xf32>
    %44 = arith.mulf %39, %43 : vector<16x16x4xf32>
    %45 = arith.addf %38, %44 : vector<16x16x4xf32>
    %c1_34 = arith.constant 1 : index
    %c0_35 = arith.constant 0 : index
    %c0_36 = arith.constant 0 : index
    %46 = vector.load %arg6[%c1_34, %c0_35, %c0_36] : memref<20x20x4xf32, #tpu.memory_space<vmem>>, vector<16x16x4xf32>
    %47 = vector.extract_strided_slice %11 {offsets = [1, 0, 0], sizes = [1, 1, 4], strides = [1, 1, 1]} : vector<5x5x4xf32> to vector<1x1x4xf32>
    %48 = vector.shape_cast %47 : vector<1x1x4xf32> to vector<4xf32>
    %49 = vector.shape_cast %48 : vector<4xf32> to vector<1x1x4xf32>
    %50 = vector.broadcast %49 : vector<1x1x4xf32> to vector<16x16x4xf32>
    %51 = arith.mulf %46, %50 : vector<16x16x4xf32>
    %52 = arith.addf %45, %51 : vector<16x16x4xf32>
    %c1_37 = arith.constant 1 : index
    %c1_38 = arith.constant 1 : index
    %c0_39 = arith.constant 0 : index
    %53 = vector.load %arg6[%c1_37, %c1_38, %c0_39] : memref<20x20x4xf32, #tpu.memory_space<vmem>>, vector<16x16x4xf32>
    %54 = vector.extract_strided_slice %11 {offsets = [1, 1, 0], sizes = [1, 1, 4], strides = [1, 1, 1]} : vector<5x5x4xf32> to vector<1x1x4xf32>
    %55 = vector.shape_cast %54 : vector<1x1x4xf32> to vector<4xf32>
    %56 = vector.shape_cast %55 : vector<4xf32> to vector<1x1x4xf32>
    %57 = vector.broadcast %56 : vector<1x1x4xf32> to vector<16x16x4xf32>
    %58 = arith.mulf %53, %57 : vector<16x16x4xf32>
    %59 = arith.addf %52, %58 : vector<16x16x4xf32>
    %c1_40 = arith.constant 1 : index
    %c2_41 = arith.constant 2 : index
    %c0_42 = arith.constant 0 : index
    %60 = vector.load %arg6[%c1_40, %c2_41, %c0_42] : memref<20x20x4xf32, #tpu.memory_space<vmem>>, vector<16x16x4xf32>
    %61 = vector.extract_strided_slice %11 {offsets = [1, 2, 0], sizes = [1, 1, 4], strides = [1, 1, 1]} : vector<5x5x4xf32> to vector<1x1x4xf32>
    %62 = vector.shape_cast %61 : vector<1x1x4xf32> to vector<4xf32>
    %63 = vector.shape_cast %62 : vector<4xf32> to vector<1x1x4xf32>
    %64 = vector.broadcast %63 : vector<1x1x4xf32> to vector<16x16x4xf32>
    %65 = arith.mulf %60, %64 : vector<16x16x4xf32>
    %66 = arith.addf %59, %65 : vector<16x16x4xf32>
    %c1_43 = arith.constant 1 : index
    %c3_44 = arith.constant 3 : index
    %c0_45 = arith.constant 0 : index
    %67 = vector.load %arg6[%c1_43, %c3_44, %c0_45] : memref<20x20x4xf32, #tpu.memory_space<vmem>>, vector<16x16x4xf32>
    %68 = vector.extract_strided_slice %11 {offsets = [1, 3, 0], sizes = [1, 1, 4], strides = [1, 1, 1]} : vector<5x5x4xf32> to vector<1x1x4xf32>
    %69 = vector.shape_cast %68 : vector<1x1x4xf32> to vector<4xf32>
    %70 = vector.shape_cast %69 : vector<4xf32> to vector<1x1x4xf32>
    %71 = vector.broadcast %70 : vector<1x1x4xf32> to vector<16x16x4xf32>
    %72 = arith.mulf %67, %71 : vector<16x16x4xf32>
    %73 = arith.addf %66, %72 : vector<16x16x4xf32>
    %c1_46 = arith.constant 1 : index
    %c4_47 = arith.constant 4 : index
    %c0_48 = arith.constant 0 : index
    %74 = vector.load %arg6[%c1_46, %c4_47, %c0_48] : memref<20x20x4xf32, #tpu.memory_space<vmem>>, vector<16x16x4xf32>
    %75 = vector.extract_strided_slice %11 {offsets = [1, 4, 0], sizes = [1, 1, 4], strides = [1, 1, 1]} : vector<5x5x4xf32> to vector<1x1x4xf32>
    %76 = vector.shape_cast %75 : vector<1x1x4xf32> to vector<4xf32>
    %77 = vector.shape_cast %76 : vector<4xf32> to vector<1x1x4xf32>
    %78 = vector.broadcast %77 : vector<1x1x4xf32> to vector<16x16x4xf32>
    %79 = arith.mulf %74, %78 : vector<16x16x4xf32>
    %80 = arith.addf %73, %79 : vector<16x16x4xf32>
    %c2_49 = arith.constant 2 : index
    %c0_50 = arith.constant 0 : index
    %c0_51 = arith.constant 0 : index
    %81 = vector.load %arg6[%c2_49, %c0_50, %c0_51] : memref<20x20x4xf32, #tpu.memory_space<vmem>>, vector<16x16x4xf32>
    %82 = vector.extract_strided_slice %11 {offsets = [2, 0, 0], sizes = [1, 1, 4], strides = [1, 1, 1]} : vector<5x5x4xf32> to vector<1x1x4xf32>
    %83 = vector.shape_cast %82 : vector<1x1x4xf32> to vector<4xf32>
    %84 = vector.shape_cast %83 : vector<4xf32> to vector<1x1x4xf32>
    %85 = vector.broadcast %84 : vector<1x1x4xf32> to vector<16x16x4xf32>
    %86 = arith.mulf %81, %85 : vector<16x16x4xf32>
    %87 = arith.addf %80, %86 : vector<16x16x4xf32>
    %c2_52 = arith.constant 2 : index
    %c1_53 = arith.constant 1 : index
    %c0_54 = arith.constant 0 : index
    %88 = vector.load %arg6[%c2_52, %c1_53, %c0_54] : memref<20x20x4xf32, #tpu.memory_space<vmem>>, vector<16x16x4xf32>
    %89 = vector.extract_strided_slice %11 {offsets = [2, 1, 0], sizes = [1, 1, 4], strides = [1, 1, 1]} : vector<5x5x4xf32> to vector<1x1x4xf32>
    %90 = vector.shape_cast %89 : vector<1x1x4xf32> to vector<4xf32>
    %91 = vector.shape_cast %90 : vector<4xf32> to vector<1x1x4xf32>
    %92 = vector.broadcast %91 : vector<1x1x4xf32> to vector<16x16x4xf32>
    %93 = arith.mulf %88, %92 : vector<16x16x4xf32>
    %94 = arith.addf %87, %93 : vector<16x16x4xf32>
    %c2_55 = arith.constant 2 : index
    %c2_56 = arith.constant 2 : index
    %c0_57 = arith.constant 0 : index
    %95 = vector.load %arg6[%c2_55, %c2_56, %c0_57] : memref<20x20x4xf32, #tpu.memory_space<vmem>>, vector<16x16x4xf32>
    %96 = vector.extract_strided_slice %11 {offsets = [2, 2, 0], sizes = [1, 1, 4], strides = [1, 1, 1]} : vector<5x5x4xf32> to vector<1x1x4xf32>
    %97 = vector.shape_cast %96 : vector<1x1x4xf32> to vector<4xf32>
    %98 = vector.shape_cast %97 : vector<4xf32> to vector<1x1x4xf32>
    %99 = vector.broadcast %98 : vector<1x1x4xf32> to vector<16x16x4xf32>
    %100 = arith.mulf %95, %99 : vector<16x16x4xf32>
    %101 = arith.addf %94, %100 : vector<16x16x4xf32>
    %c2_58 = arith.constant 2 : index
    %c3_59 = arith.constant 3 : index
    %c0_60 = arith.constant 0 : index
    %102 = vector.load %arg6[%c2_58, %c3_59, %c0_60] : memref<20x20x4xf32, #tpu.memory_space<vmem>>, vector<16x16x4xf32>
    %103 = vector.extract_strided_slice %11 {offsets = [2, 3, 0], sizes = [1, 1, 4], strides = [1, 1, 1]} : vector<5x5x4xf32> to vector<1x1x4xf32>
    %104 = vector.shape_cast %103 : vector<1x1x4xf32> to vector<4xf32>
    %105 = vector.shape_cast %104 : vector<4xf32> to vector<1x1x4xf32>
    %106 = vector.broadcast %105 : vector<1x1x4xf32> to vector<16x16x4xf32>
    %107 = arith.mulf %102, %106 : vector<16x16x4xf32>
    %108 = arith.addf %101, %107 : vector<16x16x4xf32>
    %c2_61 = arith.constant 2 : index
    %c4_62 = arith.constant 4 : index
    %c0_63 = arith.constant 0 : index
    %109 = vector.load %arg6[%c2_61, %c4_62, %c0_63] : memref<20x20x4xf32, #tpu.memory_space<vmem>>, vector<16x16x4xf32>
    %110 = vector.extract_strided_slice %11 {offsets = [2, 4, 0], sizes = [1, 1, 4], strides = [1, 1, 1]} : vector<5x5x4xf32> to vector<1x1x4xf32>
    %111 = vector.shape_cast %110 : vector<1x1x4xf32> to vector<4xf32>
    %112 = vector.shape_cast %111 : vector<4xf32> to vector<1x1x4xf32>
    %113 = vector.broadcast %112 : vector<1x1x4xf32> to vector<16x16x4xf32>
    %114 = arith.mulf %109, %113 : vector<16x16x4xf32>
    %115 = arith.addf %108, %114 : vector<16x16x4xf32>
    %c3_64 = arith.constant 3 : index
    %c0_65 = arith.constant 0 : index
    %c0_66 = arith.constant 0 : index
    %116 = vector.load %arg6[%c3_64, %c0_65, %c0_66] : memref<20x20x4xf32, #tpu.memory_space<vmem>>, vector<16x16x4xf32>
    %117 = vector.extract_strided_slice %11 {offsets = [3, 0, 0], sizes = [1, 1, 4], strides = [1, 1, 1]} : vector<5x5x4xf32> to vector<1x1x4xf32>
    %118 = vector.shape_cast %117 : vector<1x1x4xf32> to vector<4xf32>
    %119 = vector.shape_cast %118 : vector<4xf32> to vector<1x1x4xf32>
    %120 = vector.broadcast %119 : vector<1x1x4xf32> to vector<16x16x4xf32>
    %121 = arith.mulf %116, %120 : vector<16x16x4xf32>
    %122 = arith.addf %115, %121 : vector<16x16x4xf32>
    %c3_67 = arith.constant 3 : index
    %c1_68 = arith.constant 1 : index
    %c0_69 = arith.constant 0 : index
    %123 = vector.load %arg6[%c3_67, %c1_68, %c0_69] : memref<20x20x4xf32, #tpu.memory_space<vmem>>, vector<16x16x4xf32>
    %124 = vector.extract_strided_slice %11 {offsets = [3, 1, 0], sizes = [1, 1, 4], strides = [1, 1, 1]} : vector<5x5x4xf32> to vector<1x1x4xf32>
    %125 = vector.shape_cast %124 : vector<1x1x4xf32> to vector<4xf32>
    %126 = vector.shape_cast %125 : vector<4xf32> to vector<1x1x4xf32>
    %127 = vector.broadcast %126 : vector<1x1x4xf32> to vector<16x16x4xf32>
    %128 = arith.mulf %123, %127 : vector<16x16x4xf32>
    %129 = arith.addf %122, %128 : vector<16x16x4xf32>
    %c3_70 = arith.constant 3 : index
    %c2_71 = arith.constant 2 : index
    %c0_72 = arith.constant 0 : index
    %130 = vector.load %arg6[%c3_70, %c2_71, %c0_72] : memref<20x20x4xf32, #tpu.memory_space<vmem>>, vector<16x16x4xf32>
    %131 = vector.extract_strided_slice %11 {offsets = [3, 2, 0], sizes = [1, 1, 4], strides = [1, 1, 1]} : vector<5x5x4xf32> to vector<1x1x4xf32>
    %132 = vector.shape_cast %131 : vector<1x1x4xf32> to vector<4xf32>
    %133 = vector.shape_cast %132 : vector<4xf32> to vector<1x1x4xf32>
    %134 = vector.broadcast %133 : vector<1x1x4xf32> to vector<16x16x4xf32>
    %135 = arith.mulf %130, %134 : vector<16x16x4xf32>
    %136 = arith.addf %129, %135 : vector<16x16x4xf32>
    %c3_73 = arith.constant 3 : index
    %c3_74 = arith.constant 3 : index
    %c0_75 = arith.constant 0 : index
    %137 = vector.load %arg6[%c3_73, %c3_74, %c0_75] : memref<20x20x4xf32, #tpu.memory_space<vmem>>, vector<16x16x4xf32>
    %138 = vector.extract_strided_slice %11 {offsets = [3, 3, 0], sizes = [1, 1, 4], strides = [1, 1, 1]} : vector<5x5x4xf32> to vector<1x1x4xf32>
    %139 = vector.shape_cast %138 : vector<1x1x4xf32> to vector<4xf32>
    %140 = vector.shape_cast %139 : vector<4xf32> to vector<1x1x4xf32>
    %141 = vector.broadcast %140 : vector<1x1x4xf32> to vector<16x16x4xf32>
    %142 = arith.mulf %137, %141 : vector<16x16x4xf32>
    %143 = arith.addf %136, %142 : vector<16x16x4xf32>
    %c3_76 = arith.constant 3 : index
    %c4_77 = arith.constant 4 : index
    %c0_78 = arith.constant 0 : index
    %144 = vector.load %arg6[%c3_76, %c4_77, %c0_78] : memref<20x20x4xf32, #tpu.memory_space<vmem>>, vector<16x16x4xf32>
    %145 = vector.extract_strided_slice %11 {offsets = [3, 4, 0], sizes = [1, 1, 4], strides = [1, 1, 1]} : vector<5x5x4xf32> to vector<1x1x4xf32>
    %146 = vector.shape_cast %145 : vector<1x1x4xf32> to vector<4xf32>
    %147 = vector.shape_cast %146 : vector<4xf32> to vector<1x1x4xf32>
    %148 = vector.broadcast %147 : vector<1x1x4xf32> to vector<16x16x4xf32>
    %149 = arith.mulf %144, %148 : vector<16x16x4xf32>
    %150 = arith.addf %143, %149 : vector<16x16x4xf32>
    %c4_79 = arith.constant 4 : index
    %c0_80 = arith.constant 0 : index
    %c0_81 = arith.constant 0 : index
    %151 = vector.load %arg6[%c4_79, %c0_80, %c0_81] : memref<20x20x4xf32, #tpu.memory_space<vmem>>, vector<16x16x4xf32>
    %152 = vector.extract_strided_slice %11 {offsets = [4, 0, 0], sizes = [1, 1, 4], strides = [1, 1, 1]} : vector<5x5x4xf32> to vector<1x1x4xf32>
    %153 = vector.shape_cast %152 : vector<1x1x4xf32> to vector<4xf32>
    %154 = vector.shape_cast %153 : vector<4xf32> to vector<1x1x4xf32>
    %155 = vector.broadcast %154 : vector<1x1x4xf32> to vector<16x16x4xf32>
    %156 = arith.mulf %151, %155 : vector<16x16x4xf32>
    %157 = arith.addf %150, %156 : vector<16x16x4xf32>
    %c4_82 = arith.constant 4 : index
    %c1_83 = arith.constant 1 : index
    %c0_84 = arith.constant 0 : index
    %158 = vector.load %arg6[%c4_82, %c1_83, %c0_84] : memref<20x20x4xf32, #tpu.memory_space<vmem>>, vector<16x16x4xf32>
    %159 = vector.extract_strided_slice %11 {offsets = [4, 1, 0], sizes = [1, 1, 4], strides = [1, 1, 1]} : vector<5x5x4xf32> to vector<1x1x4xf32>
    %160 = vector.shape_cast %159 : vector<1x1x4xf32> to vector<4xf32>
    %161 = vector.shape_cast %160 : vector<4xf32> to vector<1x1x4xf32>
    %162 = vector.broadcast %161 : vector<1x1x4xf32> to vector<16x16x4xf32>
    %163 = arith.mulf %158, %162 : vector<16x16x4xf32>
    %164 = arith.addf %157, %163 : vector<16x16x4xf32>
    %c4_85 = arith.constant 4 : index
    %c2_86 = arith.constant 2 : index
    %c0_87 = arith.constant 0 : index
    %165 = vector.load %arg6[%c4_85, %c2_86, %c0_87] : memref<20x20x4xf32, #tpu.memory_space<vmem>>, vector<16x16x4xf32>
    %166 = vector.extract_strided_slice %11 {offsets = [4, 2, 0], sizes = [1, 1, 4], strides = [1, 1, 1]} : vector<5x5x4xf32> to vector<1x1x4xf32>
    %167 = vector.shape_cast %166 : vector<1x1x4xf32> to vector<4xf32>
    %168 = vector.shape_cast %167 : vector<4xf32> to vector<1x1x4xf32>
    %169 = vector.broadcast %168 : vector<1x1x4xf32> to vector<16x16x4xf32>
    %170 = arith.mulf %165, %169 : vector<16x16x4xf32>
    %171 = arith.addf %164, %170 : vector<16x16x4xf32>
    %c4_88 = arith.constant 4 : index
    %c3_89 = arith.constant 3 : index
    %c0_90 = arith.constant 0 : index
    %172 = vector.load %arg6[%c4_88, %c3_89, %c0_90] : memref<20x20x4xf32, #tpu.memory_space<vmem>>, vector<16x16x4xf32>
    %173 = vector.extract_strided_slice %11 {offsets = [4, 3, 0], sizes = [1, 1, 4], strides = [1, 1, 1]} : vector<5x5x4xf32> to vector<1x1x4xf32>
    %174 = vector.shape_cast %173 : vector<1x1x4xf32> to vector<4xf32>
    %175 = vector.shape_cast %174 : vector<4xf32> to vector<1x1x4xf32>
    %176 = vector.broadcast %175 : vector<1x1x4xf32> to vector<16x16x4xf32>
    %177 = arith.mulf %172, %176 : vector<16x16x4xf32>
    %178 = arith.addf %171, %177 : vector<16x16x4xf32>
    %c4_91 = arith.constant 4 : index
    %c4_92 = arith.constant 4 : index
    %c0_93 = arith.constant 0 : index
    %179 = vector.load %arg6[%c4_91, %c4_92, %c0_93] : memref<20x20x4xf32, #tpu.memory_space<vmem>>, vector<16x16x4xf32>
    %180 = vector.extract_strided_slice %11 {offsets = [4, 4, 0], sizes = [1, 1, 4], strides = [1, 1, 1]} : vector<5x5x4xf32> to vector<1x1x4xf32>
    %181 = vector.shape_cast %180 : vector<1x1x4xf32> to vector<4xf32>
    %182 = vector.shape_cast %181 : vector<4xf32> to vector<1x1x4xf32>
    %183 = vector.broadcast %182 : vector<1x1x4xf32> to vector<16x16x4xf32>
    %184 = arith.mulf %179, %183 : vector<16x16x4xf32>
    %185 = arith.addf %178, %184 : vector<16x16x4xf32>
    %c0_94 = arith.constant 0 : index
    %c0_95 = arith.constant 0 : index
    %c0_96 = arith.constant 0 : index
    %186 = vector.load %arg4[%c0_94, %c0_95, %c0_96] : memref<1x1x4xf32, #tpu.memory_space<vmem>>, vector<1x1x4xf32>
    %187 = vector.broadcast %186 : vector<1x1x4xf32> to vector<16x16x4xf32>
    %188 = arith.addf %185, %187 : vector<16x16x4xf32>
    %c0_97 = arith.constant 0 : index
    %c0_98 = arith.constant 0 : index
    %c0_99 = arith.constant 0 : index
    %c0_100 = arith.constant 0 : index
    %189 = vector.load %arg5[%c0_97, %c0_98, %c0_99, %c0_100] : memref<1x16x16x4xf32, #tpu.memory_space<vmem>>, vector<1x16x16x4xf32>
    %190 = vector.shape_cast %189 : vector<1x16x16x4xf32> to vector<16x16x4xf32>
    %191 = vector.shape_cast %188 : vector<16x16x4xf32> to vector<1x16x16x4xf32>
    tpu.vector_store %arg5[%c0_97, %c0_98, %c0_99, %c0_100], %191 {strides = array<i32>} : memref<1x16x16x4xf32, #tpu.memory_space<vmem>>, vector<1x16x16x4xf32>,
    return
  }
  func.func @transform_0(%arg0: i32, %arg1: i32) -> (i32, i32, i32, i32) {
    %c0_i32 = arith.constant 0 : i32
    %c0_i32_0 = arith.constant 0 : i32
    %c0_i32_1 = arith.constant 0 : i32
    return %arg0, %c0_i32, %c0_i32_0, %arg1 : i32, i32, i32, i32
  }
  func.func @transform_1(%arg0: i32, %arg1: i32) -> (i32, i32, i32) {
    %c0_i32 = arith.constant 0 : i32
    %c0_i32_0 = arith.constant 0 : i32
    %c0_i32_1 = arith.constant 0 : i32
    return %c0_i32, %c0_i32_0, %arg1 : i32, i32, i32
  }
  func.func @transform_2(%arg0: i32, %arg1: i32) -> (i32, i32, i32) {
    %c0_i32 = arith.constant 0 : i32
    %c0_i32_0 = arith.constant 0 : i32
    %c0_i32_1 = arith.constant 0 : i32
    return %c0_i32, %c0_i32_0, %arg1 : i32, i32, i32
  }
  func.func @transform_3(%arg0: i32, %arg1: i32) -> (i32, i32, i32, i32) {
    %c0_i32 = arith.constant 0 : i32
    %c0_i32_0 = arith.constant 0 : i32
    %c0_i32_1 = arith.constant 0 : i32
    return %arg0, %c0_i32, %c0_i32_0, %arg1 : i32, i32, i32, i32
  }
}

</mosaic_0001>

<bundles_post_ra>
// kernel: a_call__.1
= control target key start
LH: loop header
LB: loop body
LE: loop exit
PB: predicated region body
PF: predicated region fallthrough
CT: control target
= control target key end

     0   :  { %s3122_s12 = smov 0   ;;  %s3124_s13 = smov 0   ;;  %s5238_s0 = inlined_call_operand.vmem [shape: f32[2,16,16,4], index: 0, kind: input, shape index: {}]   ;;  %s5239_s1 = inlined_call_operand.vmem [shape: f32[5,5,4], index: 1, kind: input, shape index: {}]   ;;  %s5240_s2 = inlined_call_operand.vmem [shape: f32[1,1,4], index: 2, kind: input, shape index: {}]   ;;  %s5241_s3 = inlined_call_operand.vmem [shape: f32[2,16,16,4], index: 3, kind: output, shape index: {}]  }
   0x1   :  { %s3126_s14 = smov 0  }
   0x2 LB: > { %s25_s15 = sadd.s32 1, %s3095_s13  ;;  %p3010_p0 = scmp.ge.s32.totalorder %s3099_s14, 1  ;;  %s3099_s14 = sphi %s3126_s14, %s13_s14   ;;  %s3095_s13 = sphi %s3124_s13, %s5407_s13   ;;  %s3091_s12 = sphi %s3122_s12, %s5406_s12  }
   0x3   : > { %p27_p1 = scmp.ge.s32.totalorder %s25_s15, 2  ;;  %p173_p2 = scmp.lt.s32.totalorder %s3099_s14, 3 }
   0x5   : > { %s5409_s15 = smov (%p27_p1, %s25_s15), 0  ;;  %p174_p3 = pnand %p3010_p0, %p173_p2 }
   0x7   : > { %177 = sbr.rel (%p174_p3) target bundleno = 458 (0x1ca), region = 32 }
   0xe   : > { %vm233_vm0 = vcmask 31744   ;;  %v383_v0 = vlaneseq  ;;  %vm236_vm1 = vcmask 27648   ;;  %p210_p4 = scmp.lt.s32.totalorder %s3091_s12, 1  ;;  %v3101_v1 = vmov 0.0   ;;  %v346_v3 = vld [vmem:[%s5239_s1] sm:$0x1f] }
   0xf   : > { %234 = vst.msk [vmem:[#allocation2] sm:$0xff] %vm233_vm0, %v3101_v1  ;;  %235 = vst.msk [vmem:[#allocation2 + $0x8] sm:$0xff] %vm233_vm0, %v3101_v1  ;;  %vm249_vm2 = vcmask 25600   ;;  %v3233_v22 = vld [vmem:[%s5239_s1 + $0x8] sm:$0x1f] }
  0x10   : > { %238 = vst.msk [vmem:[#allocation2 + $0x18] sm:$0xff] %vm233_vm0, %v3101_v1  ;;  %239 = vst.msk [vmem:[#allocation2 + $0x20] sm:$0xff] %vm233_vm0, %v3101_v1  ;;  %v384_v2 = vshrl.u32 %v383_v0, 7  ;;  %s5411_s12 = smov (!%p210_p4, %s3091_s12), 1 }
  0x11   : > { %242 = vst.msk [vmem:[#allocation2 + $0x1b0] sm:$0xff] %vm233_vm0, %v3101_v1  ;;  %243 = vst.msk [vmem:[#allocation2 + $0x1b8] sm:$0xff] %vm233_vm0, %v3101_v1  ;;  %s3018_s18 = sshll.u32 %s5411_s12, 8 }
  0x12   : > { %245 = vst.msk [vmem:[#allocation2 + $0x1c8] sm:$0xff] %vm233_vm0, %v3101_v1  ;;  %246 = vst.msk [vmem:[#allocation2 + $0x1d0] sm:$0xff] %vm233_vm0, %v3101_v1  ;;  %v3191_v4 = vsub.s32 0, %v384_v2  ;;  %v3193_v5 = vsub.s32 1, %v384_v2  ;;  %v3195_v6 = vsub.s32 2, %v384_v2  ;;  %v3197_v7 = vsub.s32 3, %v384_v2  ;;  %s3205_s21 = scalar_lea.vmem %s5238_s0, %s3018_s18  ;;  %s4397_s9 = scalar_lea.vmem %s5241_s3, %s3018_s18 }
  0x13   : > { %237 = vst.msk [vmem:[#allocation2 + $0x10] sm:$0xf] %vm236_vm1, %v3101_v1  ;;  %240 = vst.msk [vmem:[#allocation2 + $0x28] sm:$0xf] %vm236_vm1, %v3101_v1  ;;  %v3213_v10 = vsub.s32 4, %v384_v2  ;;  %v282_v11 = vld [vmem:[%s3205_s21] sm:$0xff] }
  0x14   : > { %244 = vst.msk [vmem:[#allocation2 + $0x1c0] sm:$0xf] %vm236_vm1, %v3101_v1  ;;  %247 = vst.msk [vmem:[#allocation2 + $0x1d8] sm:$0xf] %vm236_vm1, %v3101_v1  ;;  %v3208_v8 = vrot.slane %v346_v3, %v3191_v4  ;;  %v3211_v9 = vrot.slane %v346_v3, %v3193_v5  ;;  %v283_v12 = vld [vmem:[%s3205_s21 + $0x8] sm:$0xff]  ;;  %v284_v13 = vld [vmem:[%s3205_s21 + $0x10] sm:$0xff]  ;;  %v3219_v14 = vrot.slane %v346_v3, %v3195_v6 }
  0x15   : > { %250 = vst.msk [vmem:[#allocation2 + $0x30] sm:$0x3] %vm249_vm2, %v3101_v1  ;;  %251 = vst.msk [vmem:[#allocation2 + $0x48] sm:$0x3] %vm249_vm2, %v3101_v1  ;;  %v285_v15 = vld [vmem:[%s3205_s21 + $0x18] sm:$0xff]  ;;  %v286_v16 = vld [vmem:[%s3205_s21 + $0x20] sm:$0xff]  ;;  %v3228_v21 = vrot.slane %v346_v3, %v3197_v7  ;;  %v3245_v33 = vrot.slane %v346_v3, %v3213_v10  ;;  %v3263_v51 = vrot.slane %v3233_v22, %v3191_v4 }
  0x16   : > { %252 = vst.msk [vmem:[#allocation2 + $0x60] sm:$0x3] %vm249_vm2, %v3101_v1  ;;  %253 = vst.msk [vmem:[#allocation2 + $0x78] sm:$0x3] %vm249_vm2, %v3101_v1  ;;  %v287_v17 = vld [vmem:[%s3205_s21 + $0x28] sm:$0xff]  ;;  %v351_v18 = vld [vmem:[#allocation2] sm:$0xff]  ;;  %v3276_v0 = vrot.slane %v3233_v22, %v3193_v5 }
  0x17   : > { %254 = vst.msk [vmem:[#allocation2 + $0x90] sm:$0x3] %vm249_vm2, %v3101_v1  ;;  %255 = vst.msk [vmem:[#allocation2 + $0xa8] sm:$0x3] %vm249_vm2, %v3101_v1  ;;  %v352_v19 = vld [vmem:[#allocation2 + $0x8] sm:$0xff]  ;;  %v353_v20 = vld [vmem:[#allocation2 + $0x18] sm:$0xff]  ;;  %v387_v23 = vmul.f32 %v3208_v8, %v351_v18 }
  0x18   : > { %256 = vst.msk [vmem:[#allocation2 + $0xc0] sm:$0x3] %vm249_vm2, %v3101_v1  ;;  %257 = vst.msk [vmem:[#allocation2 + $0xd8] sm:$0x3] %vm249_vm2, %v3101_v1  ;;  %v354_v24 = vld [vmem:[#allocation2 + $0x20] sm:$0xff]  ;;  %v389_v25 = vmul.f32 %v3208_v8, %v353_v20  ;;  %v388_v34 = vmul.f32 %v3208_v8, %v352_v19 }
  0x19   : > { %258 = vst.msk [vmem:[#allocation2 + $0xf0] sm:$0x3] %vm249_vm2, %v3101_v1  ;;  %259 = vst.msk [vmem:[#allocation2 + $0x108] sm:$0x3] %vm249_vm2, %v3101_v1  ;;  %v419_v26 = vld [vmem:[#allocation2 + $0x1] sm:$0xff]  ;;  %v421_v27 = vld [vmem:[#allocation2 + $0x19] sm:$0xff]  ;;  %v390_v39 = vmul.f32 %v3208_v8, %v354_v24 }
  0x1a   : > { %260 = vst.msk [vmem:[#allocation2 + $0x120] sm:$0x3] %vm249_vm2, %v3101_v1  ;;  %261 = vst.msk [vmem:[#allocation2 + $0x138] sm:$0x3] %vm249_vm2, %v3101_v1  ;;  %v455_v28 = vmul.f32 %v3211_v9, %v419_v26  ;;  %v457_v29 = vmul.f32 %v3211_v9, %v421_v27  ;;  %v519_v30 = vld [vmem:[#allocation2 + $0x2] sm:$0xff]  ;;  %v3242_v31 = vld [vmem:[#allocation2 + $0x1a] sm:$0xff] }
  0x1b   : > { %262 = vst.msk [vmem:[#allocation2 + $0x150] sm:$0x3] %vm249_vm2, %v3101_v1  ;;  %263 = vst.msk [vmem:[#allocation2 + $0x168] sm:$0x3] %vm249_vm2, %v3101_v1  ;;  %v619_v32 = vld [vmem:[#allocation2 + $0x3] sm:$0xff]  ;;  %v555_v35 = vmul.f32 %v3219_v14, %v519_v30  ;;  %v557_v36 = vmul.f32 %v3219_v14, %v3242_v31  ;;  %v3251_v37 = vld [vmem:[#allocation2 + $0x1b] sm:$0xff]  ;;  %v3297_v30 = vrot.slane %v3233_v22, %v3195_v6 }
  0x1c   : > { %264 = vst.msk [vmem:[#allocation2 + $0x180] sm:$0x3] %vm249_vm2, %v3101_v1  ;;  %265 = vst.msk [vmem:[#allocation2 + $0x198] sm:$0x3] %vm249_vm2, %v3101_v1  ;;  %v719_v38 = vld [vmem:[#allocation2 + $0x4] sm:$0xff]  ;;  %v487_v40 = vadd.f32 %v455_v28, %v387_v23  ;;  %v489_v41 = vadd.f32 %v457_v29, %v389_v25  ;;  %v655_v42 = vmul.f32 %v3228_v21, %v619_v32  ;;  %v3265_v54 = vld [vmem:[#allocation2 + $0x1c] sm:$0xff] }
  0x1d   : > { %266 = vst.msk [vmem:[#allocation2 + $0x42] sm:$0x3] %vm249_vm2, %v3101_v1  ;;  %267 = vst.msk [vmem:[#allocation2 + $0x5a] sm:$0x3] %vm249_vm2, %v3101_v1  ;;  %v420_v43 = vld [vmem:[#allocation2 + $0x9] sm:$0xff]  ;;  %v657_v46 = vmul.f32 %v3228_v21, %v3251_v37  ;;  %v422_v49 = vld [vmem:[#allocation2 + $0x21] sm:$0xff]  ;;  %v755_v55 = vmul.f32 %v3245_v33, %v719_v38  ;;  %v757_v3 = vmul.f32 %v3245_v33, %v3265_v54 }
  0x1e   : > { %268 = vst.msk [vmem:[#allocation2 + $0x72] sm:$0x3] %vm249_vm2, %v3101_v1  ;;  %269 = vst.msk [vmem:[#allocation2 + $0x8a] sm:$0x3] %vm249_vm2, %v3101_v1  ;;  %v520_v44 = vld [vmem:[#allocation2 + $0xa] sm:$0xff]  ;;  %v456_v47 = vmul.f32 %v3211_v9, %v420_v43  ;;  %v3259_v50 = vld [vmem:[#allocation2 + $0x22] sm:$0xff]  ;;  %v587_v52 = vadd.f32 %v555_v35, %v487_v40  ;;  %v589_v53 = vadd.f32 %v557_v36, %v489_v41 }
  0x1f   : > { %270 = vst.msk [vmem:[#allocation2 + $0xa2] sm:$0x3] %vm249_vm2, %v3101_v1  ;;  %271 = vst.msk [vmem:[#allocation2 + $0xba] sm:$0x3] %vm249_vm2, %v3101_v1  ;;  %v620_v45 = vld [vmem:[#allocation2 + $0xb] sm:$0xff]  ;;  %v556_v48 = vmul.f32 %v3219_v14, %v520_v44  ;;  %v458_v57 = vmul.f32 %v3211_v9, %v422_v49  ;;  %v558_v60 = vmul.f32 %v3219_v14, %v3259_v50  ;;  %v3272_v63 = vld [vmem:[#allocation2 + $0x23] sm:$0xff] }
  0x20   : > { %272 = vst.msk [vmem:[#allocation2 + $0xd2] sm:$0x3] %vm249_vm2, %v3101_v1  ;;  %273 = vst.msk [vmem:[#allocation2 + $0xea] sm:$0x3] %vm249_vm2, %v3101_v1  ;;  %v720_v56 = vld [vmem:[#allocation2 + $0xc] sm:$0xff]  ;;  %v488_v58 = vadd.f32 %v456_v47, %v388_v34  ;;  %v656_v59 = vmul.f32 %v3228_v21, %v620_v45  ;;  %v687_v61 = vadd.f32 %v655_v42, %v587_v52  ;;  %v3288_v23 = vld [vmem:[#allocation2 + $0x24] sm:$0xff] }
  0x21   : > { %274 = vst.msk [vmem:[#allocation2 + $0x102] sm:$0x3] %vm249_vm2, %v3101_v1  ;;  %275 = vst.msk [vmem:[#allocation2 + $0x11a] sm:$0x3] %vm249_vm2, %v3101_v1  ;;  %v490_v62 = vadd.f32 %v458_v57, %v390_v39  ;;  %v689_v2 = vadd.f32 %v657_v46, %v589_v53  ;;  %v658_v19 = vmul.f32 %v3228_v21, %v3272_v63  ;;  %v348_v40 = vld [vmem:[%s5239_s1 + $0x10] sm:$0x1f] }
  0x22   : > { %276 = vst.msk [vmem:[#allocation2 + $0x132] sm:$0x3] %vm249_vm2, %v3101_v1  ;;  %277 = vst.msk [vmem:[#allocation2 + $0x14a] sm:$0x3] %vm249_vm2, %v3101_v1  ;;  %v956_v29 = vmul.f32 %v3276_v0, %v421_v27  ;;  %v857_v36 = vmul.f32 %v3263_v51, %v354_v24  ;;  %v758_v39 = vmul.f32 %v3245_v33, %v3288_v23 }
  0x23   : > { %278 = vst.msk [vmem:[#allocation2 + $0x162] sm:$0x3] %vm249_vm2, %v3101_v1  ;;  %279 = vst.msk [vmem:[#allocation2 + $0x17a] sm:$0x3] %vm249_vm2, %v3101_v1  ;;  %v590_v18 = vadd.f32 %v558_v60, %v490_v62  ;;  %v789_v34 = vadd.f32 %v757_v3, %v689_v2  ;;  %v1056_v47 = vmul.f32 %v3297_v30, %v3242_v31  ;;  %v290_v62 = vld [vmem:[%s3205_s21 + $0x40] sm:$0xff]  ;;  %v291_v2 = vld [vmem:[%s3205_s21 + $0x48] sm:$0xff] }
  0x24   : > { %280 = vst.msk [vmem:[#allocation2 + $0x192] sm:$0x3] %vm249_vm2, %v3101_v1  ;;  %281 = vst.msk [vmem:[#allocation2 + $0x1aa] sm:$0x3] %vm249_vm2, %v3101_v1  ;;  %v957_v57 = vmul.f32 %v3276_v0, %v422_v49  ;;  %v3336_v31 = vrot.slane %v348_v40, %v3191_v4  ;;  %v3345_v49 = vrot.slane %v348_v40, %v3193_v5 }
  0x25   : > { %314 = vst.msk [vmem:[#allocation2 + $0x32] sm:$0xff] %vm233_vm0, %v282_v11  ;;  %315 = vst.msk [vmem:[#allocation2 + $0x3a] sm:$0xff] %vm233_vm0, %v283_v12  ;;  %v588_v11 = vadd.f32 %v556_v48, %v488_v58  ;;  %v756_v12 = vmul.f32 %v3245_v33, %v720_v56  ;;  %v690_v43 = vadd.f32 %v658_v19, %v590_v18  ;;  %v288_v56 = vld [vmem:[%s3205_s21 + $0x30] sm:$0xff] }
  0x26   : > { %316 = vst.msk [vmem:[#allocation2 + $0x4a] sm:$0xff] %vm233_vm0, %v284_v13  ;;  %317 = vst.msk [vmem:[#allocation2 + $0x52] sm:$0xff] %vm233_vm0, %v285_v15  ;;  %v787_v15 = vadd.f32 %v755_v55, %v687_v61  ;;  %v3323_v48 = vrot.slane %v3233_v22, %v3197_v7  ;;  %v3333_v58 = vrot.slane %v3233_v22, %v3213_v10  ;;  %v289_v61 = vld [vmem:[%s3205_s21 + $0x38] sm:$0xff] }
  0x27   : > { %318 = vst.msk [vmem:[#allocation2 + $0x62] sm:$0xff] %vm233_vm0, %v286_v16  ;;  %319 = vst.msk [vmem:[#allocation2 + $0x6a] sm:$0xff] %vm233_vm0, %v287_v17  ;;  %v856_v16 = vmul.f32 %v3263_v51, %v353_v20  ;;  %v688_v17 = vadd.f32 %v656_v59, %v588_v11  ;;  %v790_v18 = vadd.f32 %v758_v39, %v690_v43  ;;  %v298_v43 = vld [vmem:[%s3205_s21 + $0x80] sm:$0xff] }
  0x28   : > { %320 = vst.msk [vmem:[#allocation2 + $0x7a] sm:$0xff] %vm233_vm0, %v288_v56  ;;  %321 = vst.msk [vmem:[#allocation2 + $0x82] sm:$0xff] %vm233_vm0, %v289_v61  ;;  %v1057_v39 = vmul.f32 %v3297_v30, %v3259_v50  ;;  %v1157_v40 = vmul.f32 %v3323_v48, %v3272_v63  ;;  %v299_v50 = vld [vmem:[%s3205_s21 + $0x88] sm:$0xff] }
  0x29   : > { %v888_v28 = vadd.f32 %v856_v16, %v787_v15  ;;  %v788_v35 = vadd.f32 %v756_v12, %v688_v17  ;;  %322 = vst.msk [vmem:[#allocation2 + $0x92] sm:$0xff] %vm233_vm0, %v290_v62  ;;  %323 = vst.msk [vmem:[#allocation2 + $0x9a] sm:$0xff] %vm233_vm0, %v291_v2  ;;  %v292_v15 = vld [vmem:[%s3205_s21 + $0x50] sm:$0xff]  ;;  %v293_v16 = vld [vmem:[%s3205_s21 + $0x58] sm:$0xff] }
  0x2a   : > { %v294_v17 = vld [vmem:[%s3205_s21 + $0x60] sm:$0xff]  ;;  %324 = vst.msk [vmem:[#allocation2 + $0xaa] sm:$0xff] %vm233_vm0, %v292_v15  ;;  %325 = vst.msk [vmem:[#allocation2 + $0xb2] sm:$0xff] %vm233_vm0, %v293_v16  ;;  %v303_v56 = vld [vmem:[%s3205_s21 + $0xa8] sm:$0xff] }
  0x2b   : > { %v988_v27 = vadd.f32 %v956_v29, %v888_v28  ;;  %v889_v44 = vadd.f32 %v857_v36, %v788_v35  ;;  %326 = vst.msk [vmem:[#allocation2 + $0xc2] sm:$0xff] %vm233_vm0, %v294_v17  ;;  %v296_v35 = vld [vmem:[%s3205_s21 + $0x70] sm:$0xff]  ;;  %v297_v36 = vld [vmem:[%s3205_s21 + $0x78] sm:$0xff]  ;;  %330 = vst.msk [vmem:[#allocation2 + $0xf2] sm:$0xff] %vm233_vm0, %v298_v43 }
  0x2c   : > { %v3278_v1 = vld [vmem:[#allocation2 + $0x30] sm:$0xff]  ;;  %v3301_v32 = vld [vmem:[#allocation2 + $0x38] sm:$0xff]  ;;  %328 = vst.msk [vmem:[#allocation2 + $0xda] sm:$0xff] %vm233_vm0, %v296_v35  ;;  %329 = vst.msk [vmem:[#allocation2 + $0xe2] sm:$0xff] %vm233_vm0, %v297_v36 }
  0x2d   : > { %v3283_v13 = vld [vmem:[#allocation2 + $0x31] sm:$0xff]  ;;  %v391_v25 = vmul.f32 %v3208_v8, %v3278_v1  ;;  %v3304_v38 = vld [vmem:[#allocation2 + $0x39] sm:$0xff]  ;;  %v858_v24 = vmul.f32 %v3263_v51, %v3278_v1  ;;  %v392_v45 = vmul.f32 %v3208_v8, %v3301_v32  ;;  %v1088_v3 = vadd.f32 %v1056_v47, %v988_v27  ;;  %v3361_v29 = vld [vmem:[#allocation2 + $0x48] sm:$0xff]  ;;  %331 = vst.msk [vmem:[#allocation2 + $0xfa] sm:$0xff] %vm233_vm0, %v299_v50 }
  0x2e   : > { %v3292_v26 = vld [vmem:[#allocation2 + $0x32] sm:$0xff]  ;;  %v459_v20 = vmul.f32 %v3211_v9, %v3283_v13  ;;  %v460_v53 = vmul.f32 %v3211_v9, %v3304_v38  ;;  %v3327_v55 = vld [vmem:[#allocation2 + $0x3a] sm:$0xff]  ;;  %v989_v19 = vadd.f32 %v957_v57, %v889_v44  ;;  %v1156_v27 = vmul.f32 %v3323_v48, %v3251_v37  ;;  %v3389_v47 = vld [vmem:[#allocation2 + $0x4a] sm:$0xff]  ;;  %335 = vst.msk [vmem:[#allocation2 + $0x12a] sm:$0xff] %vm233_vm0, %v303_v56 }
  0x2f   : > { %v559_v42 = vmul.f32 %v3219_v14, %v3292_v26  ;;  %v3317_v46 = vld [vmem:[#allocation2 + $0x33] sm:$0xff]  ;;  %v890_v59 = vadd.f32 %v858_v24, %v789_v34  ;;  %v3347_v11 = vld [vmem:[#allocation2 + $0x3b] sm:$0xff]  ;;  %v560_v28 = vmul.f32 %v3219_v14, %v3327_v55  ;;  %v295_v34 = vld [vmem:[%s3205_s21 + $0x68] sm:$0xff]  ;;  %v1256_v37 = vmul.f32 %v3333_v58, %v3265_v54 }
  0x30   : > { %v491_v41 = vadd.f32 %v459_v20, %v391_v25  ;;  %v3338_v60 = vld [vmem:[#allocation2 + $0x34] sm:$0xff]  ;;  %v492_v22 = vadd.f32 %v460_v53, %v392_v45  ;;  %v659_v12 = vmul.f32 %v3228_v21, %v3317_v46  ;;  %v958_v25 = vmul.f32 %v3276_v0, %v3283_v13  ;;  %v3363_v20 = vld [vmem:[#allocation2 + $0x49] sm:$0xff]  ;;  %327 = vst.msk [vmem:[#allocation2 + $0xca] sm:$0xff] %vm233_vm0, %v295_v34  ;;  %v302_v53 = vld [vmem:[%s3205_s21 + $0xa0] sm:$0xff] }
  0x31   : > { %v300_v44 = vld [vmem:[%s3205_s21 + $0x90] sm:$0xff]  ;;  %v859_v45 = vmul.f32 %v3263_v51, %v3301_v32  ;;  %v1188_v54 = vadd.f32 %v1156_v27, %v1088_v3  ;;  %v1257_v57 = vmul.f32 %v3333_v58, %v3288_v23  ;;  %v759_v61 = vmul.f32 %v3245_v33, %v3338_v60  ;;  %334 = vst.msk [vmem:[#allocation2 + $0x122] sm:$0xff] %vm233_vm0, %v302_v53  ;;  %v305_v2 = vld [vmem:[%s3205_s21 + $0xb8] sm:$0xff]  ;;  %v306_v3 = vld [vmem:[%s3205_s21 + $0xc0] sm:$0xff] }
  0x32   : > { %v591_v52 = vadd.f32 %v559_v42, %v491_v41  ;;  %v3377_v42 = vld [vmem:[#allocation2 + $0x3c] sm:$0xff]  ;;  %v990_v24 = vadd.f32 %v958_v25, %v890_v59  ;;  %v592_v63 = vadd.f32 %v560_v28, %v492_v22  ;;  %332 = vst.msk [vmem:[#allocation2 + $0x10a] sm:$0xff] %vm233_vm0, %v300_v44  ;;  %v1058_v59 = vmul.f32 %v3297_v30, %v3292_v26  ;;  %v304_v62 = vld [vmem:[%s3205_s21 + $0xb0] sm:$0xff]  ;;  %v307_v15 = vld [vmem:[%s3205_s21 + $0xc8] sm:$0xff] }
  0x33   : > { %v1089_v22 = vadd.f32 %v1057_v39, %v989_v19  ;;  %v3411_v23 = vmul.f32 %v3336_v31, %v3278_v1  ;;  %v660_v26 = vmul.f32 %v3228_v21, %v3347_v11  ;;  %336 = vst.msk [vmem:[#allocation2 + $0x13a] sm:$0xff] %vm233_vm0, %v304_v62  ;;  %337 = vst.msk [vmem:[#allocation2 + $0x142] sm:$0xff] %vm233_vm0, %v305_v2  ;;  %v308_v16 = vld [vmem:[%s3205_s21 + $0xd0] sm:$0xff]  ;;  %v309_v17 = vld [vmem:[%s3205_s21 + $0xd8] sm:$0xff] }
  0x34   : > { %v691_v41 = vadd.f32 %v659_v12, %v591_v52  ;;  %v301_v52 = vld [vmem:[%s3205_s21 + $0x98] sm:$0xff]  ;;  %v891_v12 = vadd.f32 %v859_v45, %v790_v18  ;;  %338 = vst.msk [vmem:[#allocation2 + $0x152] sm:$0xff] %vm233_vm0, %v306_v3  ;;  %v3423_v19 = vmul.f32 %v3345_v49, %v3283_v13  ;;  %v393_v1 = vmul.f32 %v3208_v8, %v3361_v29  ;;  %v3429_v28 = vld [vmem:[#allocation2 + $0x50] sm:$0xff] }
  0x35   : > { %333 = vst.msk [vmem:[#allocation2 + $0x112] sm:$0xff] %vm233_vm0, %v301_v52  ;;  %v461_v18 = vmul.f32 %v3211_v9, %v3363_v20  ;;  %339 = vst.msk [vmem:[#allocation2 + $0x15a] sm:$0xff] %vm233_vm0, %v307_v15  ;;  %v1090_v34 = vadd.f32 %v1058_v59, %v990_v24  ;;  %v692_v35 = vadd.f32 %v660_v26, %v592_v63  ;;  %v3438_v39 = vld [vmem:[#allocation2 + $0x51] sm:$0xff] }
  0x36   : > { %v791_v25 = vadd.f32 %v759_v61, %v691_v41  ;;  %340 = vst.msk [vmem:[#allocation2 + $0x16a] sm:$0xff] %vm233_vm0, %v308_v16  ;;  %341 = vst.msk [vmem:[#allocation2 + $0x172] sm:$0xff] %vm233_vm0, %v309_v17  ;;  %v760_v13 = vmul.f32 %v3245_v33, %v3377_v42  ;;  %v959_v36 = vmul.f32 %v3276_v0, %v3304_v38  ;;  %v625_v27 = vld [vmem:[#allocation2 + $0x4b] sm:$0xff] }
  0x37   : > { %v3440_v41 = vadd.f32 %v1256_v37, %v1188_v54  ;;  %v493_v43 = vadd.f32 %v461_v18, %v393_v1  ;;  %v561_v50 = vmul.f32 %v3219_v14, %v3389_v47  ;;  %v860_v44 = vmul.f32 %v3263_v51, %v3361_v29  ;;  %v526_v53 = vld [vmem:[#allocation2 + $0x52] sm:$0xff] }
  0x38   : > { %v1189_v24 = vadd.f32 %v1157_v40, %v1089_v22  ;;  %v991_v63 = vadd.f32 %v959_v36, %v891_v12  ;;  %v1158_v45 = vmul.f32 %v3323_v48, %v3317_v46  ;;  %v394_v52 = vmul.f32 %v3208_v8, %v3429_v28  ;;  %v725_v46 = vld [vmem:[#allocation2 + $0x4c] sm:$0xff] }
  0x39   : > { %v593_v56 = vadd.f32 %v561_v50, %v493_v43  ;;  %v892_v59 = vadd.f32 %v860_v44, %v791_v25  ;;  %v462_v37 = vmul.f32 %v3211_v9, %v3438_v39  ;;  %v661_v54 = vmul.f32 %v3228_v21, %v625_v27  ;;  %v626_v25 = vld [vmem:[#allocation2 + $0x53] sm:$0xff] }
  0x3a   : > { %v792_v61 = vadd.f32 %v760_v13, %v692_v35  ;;  %v1059_v62 = vmul.f32 %v3297_v30, %v3327_v55  ;;  %v1159_v40 = vmul.f32 %v3323_v48, %v3347_v11  ;;  %v1190_v2 = vadd.f32 %v1158_v45, %v1090_v34  ;;  %v359_v11 = vld [vmem:[#allocation2 + $0x60] sm:$0xff]  ;;  %v726_v50 = vld [vmem:[#allocation2 + $0x54] sm:$0xff] }
  0x3b   : > { %v960_v3 = vmul.f32 %v3276_v0, %v3363_v20  ;;  %v494_v22 = vadd.f32 %v462_v37, %v394_v52  ;;  %v562_v26 = vmul.f32 %v3219_v14, %v526_v53  ;;  %v693_v12 = vadd.f32 %v661_v54, %v593_v56  ;;  %v3469_v13 = vld [vmem:[#allocation2 + $0x61] sm:$0xff] }
  0x3c   : > { %v3460_v15 = vadd.f32 %v1257_v57, %v1189_v24  ;;  %v1091_v16 = vadd.f32 %v1059_v62, %v991_v63  ;;  %v1258_v17 = vmul.f32 %v3333_v58, %v3338_v60  ;;  %v1259_v55 = vmul.f32 %v3333_v58, %v3377_v42  ;;  %v527_v45 = vld [vmem:[#allocation2 + $0x62] sm:$0xff] }
  0x3d   : > { %v992_v1 = vadd.f32 %v960_v3, %v892_v59  ;;  %v594_v18 = vadd.f32 %v562_v26, %v494_v22  ;;  %v761_v34 = vmul.f32 %v3245_v33, %v725_v46  ;;  %v861_v35 = vmul.f32 %v3263_v51, %v3429_v28  ;;  %v3495_v56 = vld [vmem:[#allocation2 + $0x68] sm:$0xff] }
  0x3e   : > { %v3471_v57 = vadd.f32 %v1258_v17, %v1190_v2  ;;  %v3475_v36 = vmul.f32 %v3336_v31, %v3301_v32  ;;  %v3479_v60 = vmul.f32 %v3345_v49, %v3304_v38  ;;  %v1060_v42 = vmul.f32 %v3297_v30, %v3389_v47  ;;  %v3497_v59 = vld [vmem:[#allocation2 + $0x69] sm:$0xff] }
  0x3f   : > { %v662_v43 = vmul.f32 %v3228_v21, %v626_v25  ;;  %v793_v44 = vadd.f32 %v761_v34, %v693_v12  ;;  %v893_v24 = vadd.f32 %v861_v35, %v792_v61  ;;  %v395_v63 = vmul.f32 %v3208_v8, %v359_v11  ;;  %v528_v17 = vld [vmem:[#allocation2 + $0x6a] sm:$0xff] }
  0x40   : > { %v1191_v52 = vadd.f32 %v1159_v40, %v1091_v16  ;;  %v3487_v32 = vmul.f32 %v3336_v31, %v3361_v29  ;;  %v3491_v38 = vmul.f32 %v3345_v49, %v3363_v20  ;;  %v463_v47 = vmul.f32 %v3211_v9, %v3469_v13  ;;  %v627_v29 = vld [vmem:[#allocation2 + $0x63] sm:$0xff] }
  0x41   : > { %v1092_v37 = vadd.f32 %v1060_v42, %v992_v1  ;;  %v694_v54 = vadd.f32 %v662_v43, %v594_v18  ;;  %v961_v61 = vmul.f32 %v3276_v0, %v3438_v39  ;;  %v862_v62 = vmul.f32 %v3263_v51, %v359_v11 }
  0x42   : > { %5242 = vst [vmem:[#allocation3_spill] sm:$0xff] %v3487_v32  ;;  %5243 = vst [vmem:[#allocation4_spill] sm:$0xff] %v3491_v38  ;;  %v762_v40 = vmul.f32 %v3245_v33, %v726_v50  ;;  %v1160_v20 = vmul.f32 %v3323_v48, %v625_v27  ;;  %v495_v2 = vadd.f32 %v463_v47, %v395_v63 }
  0x43   : > { %v563_v3 = vmul.f32 %v3219_v14, %v527_v45  ;;  %v993_v22 = vadd.f32 %v961_v61, %v893_v24  ;;  %v894_v26 = vadd.f32 %v862_v62, %v793_v44  ;;  %v396_v12 = vmul.f32 %v3208_v8, %v3495_v56  ;;  %v727_v24 = vld [vmem:[#allocation2 + $0x64] sm:$0xff] }
  0x44   : > { %v464_v16 = vmul.f32 %v3211_v9, %v3497_v59  ;;  %v3509_v1 = vadd.f32 %v1259_v55, %v1191_v52  ;;  %v1061_v18 = vmul.f32 %v3297_v30, %v526_v53  ;;  %v663_v35 = vmul.f32 %v3228_v21, %v627_v29 }
  0x45   : > { %v595_v34 = vadd.f32 %v563_v3, %v495_v2  ;;  %v794_v27 = vadd.f32 %v762_v40, %v694_v54  ;;  %v1192_v42 = vadd.f32 %v1160_v20, %v1092_v37  ;;  %v962_v43 = vmul.f32 %v3276_v0, %v3469_v13  ;;  %v628_v2 = vld [vmem:[#allocation2 + $0x6b] sm:$0xff]  ;;  %v3521_v54 = vld [vmem:[#allocation2 + $0x78] sm:$0xff] }
  0x46   : > { %5244 = vst [vmem:[#allocation5_spill] sm:$0xff] %v3509_v1  ;;  %v496_v44 = vadd.f32 %v464_v16, %v396_v12  ;;  %v1161_v63 = vmul.f32 %v3323_v48, %v626_v25  ;;  %v1260_v47 = vmul.f32 %v3333_v58, %v725_v46  ;;  %v564_v61 = vmul.f32 %v3219_v14, %v528_v17  ;;  %v3523_v40 = vld [vmem:[#allocation2 + $0x79] sm:$0xff] }
  0x47   : > { %v695_v55 = vadd.f32 %v663_v35, %v595_v34  ;;  %v1093_v52 = vadd.f32 %v1061_v18, %v993_v22  ;;  %v1261_v53 = vmul.f32 %v3333_v58, %v726_v50  ;;  %v994_v62 = vadd.f32 %v962_v43, %v894_v26  ;;  %v529_v16 = vld [vmem:[#allocation2 + $0x7a] sm:$0xff] }
  0x48   : > { %v863_v37 = vmul.f32 %v3263_v51, %v3495_v56  ;;  %v3527_v25 = vmul.f32 %v3336_v31, %v3429_v28  ;;  %v3531_v46 = vmul.f32 %v3345_v49, %v3438_v39  ;;  %v596_v20 = vadd.f32 %v564_v61, %v496_v44  ;;  %v3545_v35 = vld [vmem:[#allocation2 + $0x80] sm:$0xff] }
  0x49   : > { %v763_v50 = vmul.f32 %v3245_v33, %v727_v24  ;;  %v3534_v3 = vadd.f32 %v1260_v47, %v1192_v42  ;;  %v1062_v22 = vmul.f32 %v3297_v30, %v527_v45  ;;  %v3538_v26 = vmul.f32 %v3336_v31, %v359_v11  ;;  %v3547_v42 = vld [vmem:[#allocation2 + $0x81] sm:$0xff] }
  0x4a   : > { %5245 = vst [vmem:[#allocation6_spill] sm:$0xff] %v3527_v25  ;;  %5246 = vst [vmem:[#allocation7_spill] sm:$0xff] %v3531_v46  ;;  %v895_v12 = vadd.f32 %v863_v37, %v794_v27  ;;  %v664_v18 = vmul.f32 %v3228_v21, %v628_v2  ;;  %v397_v34 = vmul.f32 %v3208_v8, %v3521_v54  ;;  %v728_v27 = vld [vmem:[#allocation2 + $0x6c] sm:$0xff]  ;;  %v629_v47 = vld [vmem:[#allocation2 + $0x7b] sm:$0xff] }
  0x4b   : > { %5247 = vst [vmem:[#allocation8_spill] sm:$0xff] %v3534_v3  ;;  %5248 = vst [vmem:[#allocation9_spill] sm:$0xff] %v3538_v26  ;;  %v795_v28 = vadd.f32 %v763_v50, %v695_v55  ;;  %v465_v39 = vmul.f32 %v3211_v9, %v3523_v40  ;;  %v1193_v43 = vadd.f32 %v1161_v63, %v1093_v52 }
  0x4c   : > { %v1094_v45 = vadd.f32 %v1062_v22, %v994_v62  ;;  %v3551_v11 = vmul.f32 %v3345_v49, %v3469_v13  ;;  %v963_v44 = vmul.f32 %v3276_v0, %v3497_v59  ;;  %v696_v61 = vadd.f32 %v664_v18, %v596_v20  ;;  %v530_v62 = vld [vmem:[#allocation2 + $0x82] sm:$0xff] }
  0x4d   : > { %v497_v55 = vadd.f32 %v465_v39, %v397_v34  ;;  %v565_v37 = vmul.f32 %v3219_v14, %v529_v16  ;;  %v864_v50 = vmul.f32 %v3263_v51, %v3521_v54  ;;  %v1162_v63 = vmul.f32 %v3323_v48, %v627_v29  ;;  %v729_v29 = vld [vmem:[#allocation2 + $0x7c] sm:$0xff] }
  0x4e   : > { %5249 = vst [vmem:[#allocation10_spill] sm:$0xff] %v3551_v11  ;;  %v995_v26 = vadd.f32 %v963_v44, %v895_v12  ;;  %v398_v52 = vmul.f32 %v3208_v8, %v3545_v35  ;;  %v466_v13 = vmul.f32 %v3211_v9, %v3547_v42  ;;  %v764_v22 = vmul.f32 %v3245_v33, %v728_v27 }
  0x4f   : > { %v597_v11 = vadd.f32 %v565_v37, %v497_v55  ;;  %v896_v20 = vadd.f32 %v864_v50, %v795_v28  ;;  %v665_v18 = vmul.f32 %v3228_v21, %v629_v47  ;;  %v3565_v34 = vadd.f32 %v1261_v53, %v1193_v43  ;;  %v630_v43 = vld [vmem:[#allocation2 + $0x83] sm:$0xff]  ;;  %v3574_v37 = vld [vmem:[#allocation2 + $0x90] sm:$0xff] }
  0x50   : > { %v1063_v39 = vmul.f32 %v3297_v30, %v528_v17  ;;  %v1194_v12 = vadd.f32 %v1162_v63, %v1094_v45  ;;  %v498_v44 = vadd.f32 %v466_v13, %v398_v52  ;;  %v796_v3 = vadd.f32 %v764_v22, %v696_v61  ;;  %v3579_v63 = vld [vmem:[#allocation2 + $0x91] sm:$0xff] }
  0x51   : > { %5250 = vst [vmem:[#allocation11_spill] sm:$0xff] %v3565_v34  ;;  %v964_v46 = vmul.f32 %v3276_v0, %v3523_v40  ;;  %v566_v25 = vmul.f32 %v3219_v14, %v530_v62  ;;  %v697_v1 = vadd.f32 %v665_v18, %v597_v11  ;;  %v1163_v55 = vmul.f32 %v3323_v48, %v628_v2  ;;  %v531_v22 = vld [vmem:[#allocation2 + $0x92] sm:$0xff] }
  0x52   : > { %v1095_v38 = vadd.f32 %v1063_v39, %v995_v26  ;;  %v1262_v28 = vmul.f32 %v3333_v58, %v727_v24  ;;  %v1263_v53 = vmul.f32 %v3333_v58, %v728_v27  ;;  %v765_v61 = vmul.f32 %v3245_v33, %v729_v29  ;;  %v730_v26 = vld [vmem:[#allocation2 + $0x84] sm:$0xff]  ;;  %v3605_v18 = vld [vmem:[#allocation2 + $0x98] sm:$0xff] }
  0x53   : > { %v996_v17 = vadd.f32 %v964_v46, %v896_v20  ;;  %v598_v45 = vadd.f32 %v566_v25, %v498_v44  ;;  %v865_v50 = vmul.f32 %v3263_v51, %v3545_v35  ;;  %v3585_v2 = vmul.f32 %v3336_v31, %v3495_v56 }
  0x54   : > { %v3581_v11 = vadd.f32 %v1262_v28, %v1194_v12  ;;  %v3589_v24 = vmul.f32 %v3345_v49, %v3497_v59  ;;  %v1064_v46 = vmul.f32 %v3297_v30, %v529_v16  ;;  %v666_v25 = vmul.f32 %v3228_v21, %v630_v43  ;;  %v3613_v12 = vld [vmem:[#allocation2 + $0x93] sm:$0xff] }
  0x55   : > { %5252 = vst [vmem:[#allocation13_spill] sm:$0xff] %v3585_v2  ;;  %v797_v27 = vadd.f32 %v765_v61, %v697_v1  ;;  %v897_v52 = vadd.f32 %v865_v50, %v796_v3  ;;  %v399_v13 = vmul.f32 %v3208_v8, %v3574_v37  ;;  %v1195_v20 = vadd.f32 %v1163_v55, %v1095_v38  ;;  %v3607_v1 = vld [vmem:[#allocation2 + $0x99] sm:$0xff] }
  0x56   : > { %5251 = vst [vmem:[#allocation12_spill] sm:$0xff] %v3581_v11  ;;  %5253 = vst [vmem:[#allocation14_spill] sm:$0xff] %v3589_v24  ;;  %v3597_v56 = vmul.f32 %v3336_v31, %v3521_v54  ;;  %v3601_v59 = vmul.f32 %v3345_v49, %v3523_v40  ;;  %v467_v16 = vmul.f32 %v3211_v9, %v3579_v63  ;;  %v311_v11 = vld [vmem:[%s3205_s21 + $0xe8] sm:$0xff] }
  0x57   : > { %v1096_v3 = vadd.f32 %v1064_v46, %v996_v17  ;;  %v698_v39 = vadd.f32 %v666_v25, %v598_v45  ;;  %v965_v38 = vmul.f32 %v3276_v0, %v3547_v42  ;;  %v866_v54 = vmul.f32 %v3263_v51, %v3574_v37  ;;  %v3622_v46 = vld [vmem:[#allocation2 + $0x9a] sm:$0xff]  ;;  %343 = vst.msk [vmem:[#allocation2 + $0x18a] sm:$0xff] %vm233_vm0, %v311_v11 }
  0x58   : > { %5254 = vst [vmem:[#allocation15_spill] sm:$0xff] %v3597_v56  ;;  %5255 = vst [vmem:[#allocation16_spill] sm:$0xff] %v3601_v59  ;;  %v766_v40 = vmul.f32 %v3245_v33, %v730_v26  ;;  %v1164_v44 = vmul.f32 %v3323_v48, %v629_v47  ;;  %v499_v55 = vadd.f32 %v467_v16, %v399_v13  ;;  %v3629_v16 = vld [vmem:[#allocation2 + $0x94] sm:$0xff] }
  0x59   : > { %v567_v28 = vmul.f32 %v3219_v14, %v531_v22  ;;  %v997_v61 = vadd.f32 %v965_v38, %v897_v52  ;;  %v898_v17 = vadd.f32 %v866_v54, %v797_v27  ;;  %v400_v45 = vmul.f32 %v3208_v8, %v3605_v18  ;;  %v310_v27 = vld [vmem:[%s3205_s21 + $0xe0] sm:$0xff] }
  0x5a   : > { %v468_v50 = vmul.f32 %v3211_v9, %v3607_v1  ;;  %v3624_v25 = vadd.f32 %v1263_v53, %v1195_v20  ;;  %v1065_v47 = vmul.f32 %v3297_v30, %v530_v62  ;;  %v667_v52 = vmul.f32 %v3228_v21, %v3613_v12  ;;  %342 = vst.msk [vmem:[#allocation2 + $0x182] sm:$0xff] %vm233_vm0, %v310_v27  ;;  %v312_v53 = vld [vmem:[%s3205_s21 + $0xf0] sm:$0xff]  ;;  %v313_v20 = vld [vmem:[%s3205_s21 + $0xf8] sm:$0xff] }
  0x5b   : > { %v599_v13 = vadd.f32 %v567_v28, %v499_v55  ;;  %v798_v38 = vadd.f32 %v766_v40, %v698_v39  ;;  %v1196_v54 = vadd.f32 %v1164_v44, %v1096_v3  ;;  %v966_v59 = vmul.f32 %v3276_v0, %v3579_v63  ;;  %344 = vst.msk [vmem:[#allocation2 + $0x19a] sm:$0xff] %vm233_vm0, %v312_v53  ;;  %v632_v44 = vld [vmem:[#allocation2 + $0x9b] sm:$0xff]  ;;  %v3674_v53 = vld [vmem:[#allocation2 + $0xb0] sm:$0xff] }
  0x5c   : > { %5256 = vst [vmem:[#allocation17_spill] sm:$0xff] %v3624_v25  ;;  %v500_v56 = vadd.f32 %v468_v50, %v400_v45  ;;  %v1165_v62 = vmul.f32 %v3323_v48, %v630_v43  ;;  %v1264_v55 = vmul.f32 %v3333_v58, %v729_v29  ;;  %v568_v28 = vmul.f32 %v3219_v14, %v3622_v46  ;;  %v3648_v45 = vld [vmem:[#allocation2 + $0xa8] sm:$0xff] }
  0x5d   : > { %v699_v25 = vadd.f32 %v667_v52, %v599_v13  ;;  %345 = vst.msk [vmem:[#allocation2 + $0x1a2] sm:$0xff] %vm233_vm0, %v313_v20  ;;  %v1097_v3 = vadd.f32 %v1065_v47, %v997_v61  ;;  %v1265_v39 = vmul.f32 %v3333_v58, %v730_v26  ;;  %v998_v40 = vadd.f32 %v966_v59, %v898_v17  ;;  %v3650_v29 = vld [vmem:[#allocation2 + $0xa9] sm:$0xff] }
  0x5e   : > { %v867_v43 = vmul.f32 %v3263_v51, %v3605_v18  ;;  %v3654_v50 = vmul.f32 %v3336_v31, %v3545_v35  ;;  %v3658_v11 = vmul.f32 %v3345_v49, %v3547_v42  ;;  %v600_v61 = vadd.f32 %v568_v28, %v500_v56  ;;  %v533_v52 = vld [vmem:[#allocation2 + $0xaa] sm:$0xff] }
  0x5f   : > { %v767_v26 = vmul.f32 %v3245_v33, %v3629_v16  ;;  %v3662_v59 = vadd.f32 %v1264_v55, %v1196_v54  ;;  %v1066_v17 = vmul.f32 %v3297_v30, %v531_v22  ;;  %v3667_v47 = vmul.f32 %v3336_v31, %v3574_v37  ;;  %v3676_v54 = vld [vmem:[#allocation2 + $0xb1] sm:$0xff] }
  0x60   : > { %5257 = vst [vmem:[#allocation18_spill] sm:$0xff] %v3654_v50  ;;  %5258 = vst [vmem:[#allocation19_spill] sm:$0xff] %v3658_v11  ;;  %v899_v13 = vadd.f32 %v867_v43, %v798_v38  ;;  %v668_v35 = vmul.f32 %v3228_v21, %v632_v44  ;;  %v401_v42 = vmul.f32 %v3208_v8, %v3648_v45  ;;  %v732_v38 = vld [vmem:[#allocation2 + $0x9c] sm:$0xff]  ;;  %v633_v55 = vld [vmem:[#allocation2 + $0xab] sm:$0xff] }
  0x61   : > { %5259 = vst [vmem:[#allocation20_spill] sm:$0xff] %v3662_v59  ;;  %5260 = vst [vmem:[#allocation21_spill] sm:$0xff] %v3667_v47  ;;  %v799_v27 = vadd.f32 %v767_v26, %v699_v25  ;;  %v469_v56 = vmul.f32 %v3211_v9, %v3650_v29  ;;  %v1197_v22 = vadd.f32 %v1165_v62, %v1097_v3 }
  0x62   : > { %v1098_v20 = vadd.f32 %v1066_v17, %v998_v40  ;;  %v3680_v37 = vmul.f32 %v3345_v49, %v3579_v63  ;;  %v967_v25 = vmul.f32 %v3276_v0, %v3607_v1  ;;  %v700_v28 = vadd.f32 %v668_v35, %v600_v61  ;;  %v534_v40 = vld [vmem:[#allocation2 + $0xb2] sm:$0xff] }
  0x63   : > { %v501_v43 = vadd.f32 %v469_v56, %v401_v42  ;;  %v569_v26 = vmul.f32 %v3219_v14, %v533_v52  ;;  %v868_v47 = vmul.f32 %v3263_v51, %v3648_v45  ;;  %v1166_v62 = vmul.f32 %v3323_v48, %v3613_v12 }
  0x64   : > { %5261 = vst [vmem:[#allocation22_spill] sm:$0xff] %v3680_v37  ;;  %v999_v59 = vadd.f32 %v967_v25, %v899_v13  ;;  %v402_v63 = vmul.f32 %v3208_v8, %v3674_v53  ;;  %v470_v3 = vmul.f32 %v3211_v9, %v3676_v54  ;;  %v768_v17 = vmul.f32 %v3245_v33, %v732_v38  ;;  %v733_v37 = vld [vmem:[#allocation2 + $0xac] sm:$0xff] }
  0x65   : > { %v601_v61 = vadd.f32 %v569_v26, %v501_v43  ;;  %v900_v35 = vadd.f32 %v868_v47, %v799_v27  ;;  %v669_v42 = vmul.f32 %v3228_v21, %v633_v55  ;;  %v3695_v56 = vadd.f32 %v1265_v39, %v1197_v22  ;;  %v634_v22 = vld [vmem:[#allocation2 + $0xb3] sm:$0xff] }
  0x66   : > { %v1067_v13 = vmul.f32 %v3297_v30, %v3622_v46  ;;  %v1198_v25 = vadd.f32 %v1166_v62, %v1098_v20  ;;  %v502_v12 = vadd.f32 %v470_v3, %v402_v63  ;;  %v800_v11 = vadd.f32 %v768_v17, %v700_v28  ;;  %v367_v46 = vld [vmem:[#allocation2 + $0xc0] sm:$0xff] }
  0x67   : > { %5262 = vst [vmem:[#allocation23_spill] sm:$0xff] %v3695_v56  ;;  %v968_v50 = vmul.f32 %v3276_v0, %v3650_v29  ;;  %v570_v24 = vmul.f32 %v3219_v14, %v534_v40  ;;  %v701_v2 = vadd.f32 %v669_v42, %v601_v61  ;;  %v1167_v47 = vmul.f32 %v3323_v48, %v632_v44  ;;  %v3709_v62 = vld [vmem:[#allocation2 + $0xc1] sm:$0xff] }
  0x68   : > { %v1099_v34 = vadd.f32 %v1067_v13, %v999_v59  ;;  %v1266_v39 = vmul.f32 %v3333_v58, %v3629_v16  ;;  %v1267_v27 = vmul.f32 %v3333_v58, %v732_v38  ;;  %v769_v28 = vmul.f32 %v3245_v33, %v733_v37  ;;  %v734_v59 = vld [vmem:[#allocation2 + $0xb4] sm:$0xff]  ;;  %v535_v61 = vld [vmem:[#allocation2 + $0xc2] sm:$0xff] }
  0x69   : > { %v1000_v20 = vadd.f32 %v968_v50, %v900_v35  ;;  %v602_v43 = vadd.f32 %v570_v24, %v502_v12  ;;  %v869_v26 = vmul.f32 %v3263_v51, %v3674_v53  ;;  %v3715_v44 = vmul.f32 %v3336_v31, %v3605_v18  ;;  %v3736_v13 = vld [vmem:[#allocation2 + $0xc9] sm:$0xff] }
  0x6a   : > { %v3711_v63 = vadd.f32 %v1266_v39, %v1198_v25  ;;  %v3719_v16 = vmul.f32 %v3345_v49, %v3607_v1  ;;  %v1068_v50 = vmul.f32 %v3297_v30, %v533_v52  ;;  %v670_v24 = vmul.f32 %v3228_v21, %v634_v22  ;;  %v3734_v52 = vld [vmem:[#allocation2 + $0xc8] sm:$0xff] }
  0x6b   : > { %5264 = vst [vmem:[#allocation25_spill] sm:$0xff] %v3715_v44  ;;  %v801_v38 = vadd.f32 %v769_v28, %v701_v2  ;;  %v901_v3 = vadd.f32 %v869_v26, %v800_v11  ;;  %v403_v17 = vmul.f32 %v3208_v8, %v367_v46  ;;  %v1199_v35 = vadd.f32 %v1167_v47, %v1099_v34 }
  0x6c   : > { %5263 = vst [vmem:[#allocation24_spill] sm:$0xff] %v3711_v63  ;;  %5265 = vst [vmem:[#allocation26_spill] sm:$0xff] %v3719_v16  ;;  %v3726_v42 = vmul.f32 %v3336_v31, %v3648_v45  ;;  %v3730_v18 = vmul.f32 %v3345_v49, %v3650_v29  ;;  %v471_v1 = vmul.f32 %v3211_v9, %v3709_v62  ;;  %v635_v45 = vld [vmem:[#allocation2 + $0xc3] sm:$0xff] }
  0x6d   : > { %v1100_v2 = vadd.f32 %v1068_v50, %v1000_v20  ;;  %v702_v11 = vadd.f32 %v670_v24, %v602_v43  ;;  %v969_v34 = vmul.f32 %v3276_v0, %v3676_v54  ;;  %v870_v25 = vmul.f32 %v3263_v51, %v367_v46  ;;  %v536_v43 = vld [vmem:[#allocation2 + $0xca] sm:$0xff] }
  0x6e   : > { %5266 = vst [vmem:[#allocation27_spill] sm:$0xff] %v3726_v42  ;;  %5267 = vst [vmem:[#allocation28_spill] sm:$0xff] %v3730_v18  ;;  %v770_v12 = vmul.f32 %v3245_v33, %v734_v59  ;;  %v1168_v29 = vmul.f32 %v3323_v48, %v633_v55  ;;  %v503_v47 = vadd.f32 %v471_v1, %v403_v17  ;;  %v735_v1 = vld [vmem:[#allocation2 + $0xc4] sm:$0xff] }
  0x6f   : > { %v571_v39 = vmul.f32 %v3219_v14, %v535_v61  ;;  %v1001_v28 = vadd.f32 %v969_v34, %v901_v3  ;;  %v902_v26 = vadd.f32 %v870_v25, %v801_v38  ;;  %v404_v18 = vmul.f32 %v3208_v8, %v3734_v52 }
  0x70   : > { %v472_v20 = vmul.f32 %v3211_v9, %v3736_v13  ;;  %v3748_v50 = vadd.f32 %v1267_v27, %v1199_v35  ;;  %v1069_v24 = vmul.f32 %v3297_v30, %v534_v40  ;;  %v671_v63 = vmul.f32 %v3228_v21, %v635_v45 }
  0x71   : > { %v603_v42 = vadd.f32 %v571_v39, %v503_v47  ;;  %v802_v55 = vadd.f32 %v770_v12, %v702_v11  ;;  %v1200_v17 = vadd.f32 %v1168_v29, %v1100_v2  ;;  %v970_v3 = vmul.f32 %v3276_v0, %v3709_v62  ;;  %v636_v39 = vld [vmem:[#allocation2 + $0xcb] sm:$0xff]  ;;  %v3760_v11 = vld [vmem:[#allocation2 + $0xd8] sm:$0xff] }
  0x72   : > { %5268 = vst [vmem:[#allocation29_spill] sm:$0xff] %v3748_v50  ;;  %v504_v38 = vadd.f32 %v472_v20, %v404_v18  ;;  %v1169_v34 = vmul.f32 %v3323_v48, %v634_v22  ;;  %v1268_v25 = vmul.f32 %v3333_v58, %v733_v37  ;;  %v572_v16 = vmul.f32 %v3219_v14, %v536_v43  ;;  %v3762_v12 = vld [vmem:[#allocation2 + $0xd9] sm:$0xff] }
  0x73   : > { %v703_v27 = vadd.f32 %v671_v63, %v603_v42  ;;  %v1101_v35 = vadd.f32 %v1069_v24, %v1001_v28  ;;  %v1269_v40 = vmul.f32 %v3333_v58, %v734_v59  ;;  %v1002_v47 = vadd.f32 %v970_v3, %v902_v26  ;;  %v537_v26 = vld [vmem:[#allocation2 + $0xda] sm:$0xff] }
  0x74   : > { %v871_v2 = vmul.f32 %v3263_v51, %v3734_v52  ;;  %v3766_v22 = vmul.f32 %v3336_v31, %v3674_v53  ;;  %v3770_v37 = vmul.f32 %v3345_v49, %v3676_v54  ;;  %v604_v63 = vadd.f32 %v572_v16, %v504_v38  ;;  %v3784_v16 = vld [vmem:[#allocation2 + $0xe0] sm:$0xff] }
  0x75   : > { %v771_v59 = vmul.f32 %v3245_v33, %v735_v1  ;;  %v3773_v42 = vadd.f32 %v1268_v25, %v1200_v17  ;;  %v1070_v18 = vmul.f32 %v3297_v30, %v535_v61  ;;  %v3777_v29 = vmul.f32 %v3336_v31, %v367_v46  ;;  %v3786_v17 = vld [vmem:[#allocation2 + $0xe1] sm:$0xff] }
  0x76   : > { %5269 = vst [vmem:[#allocation30_spill] sm:$0xff] %v3766_v22  ;;  %5270 = vst [vmem:[#allocation31_spill] sm:$0xff] %v3770_v37  ;;  %v903_v28 = vadd.f32 %v871_v2, %v802_v55  ;;  %v672_v20 = vmul.f32 %v3228_v21, %v636_v39  ;;  %v405_v24 = vmul.f32 %v3208_v8, %v3760_v11  ;;  %v736_v55 = vld [vmem:[#allocation2 + $0xcc] sm:$0xff]  ;;  %v637_v25 = vld [vmem:[#allocation2 + $0xdb] sm:$0xff] }
  0x77   : > { %5271 = vst [vmem:[#allocation32_spill] sm:$0xff] %v3773_v42  ;;  %5272 = vst [vmem:[#allocation33_spill] sm:$0xff] %v3777_v29  ;;  %v803_v53 = vadd.f32 %v771_v59, %v703_v27  ;;  %v473_v54 = vmul.f32 %v3211_v9, %v3762_v12  ;;  %v1201_v3 = vadd.f32 %v1169_v34, %v1101_v35 }
  0x78   : > { %v1102_v61 = vadd.f32 %v1070_v18, %v1002_v47  ;;  %v3790_v46 = vmul.f32 %v3345_v49, %v3709_v62  ;;  %v971_v38 = vmul.f32 %v3276_v0, %v3736_v13  ;;  %v704_v27 = vadd.f32 %v672_v20, %v604_v63  ;;  %v538_v47 = vld [vmem:[#allocation2 + $0xe2] sm:$0xff] }
  0x79   : > { %v505_v2 = vadd.f32 %v473_v54, %v405_v24  ;;  %v573_v59 = vmul.f32 %v3219_v14, %v537_v26  ;;  %v872_v29 = vmul.f32 %v3263_v51, %v3760_v11  ;;  %v1170_v34 = vmul.f32 %v3323_v48, %v635_v45  ;;  %v737_v45 = vld [vmem:[#allocation2 + $0xdc] sm:$0xff] }
  0x7a   : > { %5273 = vst [vmem:[#allocation34_spill] sm:$0xff] %v3790_v46  ;;  %v1003_v42 = vadd.f32 %v971_v38, %v903_v28  ;;  %v406_v35 = vmul.f32 %v3208_v8, %v3784_v16  ;;  %v474_v62 = vmul.f32 %v3211_v9, %v3786_v17  ;;  %v772_v18 = vmul.f32 %v3245_v33, %v736_v55 }
  0x7b   : > { %v605_v46 = vadd.f32 %v573_v59, %v505_v2  ;;  %v904_v63 = vadd.f32 %v872_v29, %v803_v53  ;;  %v673_v20 = vmul.f32 %v3228_v21, %v637_v25  ;;  %v3804_v24 = vadd.f32 %v1269_v40, %v1201_v3  ;;  %v638_v53 = vld [vmem:[#allocation2 + $0xe3] sm:$0xff]  ;;  %v371_v3 = vld [vmem:[#allocation2 + $0xf0] sm:$0xff] }
  0x7c   : > { %v1071_v54 = vmul.f32 %v3297_v30, %v536_v43  ;;  %v1202_v28 = vadd.f32 %v1170_v34, %v1102_v61  ;;  %v506_v38 = vadd.f32 %v474_v62, %v406_v35  ;;  %v804_v37 = vadd.f32 %v772_v18, %v704_v27  ;;  %v3816_v34 = vld [vmem:[#allocation2 + $0xf1] sm:$0xff] }
  0x7d   : > { %5274 = vst [vmem:[#allocation35_spill] sm:$0xff] %v3804_v24  ;;  %v972_v22 = vmul.f32 %v3276_v0, %v3762_v12  ;;  %v574_v50 = vmul.f32 %v3219_v14, %v538_v47  ;;  %v705_v44 = vadd.f32 %v673_v20, %v605_v46  ;;  %v1171_v2 = vmul.f32 %v3323_v48, %v636_v39  ;;  %v539_v18 = vld [vmem:[#allocation2 + $0xf2] sm:$0xff] }
  0x7e   : > { %v1103_v56 = vadd.f32 %v1071_v54, %v1003_v42  ;;  %v1270_v29 = vmul.f32 %v3333_v58, %v735_v1  ;;  %v1271_v40 = vmul.f32 %v3333_v58, %v736_v55  ;;  %v773_v59 = vmul.f32 %v3245_v33, %v737_v45  ;;  %v738_v42 = vld [vmem:[#allocation2 + $0xe4] sm:$0xff]  ;;  %v3843_v54 = vld [vmem:[#allocation2 + $0xf9] sm:$0xff] }
  0x7f   : > { %v1004_v43 = vadd.f32 %v972_v22, %v904_v63  ;;  %v606_v61 = vadd.f32 %v574_v50, %v506_v38  ;;  %v873_v27 = vmul.f32 %v3263_v51, %v3784_v16  ;;  %v3822_v39 = vmul.f32 %v3336_v31, %v3734_v52 }
  0x80   : > { %v3818_v35 = vadd.f32 %v1270_v29, %v1202_v28  ;;  %v3826_v1 = vmul.f32 %v3345_v49, %v3736_v13  ;;  %v1072_v22 = vmul.f32 %v3297_v30, %v537_v26  ;;  %v674_v50 = vmul.f32 %v3228_v21, %v638_v53  ;;  %v3841_v26 = vld [vmem:[#allocation2 + $0xf8] sm:$0xff] }
  0x81   : > { %5276 = vst [vmem:[#allocation37_spill] sm:$0xff] %v3822_v39  ;;  %v805_v46 = vadd.f32 %v773_v59, %v705_v44  ;;  %v905_v55 = vadd.f32 %v873_v27, %v804_v37  ;;  %v407_v62 = vmul.f32 %v3208_v8, %v371_v3  ;;  %v1203_v63 = vadd.f32 %v1171_v2, %v1103_v56  ;;  %v642_v39 = vld [vmem:[#allocation2 + $0x113] sm:$0xff] }
  0x82   : > { %5275 = vst [vmem:[#allocation36_spill] sm:$0xff] %v3818_v35  ;;  %5277 = vst [vmem:[#allocation38_spill] sm:$0xff] %v3826_v1  ;;  %v3833_v20 = vmul.f32 %v3336_v31, %v3760_v11  ;;  %v3837_v52 = vmul.f32 %v3345_v49, %v3762_v12  ;;  %v475_v13 = vmul.f32 %v3211_v9, %v3816_v34  ;;  %v639_v11 = vld [vmem:[#allocation2 + $0xf3] sm:$0xff] }
  0x83   : > { %v1104_v44 = vadd.f32 %v1072_v22, %v1004_v43  ;;  %v706_v37 = vadd.f32 %v674_v50, %v606_v61  ;;  %v973_v56 = vmul.f32 %v3276_v0, %v3786_v17  ;;  %v874_v28 = vmul.f32 %v3263_v51, %v371_v3  ;;  %v540_v61 = vld [vmem:[#allocation2 + $0xfa] sm:$0xff] }
  0x84   : > { %5278 = vst [vmem:[#allocation39_spill] sm:$0xff] %v3833_v20  ;;  %5279 = vst [vmem:[#allocation40_spill] sm:$0xff] %v3837_v52  ;;  %v774_v38 = vmul.f32 %v3245_v33, %v738_v42  ;;  %v1172_v12 = vmul.f32 %v3323_v48, %v637_v25  ;;  %v507_v2 = vadd.f32 %v475_v13, %v407_v62  ;;  %v739_v13 = vld [vmem:[#allocation2 + $0xf4] sm:$0xff] }
  0x85   : > { %v575_v29 = vmul.f32 %v3219_v14, %v539_v18  ;;  %v1005_v59 = vadd.f32 %v973_v56, %v905_v55  ;;  %v906_v27 = vadd.f32 %v874_v28, %v805_v46  ;;  %v408_v52 = vmul.f32 %v3208_v8, %v3841_v26 }
  0x86   : > { %v476_v43 = vmul.f32 %v3211_v9, %v3843_v54  ;;  %v3855_v22 = vadd.f32 %v1271_v40, %v1203_v63  ;;  %v1073_v50 = vmul.f32 %v3297_v30, %v538_v47  ;;  %v675_v35 = vmul.f32 %v3228_v21, %v639_v11 }
  0x87   : > { %v607_v20 = vadd.f32 %v575_v29, %v507_v2  ;;  %v806_v25 = vadd.f32 %v774_v38, %v706_v37  ;;  %v1204_v62 = vadd.f32 %v1172_v12, %v1104_v44  ;;  %v974_v55 = vmul.f32 %v3276_v0, %v3816_v34  ;;  %v640_v29 = vld [vmem:[#allocation2 + $0xfb] sm:$0xff]  ;;  %v3867_v37 = vld [vmem:[#allocation2 + $0x108] sm:$0xff] }
  0x88   : > { %5280 = vst [vmem:[#allocation41_spill] sm:$0xff] %v3855_v22  ;;  %v508_v46 = vadd.f32 %v476_v43, %v408_v52  ;;  %v1173_v56 = vmul.f32 %v3323_v48, %v638_v53  ;;  %v1272_v28 = vmul.f32 %v3333_v58, %v737_v45  ;;  %v576_v1 = vmul.f32 %v3219_v14, %v540_v61  ;;  %v3869_v38 = vld [vmem:[#allocation2 + $0x109] sm:$0xff] }
  0x89   : > { %v707_v40 = vadd.f32 %v675_v35, %v607_v20  ;;  %v1105_v63 = vadd.f32 %v1073_v50, %v1005_v59  ;;  %v1273_v47 = vmul.f32 %v3333_v58, %v738_v42  ;;  %v1006_v2 = vadd.f32 %v974_v55, %v906_v27  ;;  %v541_v27 = vld [vmem:[#allocation2 + $0x10a] sm:$0xff] }
  0x8a   : > { %v875_v44 = vmul.f32 %v3263_v51, %v3841_v26  ;;  %v3873_v53 = vmul.f32 %v3336_v31, %v3784_v16  ;;  %v3877_v45 = vmul.f32 %v3345_v49, %v3786_v17  ;;  %v608_v35 = vadd.f32 %v576_v1, %v508_v46  ;;  %v3891_v1 = vld [vmem:[#allocation2 + $0x110] sm:$0xff] }
  0x8b   : > { %v775_v42 = vmul.f32 %v3245_v33, %v739_v13  ;;  %v3880_v20 = vadd.f32 %v1272_v28, %v1204_v62  ;;  %v1074_v52 = vmul.f32 %v3297_v30, %v539_v18  ;;  %v3884_v12 = vmul.f32 %v3336_v31, %v371_v3  ;;  %v3893_v62 = vld [vmem:[#allocation2 + $0x111] sm:$0xff] }
  0x8c   : > { %5281 = vst [vmem:[#allocation42_spill] sm:$0xff] %v3873_v53  ;;  %5282 = vst [vmem:[#allocation43_spill] sm:$0xff] %v3877_v45  ;;  %v907_v59 = vadd.f32 %v875_v44, %v806_v25  ;;  %v676_v43 = vmul.f32 %v3228_v21, %v640_v29  ;;  %v409_v50 = vmul.f32 %v3208_v8, %v3867_v37  ;;  %v740_v25 = vld [vmem:[#allocation2 + $0xfc] sm:$0xff]  ;;  %v641_v28 = vld [vmem:[#allocation2 + $0x10b] sm:$0xff] }
  0x8d   : > { %5283 = vst [vmem:[#allocation44_spill] sm:$0xff] %v3880_v20  ;;  %5284 = vst [vmem:[#allocation45_spill] sm:$0xff] %v3884_v12  ;;  %v807_v16 = vadd.f32 %v775_v42, %v707_v40  ;;  %v477_v17 = vmul.f32 %v3211_v9, %v3869_v38  ;;  %v1205_v55 = vadd.f32 %v1173_v56, %v1105_v63  ;;  %v3904_v20 = vld [vmem:[#allocation2 + $0x112] sm:$0xff] }
  0x8e   : > { %v1106_v18 = vadd.f32 %v1074_v52, %v1006_v2  ;;  %v3897_v3 = vmul.f32 %v3345_v49, %v3816_v34  ;;  %v975_v46 = vmul.f32 %v3276_v0, %v3843_v54  ;;  %v708_v40 = vadd.f32 %v676_v43, %v608_v35 }
  0x8f   : > { %v509_v44 = vadd.f32 %v477_v17, %v409_v50  ;;  %v577_v42 = vmul.f32 %v3219_v14, %v541_v27  ;;  %v876_v12 = vmul.f32 %v3263_v51, %v3867_v37  ;;  %v1174_v63 = vmul.f32 %v3323_v48, %v639_v11  ;;  %v741_v11 = vld [vmem:[#allocation2 + $0x10c] sm:$0xff] }
  0x90   : > { %5285 = vst [vmem:[#allocation46_spill] sm:$0xff] %v3897_v3  ;;  %v1007_v56 = vadd.f32 %v975_v46, %v907_v59  ;;  %v410_v34 = vmul.f32 %v3208_v8, %v3891_v1  ;;  %v478_v2 = vmul.f32 %v3211_v9, %v3893_v62  ;;  %v776_v52 = vmul.f32 %v3245_v33, %v740_v25 }
  0x91   : > { %v609_v35 = vadd.f32 %v577_v42, %v509_v44  ;;  %v908_v43 = vadd.f32 %v876_v12, %v807_v16  ;;  %v677_v50 = vmul.f32 %v3228_v21, %v641_v28  ;;  %v1075_v17 = vmul.f32 %v3297_v30, %v540_v61 }
  0x92   : > { %v1206_v3 = vadd.f32 %v1174_v63, %v1106_v18  ;;  %v510_v45 = vadd.f32 %v478_v2, %v410_v34  ;;  %v578_v59 = vmul.f32 %v3219_v14, %v3904_v20  ;;  %v3916_v46 = vadd.f32 %v1273_v47, %v1205_v55  ;;  %v3922_v18 = vld [vmem:[#allocation2 + $0x120] sm:$0xff] }
  0x93   : > { %v808_v53 = vadd.f32 %v776_v52, %v708_v40  ;;  %v976_v22 = vmul.f32 %v3276_v0, %v3869_v38  ;;  %v709_v24 = vadd.f32 %v677_v50, %v609_v35  ;;  %v1107_v44 = vadd.f32 %v1075_v17, %v1007_v56  ;;  %v3928_v40 = vld [vmem:[#allocation2 + $0x121] sm:$0xff]  ;;  %v3952_v17 = vld [vmem:[#allocation2 + $0x129] sm:$0xff] }
  0x94   : > { %5286 = vst [vmem:[#allocation47_spill] sm:$0xff] %v3916_v46  ;;  %v1175_v12 = vmul.f32 %v3323_v48, %v640_v29  ;;  %v1274_v16 = vmul.f32 %v3333_v58, %v739_v13  ;;  %v610_v61 = vadd.f32 %v578_v59, %v510_v45  ;;  %v1275_v42 = vmul.f32 %v3333_v58, %v740_v25  ;;  %v742_v25 = vld [vmem:[#allocation2 + $0x114] sm:$0xff]  ;;  %v3950_v50 = vld [vmem:[#allocation2 + $0x128] sm:$0xff] }
  0x95   : > { %v1008_v63 = vadd.f32 %v976_v22, %v908_v43  ;;  %v777_v47 = vmul.f32 %v3245_v33, %v741_v11  ;;  %v877_v55 = vmul.f32 %v3263_v51, %v3891_v1  ;;  %v3934_v29 = vmul.f32 %v3336_v31, %v3841_v26  ;;  %v643_v59 = vld [vmem:[#allocation2 + $0x123] sm:$0xff] }
  0x96   : > { %v3930_v34 = vadd.f32 %v1274_v16, %v1206_v3  ;;  %v3938_v13 = vmul.f32 %v3345_v49, %v3843_v54  ;;  %v678_v45 = vmul.f32 %v3228_v21, %v642_v39  ;;  %v1076_v22 = vmul.f32 %v3297_v30, %v541_v27  ;;  %v543_v3 = vld [vmem:[#allocation2 + $0x122] sm:$0xff] }
  0x97   : > { %5288 = vst [vmem:[#allocation49_spill] sm:$0xff] %v3934_v29  ;;  %v809_v56 = vadd.f32 %v777_v47, %v709_v24  ;;  %v909_v2 = vadd.f32 %v877_v55, %v808_v53  ;;  %v411_v52 = vmul.f32 %v3208_v8, %v3922_v18  ;;  %v1207_v35 = vadd.f32 %v1175_v12, %v1107_v44  ;;  %v646_v46 = vld [vmem:[#allocation2 + $0x143] sm:$0xff] }
  0x98   : > { %5287 = vst [vmem:[#allocation48_spill] sm:$0xff] %v3930_v34  ;;  %5289 = vst [vmem:[#allocation50_spill] sm:$0xff] %v3938_v13  ;;  %v3946_v26 = vmul.f32 %v3336_v31, %v3867_v37  ;;  %v710_v43 = vadd.f32 %v678_v45, %v610_v61  ;;  %v479_v54 = vmul.f32 %v3211_v9, %v3928_v40 }
  0x99   : > { %v1108_v27 = vadd.f32 %v1076_v22, %v1008_v63  ;;  %v3956_v24 = vmul.f32 %v3345_v49, %v3869_v38  ;;  %v977_v53 = vmul.f32 %v3276_v0, %v3893_v62  ;;  %v878_v37 = vmul.f32 %v3263_v51, %v3922_v18 }
  0x9a   : > { %5290 = vst [vmem:[#allocation51_spill] sm:$0xff] %v3946_v26  ;;  %v778_v44 = vmul.f32 %v3245_v33, %v742_v25  ;;  %v1176_v12 = vmul.f32 %v3323_v48, %v641_v28  ;;  %v511_v16 = vadd.f32 %v479_v54, %v411_v52  ;;  %v579_v61 = vmul.f32 %v3219_v14, %v543_v3  ;;  %v544_v26 = vld [vmem:[#allocation2 + $0x12a] sm:$0xff] }
  0x9b   : > { %5291 = vst [vmem:[#allocation52_spill] sm:$0xff] %v3956_v24  ;;  %v1009_v47 = vadd.f32 %v977_v53, %v909_v2  ;;  %v910_v63 = vadd.f32 %v878_v37, %v809_v56  ;;  %v412_v38 = vmul.f32 %v3208_v8, %v3950_v50  ;;  %v480_v55 = vmul.f32 %v3211_v9, %v3952_v17  ;;  %v743_v54 = vld [vmem:[#allocation2 + $0x124] sm:$0xff] }
  0x9c   : > { %v3969_v45 = vadd.f32 %v1275_v42, %v1207_v35  ;;  %v810_v22 = vadd.f32 %v778_v44, %v710_v43  ;;  %v611_v24 = vadd.f32 %v579_v61, %v511_v16  ;;  %v679_v34 = vmul.f32 %v3228_v21, %v643_v59 }
  0x9d   : > { %v1077_v28 = vmul.f32 %v3297_v30, %v3904_v20  ;;  %v1208_v52 = vadd.f32 %v1176_v12, %v1108_v27  ;;  %v978_v56 = vmul.f32 %v3276_v0, %v3928_v40  ;;  %v512_v2 = vadd.f32 %v480_v55, %v412_v38  ;;  %v3982_v27 = vld [vmem:[#allocation2 + $0x138] sm:$0xff] }
  0x9e   : > { %5292 = vst [vmem:[#allocation53_spill] sm:$0xff] %v3969_v45  ;;  %v1177_v53 = vmul.f32 %v3323_v48, %v642_v39  ;;  %v1276_v37 = vmul.f32 %v3333_v58, %v741_v11  ;;  %v711_v42 = vadd.f32 %v679_v34, %v611_v24  ;;  %v879_v35 = vmul.f32 %v3263_v51, %v3950_v50  ;;  %v3984_v12 = vld [vmem:[#allocation2 + $0x139] sm:$0xff]  ;;  %v644_v39 = vld [vmem:[#allocation2 + $0x12b] sm:$0xff] }
  0x9f   : > { %v1109_v43 = vadd.f32 %v1077_v28, %v1009_v47  ;;  %v1277_v44 = vmul.f32 %v3333_v58, %v742_v25  ;;  %v1010_v16 = vadd.f32 %v978_v56, %v910_v63  ;;  %v580_v20 = vmul.f32 %v3219_v14, %v544_v26  ;;  %v545_v55 = vld [vmem:[#allocation2 + $0x13a] sm:$0xff] }
  0xa0   : > { %v3988_v61 = vmul.f32 %v3336_v31, %v3891_v1  ;;  %v779_v11 = vmul.f32 %v3245_v33, %v743_v54  ;;  %v911_v34 = vadd.f32 %v879_v35, %v810_v22  ;;  %v979_v24 = vmul.f32 %v3276_v0, %v3952_v17  ;;  %v4004_v35 = vld [vmem:[#allocation2 + $0x140] sm:$0xff] }
  0xa1   : > { %v3993_v47 = vadd.f32 %v1276_v37, %v1208_v52  ;;  %v3997_v25 = vmul.f32 %v3345_v49, %v3893_v62  ;;  %v1078_v63 = vmul.f32 %v3297_v30, %v543_v3  ;;  %v612_v38 = vadd.f32 %v580_v20, %v512_v2  ;;  %v4006_v52 = vld [vmem:[#allocation2 + $0x141] sm:$0xff] }
  0xa2   : > { %5293 = vst [vmem:[#allocation54_spill] sm:$0xff] %v3988_v61  ;;  %v811_v28 = vadd.f32 %v779_v11, %v711_v42  ;;  %v1011_v1 = vadd.f32 %v979_v24, %v911_v34  ;;  %v413_v56 = vmul.f32 %v3208_v8, %v3982_v27  ;;  %v481_v22 = vmul.f32 %v3211_v9, %v3984_v12  ;;  %v546_v34 = vld [vmem:[#allocation2 + $0x142] sm:$0xff] }
  0xa3   : > { %5294 = vst [vmem:[#allocation55_spill] sm:$0xff] %v3993_v47  ;;  %5295 = vst [vmem:[#allocation56_spill] sm:$0xff] %v3997_v25  ;;  %v1209_v37 = vadd.f32 %v1177_v53, %v1109_v43  ;;  %v1110_v47 = vadd.f32 %v1078_v63, %v1010_v16  ;;  %v4010_v62 = vmul.f32 %v3336_v31, %v3922_v18  ;;  %v645_v24 = vld [vmem:[#allocation2 + $0x13b] sm:$0xff]  ;;  %v744_v43 = vld [vmem:[#allocation2 + $0x12c] sm:$0xff] }
  0xa4   : > { %v680_v3 = vmul.f32 %v3228_v21, %v644_v39  ;;  %v1079_v2 = vmul.f32 %v3297_v30, %v544_v26  ;;  %v513_v42 = vadd.f32 %v481_v22, %v413_v56  ;;  %v581_v20 = vmul.f32 %v3219_v14, %v545_v55 }
  0xa5   : > { %5296 = vst [vmem:[#allocation57_spill] sm:$0xff] %v4010_v62  ;;  %v880_v11 = vmul.f32 %v3263_v51, %v3982_v27  ;;  %v4019_v53 = vmul.f32 %v3345_v49, %v3928_v40  ;;  %v1178_v18 = vmul.f32 %v3323_v48, %v643_v59  ;;  %v414_v16 = vmul.f32 %v3208_v8, %v4004_v35 }
  0xa6   : > { %v482_v26 = vmul.f32 %v3211_v9, %v4006_v52  ;;  %v712_v63 = vadd.f32 %v680_v3, %v612_v38  ;;  %v1111_v56 = vadd.f32 %v1079_v2, %v1011_v1  ;;  %v613_v22 = vadd.f32 %v581_v20, %v513_v42  ;;  %v745_v38 = vld [vmem:[#allocation2 + $0x13c] sm:$0xff]  ;;  %v4036_v2 = vld [vmem:[#allocation2 + $0x150] sm:$0xff] }
  0xa7   : > { %5297 = vst [vmem:[#allocation58_spill] sm:$0xff] %v4019_v53  ;;  %v912_v62 = vadd.f32 %v880_v11, %v811_v28  ;;  %v1210_v25 = vadd.f32 %v1178_v18, %v1110_v47  ;;  %v582_v45 = vmul.f32 %v3219_v14, %v546_v34  ;;  %v681_v40 = vmul.f32 %v3228_v21, %v645_v24  ;;  %v4042_v20 = vld [vmem:[#allocation2 + $0x151] sm:$0xff] }
  0xa8   : > { %v514_v61 = vadd.f32 %v482_v26, %v414_v16  ;;  %v4028_v53 = vadd.f32 %v1277_v44, %v1209_v37  ;;  %v780_v59 = vmul.f32 %v3245_v33, %v744_v43  ;;  %v1179_v13 = vmul.f32 %v3323_v48, %v644_v39  ;;  %v4067_v26 = vld [vmem:[#allocation2 + $0x158] sm:$0xff] }
  0xa9   : > { %v980_v29 = vmul.f32 %v3276_v0, %v3984_v12  ;;  %v1278_v1 = vmul.f32 %v3333_v58, %v743_v54  ;;  %v1279_v47 = vmul.f32 %v3333_v58, %v744_v43  ;;  %v713_v3 = vadd.f32 %v681_v40, %v613_v22 }
  0xaa   : > { %5298 = vst [vmem:[#allocation59_spill] sm:$0xff] %v4028_v53  ;;  %v614_v28 = vadd.f32 %v582_v45, %v514_v61  ;;  %v812_v42 = vadd.f32 %v780_v59, %v712_v63  ;;  %v1211_v44 = vadd.f32 %v1179_v13, %v1111_v56  ;;  %v4040_v37 = vmul.f32 %v3336_v31, %v3950_v50  ;;  %v746_v61 = vld [vmem:[#allocation2 + $0x144] sm:$0xff]  ;;  %v4074_v59 = vld [vmem:[#allocation2 + $0x153] sm:$0xff] }
  0xab   : > { %v1012_v39 = vadd.f32 %v980_v29, %v912_v62  ;;  %v4044_v11 = vadd.f32 %v1278_v1, %v1210_v25  ;;  %v4048_v54 = vmul.f32 %v3345_v49, %v3952_v17  ;;  %v682_v45 = vmul.f32 %v3228_v21, %v646_v46  ;;  %v547_v62 = vld [vmem:[#allocation2 + $0x152] sm:$0xff] }
  0xac   : > { %5299 = vst [vmem:[#allocation60_spill] sm:$0xff] %v4040_v37  ;;  %v781_v43 = vmul.f32 %v3245_v33, %v745_v38  ;;  %v1080_v13 = vmul.f32 %v3297_v30, %v545_v55  ;;  %v4055_v50 = vmul.f32 %v3336_v31, %v3982_v27  ;;  %v881_v29 = vmul.f32 %v3263_v51, %v4004_v35  ;;  %v4069_v27 = vld [vmem:[#allocation2 + $0x159] sm:$0xff] }
  0xad   : > { %5300 = vst [vmem:[#allocation61_spill] sm:$0xff] %v4044_v11  ;;  %5301 = vst [vmem:[#allocation62_spill] sm:$0xff] %v4048_v54  ;;  %v415_v25 = vmul.f32 %v3208_v8, %v4036_v2  ;;  %v4063_v17 = vmul.f32 %v3345_v49, %v3984_v12  ;;  %v714_v18 = vadd.f32 %v682_v45, %v614_v28  ;;  %v548_v45 = vld [vmem:[#allocation2 + $0x15a] sm:$0xff] }
  0xae   : > { %5302 = vst [vmem:[#allocation63_spill] sm:$0xff] %v4055_v50  ;;  %v813_v16 = vadd.f32 %v781_v43, %v713_v3  ;;  %v483_v55 = vmul.f32 %v3211_v9, %v4042_v20  ;;  %v4071_v63 = vadd.f32 %v1279_v47, %v1211_v44  ;;  %v1112_v56 = vadd.f32 %v1080_v13, %v1012_v39  ;;  %v648_v50 = vld [vmem:[#allocation2 + $0x15b] sm:$0xff] }
  0xaf   : > { %5303 = vst [vmem:[#allocation64_spill] sm:$0xff] %v4063_v17  ;;  %v782_v22 = vmul.f32 %v3245_v33, %v746_v61  ;;  %v913_v40 = vadd.f32 %v881_v29, %v812_v42  ;;  %v981_v12 = vmul.f32 %v3276_v0, %v4006_v52  ;;  %v583_v28 = vmul.f32 %v3219_v14, %v547_v62 }
  0xb0   : > { %5304 = vst [vmem:[#allocation65_spill] sm:$0xff] %v4071_v63  ;;  %v515_v1 = vadd.f32 %v483_v55, %v415_v25  ;;  %v882_v3 = vmul.f32 %v3263_v51, %v4036_v2  ;;  %v1081_v43 = vmul.f32 %v3297_v30, %v546_v34  ;;  %v1180_v47 = vmul.f32 %v3323_v48, %v645_v24  ;;  %v4089_v55 = vld [vmem:[#allocation2 + $0x154] sm:$0xff] }
  0xb1   : > { %v416_v44 = vmul.f32 %v3208_v8, %v4067_v26  ;;  %v484_v42 = vmul.f32 %v3211_v9, %v4069_v27  ;;  %v814_v39 = vadd.f32 %v782_v22, %v714_v18  ;;  %v683_v25 = vmul.f32 %v3228_v21, %v4074_v59 }
  0xb2   : > { %v615_v13 = vadd.f32 %v583_v28, %v515_v1  ;;  %v914_v29 = vadd.f32 %v882_v3, %v813_v16  ;;  %v1013_v63 = vadd.f32 %v981_v12, %v913_v40  ;;  %v1181_v17 = vmul.f32 %v3323_v48, %v646_v46  ;;  %v4103_v12 = vld [vmem:[#allocation2 + $0x168] sm:$0xff] }
  0xb3   : > { %v516_v34 = vadd.f32 %v484_v42, %v416_v44  ;;  %v584_v24 = vmul.f32 %v3219_v14, %v548_v45  ;;  %v1280_v11 = vmul.f32 %v3333_v58, %v745_v38  ;;  %v982_v54 = vmul.f32 %v3276_v0, %v4042_v20  ;;  %v4105_v28 = vld [vmem:[#allocation2 + $0x169] sm:$0xff]  ;;  %v748_v42 = vld [vmem:[#allocation2 + $0x15c] sm:$0xff] }
  0xb4   : > { %v715_v18 = vadd.f32 %v683_v25, %v615_v13  ;;  %v883_v16 = vmul.f32 %v3263_v51, %v4067_v26  ;;  %v1212_v22 = vadd.f32 %v1180_v47, %v1112_v56  ;;  %v4099_v1 = vmul.f32 %v3333_v58, %v746_v61 }
  0xb5   : > { %v616_v40 = vadd.f32 %v584_v24, %v516_v34  ;;  %v783_v46 = vmul.f32 %v3245_v33, %v4089_v55  ;;  %v4109_v38 = vmul.f32 %v3336_v31, %v4004_v35  ;;  %v1014_v3 = vadd.f32 %v982_v54, %v914_v29  ;;  %v549_v34 = vld [vmem:[#allocation2 + $0x16a] sm:$0xff] }
  0xb6   : > { %v684_v44 = vmul.f32 %v3228_v21, %v648_v50  ;;  %v915_v56 = vadd.f32 %v883_v16, %v814_v39  ;;  %v1113_v47 = vadd.f32 %v1081_v43, %v1013_v63  ;;  %v4114_v61 = vmul.f32 %v3345_v49, %v4006_v52  ;;  %v4123_v39 = vld [vmem:[#allocation2 + $0x170] sm:$0xff] }
  0xb7   : > { %5305 = vst [vmem:[#allocation66_spill] sm:$0xff] %v4109_v38  ;;  %v1082_v13 = vmul.f32 %v3297_v30, %v547_v62  ;;  %v815_v25 = vadd.f32 %v783_v46, %v715_v18  ;;  %v983_v37 = vmul.f32 %v3276_v0, %v4069_v27  ;;  %v417_v35 = vmul.f32 %v3208_v8, %v4103_v12  ;;  %v4125_v63 = vld [vmem:[#allocation2 + $0x171] sm:$0xff] }
  0xb8   : > { %5306 = vst [vmem:[#allocation67_spill] sm:$0xff] %v4114_v61  ;;  %v716_v24 = vadd.f32 %v684_v44, %v616_v40  ;;  %v485_v54 = vmul.f32 %v3211_v9, %v4105_v28  ;;  %v4127_v52 = vadd.f32 %v1280_v11, %v1212_v22  ;;  %v4131_v62 = vmul.f32 %v3336_v31, %v4036_v2  ;;  %v649_v18 = vld [vmem:[#allocation2 + $0x16b] sm:$0xff] }
  0xb9   : > { %v784_v43 = vmul.f32 %v3245_v33, %v748_v42  ;;  %v884_v29 = vmul.f32 %v3263_v51, %v4103_v12  ;;  %v1114_v16 = vadd.f32 %v1082_v13, %v1014_v3  ;;  %v1015_v40 = vadd.f32 %v983_v37, %v915_v56  ;;  %v550_v61 = vld [vmem:[#allocation2 + $0x172] sm:$0xff] }
  0xba   : > { %5307 = vst [vmem:[#allocation68_spill] sm:$0xff] %v4127_v52  ;;  %5308 = vst [vmem:[#allocation69_spill] sm:$0xff] %v4131_v62  ;;  %v517_v46 = vadd.f32 %v485_v54, %v417_v35  ;;  %v585_v44 = vmul.f32 %v3219_v14, %v549_v34  ;;  %v984_v11 = vmul.f32 %v3276_v0, %v4105_v28  ;;  %v650_v3 = vld [vmem:[#allocation2 + $0x173] sm:$0xff] }
  0xbb   : > { %v916_v38 = vadd.f32 %v884_v29, %v815_v25  ;;  %v418_v2 = vmul.f32 %v3208_v8, %v4123_v39  ;;  %v486_v22 = vmul.f32 %v3211_v9, %v4125_v63  ;;  %v816_v62 = vadd.f32 %v784_v43, %v716_v24  ;;  %v749_v56 = vld [vmem:[#allocation2 + $0x16c] sm:$0xff] }
  0xbc   : > { %v1083_v52 = vmul.f32 %v3297_v30, %v548_v45  ;;  %v617_v53 = vadd.f32 %v585_v44, %v517_v46  ;;  %v685_v37 = vmul.f32 %v3228_v21, %v649_v18  ;;  %v1213_v13 = vadd.f32 %v1181_v17, %v1113_v47  ;;  %v850_v17 = vld [vmem:[#allocation2 + $0x180] sm:$0xff] }
  0xbd   : > { %v1016_v35 = vadd.f32 %v984_v11, %v916_v38  ;;  %v518_v25 = vadd.f32 %v486_v22, %v418_v2  ;;  %v586_v54 = vmul.f32 %v3219_v14, %v550_v61  ;;  %v1182_v8 = vmul.f32 %v3323_v48, %v4074_v59  ;;  %v750_v59 = vld [vmem:[#allocation2 + $0x174] sm:$0xff]  ;;  %v851_v22 = vld [vmem:[#allocation2 + $0x188] sm:$0xff] }
  0xbe   : > { %v1115_v29 = vadd.f32 %v1083_v52, %v1015_v40  ;;  %v717_v32 = vadd.f32 %v685_v37, %v617_v53  ;;  %v885_v9 = vmul.f32 %v3263_v51, %v4123_v39  ;;  %v1084_v45 = vmul.f32 %v3297_v30, %v549_v34 }
  0xbf   : > { %v618_v24 = vadd.f32 %v586_v54, %v518_v25  ;;  %v686_v43 = vmul.f32 %v3228_v21, %v650_v3  ;;  %v785_v46 = vmul.f32 %v3245_v33, %v749_v56  ;;  %v4155_v38 = vmul.f32 %v3345_v49, %v4042_v20 }
  0xc0   : > { %v1183_v14 = vmul.f32 %v3323_v48, %v648_v50  ;;  %v1214_v47 = vadd.f32 %v1182_v8, %v1114_v16  ;;  %v917_v53 = vadd.f32 %v885_v9, %v816_v62  ;;  %v1116_v52 = vadd.f32 %v1084_v45, %v1016_v35  ;;  %v950_v35 = vld [vmem:[#allocation2 + $0x181] sm:$0xff] }
  0xc1   : > { %v718_v40 = vadd.f32 %v686_v43, %v618_v24  ;;  %v817_v44 = vadd.f32 %v785_v46, %v717_v32  ;;  %v985_v34 = vmul.f32 %v3276_v0, %v4125_v63  ;;  %v4161_v21 = vadd.f32 %v4099_v1, %v1213_v13  ;;  %v1051_v46 = vld [vmem:[#allocation2 + $0x18a] sm:$0xff] }
  0xc2   : > { %v1215_v11 = vadd.f32 %v1183_v14, %v1115_v29  ;;  %v1282_v2 = vmul.f32 %v3333_v58, %v4089_v55  ;;  %v886_v20 = vmul.f32 %v3263_v51, %v850_v17  ;;  %v1283_v50 = vmul.f32 %v3333_v58, %v748_v42 }
  0xc3   : > { %v786_v62 = vmul.f32 %v3245_v33, %v750_v59  ;;  %v1017_v16 = vadd.f32 %v985_v34, %v917_v53  ;;  %v1184_v32 = vmul.f32 %v3323_v48, %v649_v18  ;;  %v4173_v1 = vmul.f32 %v3336_v31, %v4067_v26  ;;  %v1050_v33 = vld [vmem:[#allocation2 + $0x182] sm:$0xff]  ;;  %v1151_v53 = vld [vmem:[#allocation2 + $0x18b] sm:$0xff] }
  0xc4   : > { %v4169_v37 = vadd.f32 %v1282_v2, %v1214_v47  ;;  %v4177_v13 = vmul.f32 %v3345_v49, %v4069_v27  ;;  %v1085_v55 = vmul.f32 %v3297_v30, %v550_v61  ;;  %v918_v54 = vadd.f32 %v886_v20, %v817_v44  ;;  %v1251_v44 = vld [vmem:[#allocation2 + $0x18c] sm:$0xff] }
  0xc5   : > { %v818_v25 = vadd.f32 %v786_v62, %v718_v40  ;;  %v1216_v42 = vadd.f32 %v1184_v32, %v1116_v52  ;;  %v887_v29 = vmul.f32 %v3263_v51, %v851_v22  ;;  %v4181_v18 = vadd.f32 %v1283_v50, %v1215_v11  ;;  %v951_v51 = vld [vmem:[#allocation2 + $0x189] sm:$0xff]  ;;  %v1620_v50 = vld [vmem:[#allocation2 + $0x33] sm:$0xff] }
  0xc6   : > { %v4185_v8 = vmul.f32 %v3336_v31, %v4103_v12  ;;  %v4189_v26 = vmul.f32 %v3345_v49, %v4105_v28  ;;  %v1185_v27 = vmul.f32 %v3323_v48, %v650_v3  ;;  %v1117_v61 = vadd.f32 %v1085_v55, %v1017_v16  ;;  %v1250_v52 = vld [vmem:[#allocation2 + $0x184] sm:$0xff]  ;;  %v1350_v32 = vld [vmem:[#allocation2 + $0x198] sm:$0xff] }
  0xc7   : > { %5309 = vst [vmem:[#allocation70_spill] sm:$0xff] %v4181_v18  ;;  %v1284_v9 = vmul.f32 %v3333_v58, %v749_v56  ;;  %v1285_v45 = vmul.f32 %v3333_v58, %v750_v59  ;;  %v986_v24 = vmul.f32 %v3276_v0, %v950_v35  ;;  %v4197_v43 = vmul.f32 %v3336_v31, %v4123_v39  ;;  %v1150_v56 = vld [vmem:[#allocation2 + $0x183] sm:$0xff]  ;;  %v1450_v55 = vld [vmem:[#allocation2 + $0x199] sm:$0xff] }
  0xc8   : > { %5310 = vst [vmem:[#allocation71_spill] sm:$0xff] %v4189_v26  ;;  %v4201_v12 = vmul.f32 %v3345_v49, %v4125_v63  ;;  %v1086_v28 = vmul.f32 %v3297_v30, %v1050_v33  ;;  %v4205_v3 = vmul.f32 %v3336_v31, %v850_v17  ;;  %v919_v59 = vadd.f32 %v887_v29, %v818_v25  ;;  %v3045_v17 = vld [vmem:[%s5239_s1 + $0x10] sm:$0x1f]  ;;  %v1451_v29 = vld [vmem:[#allocation2 + $0x1a1] sm:$0xff]  ;;  %v2424_v26 = vld [vmem:[#allocation2 + $0x79] sm:$0xff] }
  0xc9   : > { %5311 = vst [vmem:[#allocation72_spill] sm:$0xff] %v4197_v43  ;;  %v4207_v14 = vadd.f32 %v1284_v9, %v1216_v42  ;;  %v1018_v47 = vadd.f32 %v986_v24, %v918_v54  ;;  %v1388_v39 = vadd.f32 %v3411_v23, %v3440_v41  ;;  %v4212_v40 = vmul.f32 %v3345_v49, %v950_v35  ;;  %v3046_v35 = vld [vmem:[#allocation2 + $0x32] sm:$0xff] }
  0xca   : > { %5312 = vst [vmem:[#allocation73_spill] sm:$0xff] %v4201_v12  ;;  %5313 = vst [vmem:[#allocation74_spill] sm:$0xff] %v4205_v3  ;;  %v987_v63 = vmul.f32 %v3276_v0, %v951_v51  ;;  %v4219_v34 = vrot.slane %v3045_v17, %v3195_v6  ;;  %v4222_v11 = vrot.slane %v3045_v17, %v3197_v7  ;;  %v349_v0 = vld [vmem:[%s5239_s1 + $0x18] sm:$0x1f] }
  0xcb   : > { %5314 = vst [vmem:[#allocation75_spill] sm:$0xff] %v4207_v14  ;;  %5315 = vst [vmem:[#allocation76_spill] sm:$0xff] %v4212_v40  ;;  %v1217_v2 = vadd.f32 %v1185_v27, %v1117_v61  ;;  %v1087_v20 = vmul.f32 %v3297_v30, %v1051_v46  ;;  %v1186_v23 = vmul.f32 %v3323_v48, %v1150_v56  ;;  %v1720_v27 = vld [vmem:[#allocation2 + $0x34] sm:$0xff]  ;;  %v1821_v56 = vld [vmem:[#allocation2 + $0x48] sm:$0xff] }
  0xcc   : > { %v1488_v41 = vadd.f32 %v3423_v19, %v1388_v39  ;;  %v4231_v62 = vmul.f32 %v3323_v48, %v1151_v53  ;;  %v1286_v16 = vmul.f32 %v3333_v58, %v1250_v52  ;;  %v1556_v25 = vmul.f32 %v3046_v35, %v4219_v34  ;;  %v1351_v48 = vld [vmem:[#allocation2 + $0x1a0] sm:$0xff]  ;;  %v1921_v39 = vld [vmem:[#allocation2 + $0x49] sm:$0xff] }
  0xcd   : > { %v4236_v30 = vrot.slane %v3045_v17, %v3213_v10  ;;  %v1118_v42 = vadd.f32 %v1086_v28, %v1018_v47  ;;  %v1019_v54 = vadd.f32 %v987_v63, %v919_v59  ;;  %v4239_v33 = vmul.f32 %v3333_v58, %v1251_v44 }
  0xce   : > { %v4242_v19 = vmul.f32 %v3336_v31, %v851_v22  ;;  %v4245_v61 = vmul.f32 %v3345_v49, %v951_v51  ;;  %v1588_v9 = vadd.f32 %v1556_v25, %v1488_v41  ;;  %v1656_v24 = vmul.f32 %v4222_v11, %v1620_v50  ;;  %v2021_v41 = vld [vmem:[#allocation2 + $0x4a] sm:$0xff] }
  0xcf   : > { %v4249_v46 = vrot.slane %v349_v0, %v3191_v4  ;;  %v4251_v28 = vadd.f32 %v1285_v45, %v1217_v2  ;;  %v4254_v58 = vmul.f32 %v3336_v31, %v1350_v32  ;;  %v4257_v22 = vmul.f32 %v3345_v49, %v1450_v55  ;;  %v350_v45 = vld [vmem:[%s5239_s1 + $0x20] sm:$0x1f]  ;;  %v2121_v50 = vld [vmem:[#allocation2 + $0x4b] sm:$0xff] }
  0xd0   : > { %5316 = vst [vmem:[#allocation77_spill] sm:$0xff] %v4242_v19  ;;  %5317 = vst [vmem:[#allocation78_spill] sm:$0xff] %v4245_v61  ;;  %v4260_v47 = vrot.slane %v349_v0, %v3193_v5  ;;  %v4263_v51 = vmul.f32 %v3336_v31, %v1351_v48  ;;  %v4266_v59 = vmul.f32 %v3345_v49, %v1451_v29  ;;  %v4296_v29 = vld [vmem:[#allocation2 + $0x60] sm:$0xff]  ;;  %v5325_v61 = vld [vmem:[#allocation4_spill] sm:$0xff] }
  0xd1   : > { %5318 = vst [vmem:[#allocation79_spill] sm:$0xff] %v4251_v28  ;;  %5319 = vst [vmem:[#allocation80_spill] sm:$0xff] %v4254_v58  ;;  %v1688_v53 = vadd.f32 %v1656_v24, %v1588_v9  ;;  %v1756_v52 = vmul.f32 %v4236_v30, %v1720_v27  ;;  %v4272_v63 = vadd.f32 %v1087_v20, %v1019_v54  ;;  %v1621_v54 = vld [vmem:[#allocation2 + $0x3b] sm:$0xff]  ;;  %v3048_v28 = vld [vmem:[#allocation2 + $0x4a] sm:$0xff] }
  0xd2   : > { %5320 = vst [vmem:[#allocation81_spill] sm:$0xff] %v4257_v22  ;;  %5321 = vst [vmem:[#allocation82_spill] sm:$0xff] %v4263_v51  ;;  %v1218_v44 = vadd.f32 %v1186_v23, %v1118_v42  ;;  %v4275_v17 = vrot.slane %v349_v0, %v3195_v6  ;;  %v4278_v31 = vrot.slane %v349_v0, %v3197_v7  ;;  %v2221_v23 = vld [vmem:[#allocation2 + $0x4c] sm:$0xff]  ;;  %v4300_v27 = vld [vmem:[#allocation2 + $0x62] sm:$0xff] }
  0xd3   : > { %5322 = vst [vmem:[#allocation83_spill] sm:$0xff] %v4266_v59  ;;  %v1788_v2 = vadd.f32 %v1756_v52, %v1688_v53  ;;  %v1857_v49 = vmul.f32 %v4249_v46, %v1821_v56  ;;  %v4282_v32 = vrot.slane %v349_v0, %v3213_v10  ;;  %v1389_v55 = vadd.f32 %v3475_v36, %v3460_v15  ;;  %v4298_v0 = vld [vmem:[#allocation2 + $0x61] sm:$0xff]  ;;  %v2122_v59 = vld [vmem:[#allocation2 + $0x53] sm:$0xff] }
  0xd4   : > { %v1957_v20 = vmul.f32 %v4260_v47, %v1921_v39  ;;  %v4288_v35 = vrot.slane %v350_v45, %v3191_v4  ;;  %v4291_v25 = vrot.slane %v350_v45, %v3193_v5  ;;  %v4294_v42 = vrot.slane %v350_v45, %v3195_v6  ;;  %v3047_v36 = vld [vmem:[#allocation2 + $0x3a] sm:$0xff]  ;;  %v4311_v56 = vld [vmem:[#allocation2 + $0x63] sm:$0xff] }
  0xd5   : > { %v1889_v48 = vadd.f32 %v1857_v49, %v1788_v2  ;;  %v4303_v15 = vrot.slane %v350_v45, %v3197_v7  ;;  %v1489_v4 = vadd.f32 %v3479_v60, %v1389_v55  ;;  %v1557_v5 = vmul.f32 %v3047_v36, %v4219_v34  ;;  %v1721_v52 = vld [vmem:[#allocation2 + $0x3c] sm:$0xff]  ;;  %v4317_v2 = vld [vmem:[#allocation2 + $0x64] sm:$0xff]  ;;  %v2022_v55 = vld [vmem:[#allocation2 + $0x52] sm:$0xff] }
  0xd6   : > { %v4307_v9 = vadd.f32 %v1286_v16, %v1218_v44  ;;  %v2057_v6 = vmul.f32 %v4275_v17, %v2021_v41  ;;  %v2157_v24 = vmul.f32 %v4278_v31, %v2121_v50  ;;  %v4314_v53 = vrot.slane %v350_v45, %v3213_v10  ;;  %v1822_v16 = vld [vmem:[#allocation2 + $0x50] sm:$0xff] }
  0xd7   : > { %v1989_v39 = vadd.f32 %v1957_v20, %v1889_v48  ;;  %v2257_v7 = vmul.f32 %v4282_v32, %v2221_v23  ;;  %v1589_v60 = vadd.f32 %v1557_v5, %v1489_v4  ;;  %v1657_v49 = vmul.f32 %v4222_v11, %v1621_v54  ;;  %v1922_v45 = vld [vmem:[#allocation2 + $0x51] sm:$0xff]  ;;  %v5324_v20 = vld [vmem:[#allocation3_spill] sm:$0xff] }
  0xd8   : > { %5323 = vst [vmem:[#allocation84_spill] sm:$0xff] %v4307_v9  ;;  %v2358_v44 = vmul.f32 %v4288_v35, %v4296_v29  ;;  %v2458_v41 = vmul.f32 %v4291_v25, %v4298_v0  ;;  %v2558_v10 = vmul.f32 %v4294_v42, %v4300_v27  ;;  %v1390_v48 = vadd.f32 %v5324_v20, %v3471_v57  ;;  %v2222_v51 = vld [vmem:[#allocation2 + $0x54] sm:$0xff]  ;;  %v2323_v9 = vld [vmem:[#allocation2 + $0x68] sm:$0xff] }
  0xd9   : > { %v2089_v36 = vadd.f32 %v2057_v6, %v1989_v39  ;;  %v2658_v4 = vmul.f32 %v4303_v15, %v4311_v56  ;;  %v1689_v54 = vadd.f32 %v1657_v49, %v1589_v60  ;;  %v1757_v5 = vmul.f32 %v4236_v30, %v1721_v52  ;;  %v2423_v49 = vld [vmem:[#allocation2 + $0x69] sm:$0xff] }
  0xda   : > { %v4333_v22 = vmul.f32 %v4314_v53, %v4317_v2  ;;  %v1858_v58 = vmul.f32 %v4249_v46, %v1822_v16  ;;  %v1490_v19 = vadd.f32 %v5325_v61, %v1390_v48  ;;  %v1558_v57 = vmul.f32 %v3048_v28, %v4219_v34  ;;  %v4340_v20 = vld [vmem:[#allocation2 + $0x6a] sm:$0xff] }
  0xdb   : > { %v2189_v6 = vadd.f32 %v2157_v24, %v2089_v36  ;;  %v1789_v39 = vadd.f32 %v1757_v5, %v1689_v54  ;;  %v1958_v60 = vmul.f32 %v4260_v47, %v1922_v45  ;;  %v2058_v52 = vmul.f32 %v4275_v17, %v2022_v55  ;;  %v4346_v24 = vld [vmem:[#allocation2 + $0x6b] sm:$0xff]  ;;  %v5327_v55 = vld [vmem:[#allocation6_spill] sm:$0xff] }
  0xdc   : > { %v2158_v40 = vmul.f32 %v4278_v31, %v2122_v59  ;;  %v2258_v3 = vmul.f32 %v4282_v32, %v2222_v51  ;;  %v1590_v16 = vadd.f32 %v1558_v57, %v1490_v19  ;;  %v1658_v14 = vmul.f32 %v2121_v50, %v4222_v11  ;;  %v4348_v36 = vld [vmem:[#allocation2 + $0x6c] sm:$0xff] }
  0xdd   : > { %v2289_v61 = vadd.f32 %v2257_v7, %v2189_v6  ;;  %v1890_v48 = vadd.f32 %v1858_v58, %v1789_v39  ;;  %v2359_v28 = vmul.f32 %v4288_v35, %v2323_v9  ;;  %v5326_v45 = vld [vmem:[#allocation5_spill] sm:$0xff]  ;;  %v2459_v5 = vmul.f32 %v4291_v25, %v2423_v49  ;;  %v5328_v58 = vld [vmem:[#allocation7_spill] sm:$0xff] }
  0xde   : > { %v1391_v54 = vadd.f32 %v5327_v55, %v5326_v45  ;;  %v2559_v12 = vmul.f32 %v4294_v42, %v4340_v20  ;;  %v1690_v43 = vadd.f32 %v1658_v14, %v1590_v16  ;;  %v1758_v19 = vmul.f32 %v2221_v23, %v4236_v30  ;;  %v3049_v6 = vld [vmem:[#allocation2 + $0x52] sm:$0xff] }
  0xdf   : > { %v2390_v50 = vadd.f32 %v2358_v44, %v2289_v61  ;;  %v1990_v7 = vadd.f32 %v1958_v60, %v1890_v48  ;;  %v1559_v39 = vmul.f32 %v3049_v6, %v4219_v34  ;;  %v2659_v18 = vmul.f32 %v4303_v15, %v4346_v24  ;;  %v2324_v44 = vld [vmem:[#allocation2 + $0x78] sm:$0xff] }
  0xe0   : > { %v1491_v57 = vadd.f32 %v5328_v58, %v1391_v54  ;;  %v4362_v45 = vmul.f32 %v4314_v53, %v4348_v36  ;;  %v1790_v55 = vadd.f32 %v1758_v19, %v1690_v43  ;;  %v1859_v14 = vmul.f32 %v4296_v29, %v4249_v46 }
  0xe1   : > { %v2490_v16 = vadd.f32 %v2458_v41, %v2390_v50  ;;  %v2090_v23 = vadd.f32 %v2058_v52, %v1990_v7  ;;  %v1659_v61 = vmul.f32 %v2122_v59, %v4222_v11  ;;  %v1959_v54 = vmul.f32 %v4298_v0, %v4260_v47  ;;  %v5329_v7 = vld [vmem:[#allocation8_spill] sm:$0xff]  ;;  %v5330_v0 = vld [vmem:[#allocation9_spill] sm:$0xff] }
  0xe2   : > { %v1591_v60 = vadd.f32 %v1559_v39, %v1491_v57  ;;  %v1891_v48 = vadd.f32 %v1859_v14, %v1790_v55  ;;  %v2059_v58 = vmul.f32 %v4300_v27, %v4275_v17  ;;  %v2159_v6 = vmul.f32 %v4311_v56, %v4278_v31  ;;  %v2524_v55 = vld [vmem:[#allocation2 + $0x7a] sm:$0xff] }
  0xe3   : > { %v2590_v43 = vadd.f32 %v2558_v10, %v2490_v16  ;;  %v2190_v19 = vadd.f32 %v2158_v40, %v2090_v23  ;;  %v1759_v41 = vmul.f32 %v2222_v51, %v4236_v30  ;;  %v2259_v59 = vmul.f32 %v4317_v2, %v4282_v32  ;;  %v4383_v51 = vld [vmem:[%s5240_s2] ss:$0 sm:$0xff]  ;;  %v5331_v23 = vld [vmem:[#allocation10_spill] sm:$0xff] }
  0xe4   : > { %v1691_v29 = vadd.f32 %v1659_v61, %v1591_v60  ;;  %v1991_v52 = vadd.f32 %v1959_v54, %v1891_v48  ;;  %v2360_v50 = vmul.f32 %v4288_v35, %v2324_v44  ;;  %v1392_v57 = vadd.f32 %v5330_v0, %v5329_v7  ;;  %v3050_v61 = vld [vmem:[#allocation2 + $0x62] sm:$0xff] }
  0xe5   : > { %v2690_v39 = vadd.f32 %v2658_v4, %v2590_v43  ;;  %v2290_v27 = vadd.f32 %v2258_v3, %v2190_v19  ;;  %v1860_v40 = vmul.f32 %v2323_v9, %v4249_v46  ;;  %v2460_v16 = vmul.f32 %v4291_v25, %v2424_v26  ;;  %v4389_v54 = vld [vmem:[#allocation2 + $0x7b] sm:$0xff] }
  0xe6   : > { %v1791_v14 = vadd.f32 %v1759_v41, %v1691_v29  ;;  %v2091_v10 = vadd.f32 %v2059_v58, %v1991_v52  ;;  %v1492_v60 = vadd.f32 %v5331_v23, %v1392_v57  ;;  %v1560_v48 = vmul.f32 %v3050_v61, %v4219_v34  ;;  %v4400_v29 = vld [vmem:[#allocation2 + $0x7c] sm:$0xff] }
  0xe7   : > { %v2790_v4 = vadd.f32 %v4333_v22, %v2690_v39  ;;  %v2391_v3 = vadd.f32 %v2359_v28, %v2290_v27  ;;  %v1960_v9 = vmul.f32 %v2423_v49, %v4260_v47  ;;  %v2560_v19 = vmul.f32 %v4294_v42, %v2524_v55  ;;  %v5332_v23 = vld [vmem:[#allocation11_spill] sm:$0xff] }
  0xe8   : > { %v1892_v43 = vadd.f32 %v1860_v40, %v1791_v14  ;;  %v2191_v58 = vadd.f32 %v2159_v6, %v2091_v10  ;;  %v1592_v41 = vadd.f32 %v1560_v48, %v1492_v60  ;;  %v1660_v22 = vmul.f32 %v4311_v56, %v4222_v11  ;;  %v5333_v60 = vld [vmem:[#allocation13_spill] sm:$0xff] }
  0xe9   : > { %v2829_v28 = vadd.f32 %v4383_v51, %v2790_v4  ;;  %v2491_v52 = vadd.f32 %v2459_v5, %v2391_v3  ;;  %v2060_v7 = vmul.f32 %v4340_v20, %v4275_v17  ;;  %v2660_v57 = vmul.f32 %v4303_v15, %v4389_v54  ;;  %v2325_v20 = vld [vmem:[#allocation2 + $0x80] sm:$0xff] }
  0xea   : > { %v1992_v49 = vadd.f32 %v1960_v9, %v1892_v43  ;;  %v2291_v0 = vadd.f32 %v2259_v59, %v2191_v58  ;;  %v1692_v6 = vadd.f32 %v1660_v22, %v1592_v41  ;;  %v1760_v39 = vmul.f32 %v4317_v2, %v4236_v30  ;;  %v2425_v43 = vld [vmem:[#allocation2 + $0x81] sm:$0xff]  ;;  %v5334_v58 = vld [vmem:[#allocation14_spill] sm:$0xff] }
  0xeb   : > { %2861 = vst.msk [vmem:[%s4397_s9] sm:$0xff] %vm233_vm0, %v2829_v28  ;;  %v2591_v27 = vadd.f32 %v2559_v12, %v2491_v52  ;;  %v2760_v56 = vmul.f32 %v4314_v53, %v4400_v29  ;;  %v2160_v5 = vmul.f32 %v4346_v24, %v4278_v31  ;;  %v1861_v10 = vmul.f32 %v2324_v44, %v4249_v46 }
  0xec   : > { %v2092_v14 = vadd.f32 %v2060_v7, %v1992_v49  ;;  %v2392_v40 = vadd.f32 %v2360_v50, %v2291_v0  ;;  %v1792_v59 = vadd.f32 %v1760_v39, %v1692_v6  ;;  %v1393_v61 = vadd.f32 %v5333_v60, %v5332_v23  ;;  %v3051_v50 = vld [vmem:[#allocation2 + $0x6a] sm:$0xff]  ;;  %v2525_v7 = vld [vmem:[#allocation2 + $0x82] sm:$0xff] }
  0xed   : > { %v2691_v48 = vadd.f32 %v2659_v18, %v2591_v27  ;;  %v2260_v12 = vmul.f32 %v4348_v36, %v4282_v32  ;;  %v1961_v4 = vmul.f32 %v2424_v26, %v4260_v47  ;;  %v1561_v22 = vmul.f32 %v3051_v50, %v4219_v34  ;;  %v2526_v50 = vld [vmem:[#allocation2 + $0x92] sm:$0xff] }
  0xee   : > { %v2192_v2 = vadd.f32 %v2160_v5, %v2092_v14  ;;  %v2492_v3 = vadd.f32 %v2460_v16, %v2392_v40  ;;  %v1893_v9 = vadd.f32 %v1861_v10, %v1792_v59  ;;  %v1493_v41 = vadd.f32 %v5334_v58, %v1393_v61  ;;  %v4434_v5 = vld [vmem:[#allocation2 + $0x83] sm:$0xff] }
  0xef   : > { %v2791_v44 = vadd.f32 %v4362_v45, %v2691_v48  ;;  %v2361_v52 = vmul.f32 %v4288_v35, %v2325_v20  ;;  %v2061_v18 = vmul.f32 %v2524_v55, %v4275_v17  ;;  %v1661_v16 = vmul.f32 %v4346_v24, %v4222_v11  ;;  %v4447_v61 = vld [vmem:[#allocation2 + $0x84] sm:$0xff] }
  0xf0   : > { %v2292_v28 = vadd.f32 %v2260_v12, %v2192_v2  ;;  %v2592_v49 = vadd.f32 %v2560_v19, %v2492_v3  ;;  %v1993_v0 = vadd.f32 %v1961_v4, %v1893_v9  ;;  %v1593_v26 = vadd.f32 %v1561_v22, %v1493_v41  ;;  %v2326_v19 = vld [vmem:[#allocation2 + $0x90] sm:$0xff]  ;;  %v5335_v3 = vld [vmem:[#allocation12_spill] sm:$0xff]  ;;  %v5336_v9 = vld [vmem:[#allocation15_spill] sm:$0xff] }
  0xf1   : > { %v2830_v6 = vadd.f32 %v4383_v51, %v2791_v44  ;;  %v2461_v27 = vmul.f32 %v4291_v25, %v2425_v43  ;;  %v2161_v45 = vmul.f32 %v4389_v54, %v4278_v31  ;;  %v1761_v59 = vmul.f32 %v4348_v36, %v4236_v30  ;;  %v2426_v4 = vld [vmem:[#allocation2 + $0x91] sm:$0xff] }
  0xf2   : > { %v2393_v39 = vadd.f32 %v2361_v52, %v2292_v28  ;;  %v2692_v14 = vadd.f32 %v2660_v57, %v2592_v49  ;;  %v2093_v55 = vadd.f32 %v2061_v18, %v1993_v0  ;;  %v1693_v40 = vadd.f32 %v1661_v16, %v1593_v26  ;;  %v4459_v52 = vld [vmem:[#allocation2 + $0x93] sm:$0xff]  ;;  %v5337_v18 = vld [vmem:[#allocation16_spill] sm:$0xff] }
  0xf3   : > { %v4440_v24 = vadd.f32 %v4231_v62, %v4272_v63  ;;  %2862 = vst.msk [vmem:[%s4397_s9 + $0x8] sm:$0xff] %vm233_vm0, %v2830_v6  ;;  %v2561_v23 = vmul.f32 %v4294_v42, %v2525_v7  ;;  %v2261_v57 = vmul.f32 %v4400_v29, %v4282_v32  ;;  %v1862_v12 = vmul.f32 %v2325_v20, %v4249_v46  ;;  %v3052_v0 = vld [vmem:[#allocation2 + $0x7a] sm:$0xff] }
  0xf4   : > { %v2493_v10 = vadd.f32 %v2461_v27, %v2393_v39  ;;  %v2792_v60 = vadd.f32 %v2760_v56, %v2692_v14  ;;  %v2193_v48 = vadd.f32 %v2161_v45, %v2093_v55  ;;  %v1793_v2 = vadd.f32 %v1761_v59, %v1693_v40  ;;  %v4466_v39 = vld [vmem:[#allocation2 + $0x94] sm:$0xff] }
  0xf5   : > { %v2661_v62 = vmul.f32 %v4303_v15, %v4434_v5  ;;  %v2362_v63 = vmul.f32 %v4288_v35, %v2326_v19  ;;  %v1394_v58 = vadd.f32 %v5336_v9, %v5335_v3  ;;  %v1962_v44 = vmul.f32 %v2425_v43, %v4260_v47  ;;  %v2527_v3 = vld [vmem:[#allocation2 + $0x9a] sm:$0xff] }
  0xf6   : > { %v2593_v36 = vadd.f32 %v2561_v23, %v2493_v10  ;;  %v2831_v41 = vadd.f32 %v4383_v51, %v2792_v60  ;;  %v2293_v56 = vadd.f32 %v2261_v57, %v2193_v48  ;;  %v1894_v22 = vadd.f32 %v1862_v12, %v1793_v2  ;;  %v2327_v60 = vld [vmem:[#allocation2 + $0x98] sm:$0xff] }
  0xf7   : > { %v2761_v20 = vmul.f32 %v4314_v53, %v4447_v61  ;;  %v1494_v49 = vadd.f32 %v5337_v18, %v1394_v58  ;;  %v1562_v26 = vmul.f32 %v3052_v0, %v4219_v34  ;;  %v2462_v6 = vmul.f32 %v4291_v25, %v2426_v4  ;;  %v2427_v48 = vld [vmem:[#allocation2 + $0x99] sm:$0xff]  ;;  %v5338_v58 = vld [vmem:[#allocation17_spill] sm:$0xff] }
  0xf8   : > { %v2693_v28 = vadd.f32 %v2661_v62, %v2593_v36  ;;  %2863 = vst.msk [vmem:[%s4397_s9 + $0x10] sm:$0xff] %vm233_vm0, %v2831_v41  ;;  %v2394_v16 = vadd.f32 %v2362_v63, %v2293_v56  ;;  %v1994_v27 = vadd.f32 %v1962_v44, %v1894_v22  ;;  %v2062_v43 = vmul.f32 %v2525_v7, %v4275_v17  ;;  %v4483_v9 = vld [vmem:[#allocation2 + $0x9b] sm:$0xff] }
  0xf9   : > { %v2562_v14 = vmul.f32 %v4294_v42, %v2526_v50  ;;  %v1594_v55 = vadd.f32 %v1562_v26, %v1494_v49  ;;  %v1662_v40 = vmul.f32 %v4389_v54, %v4222_v11  ;;  %v2662_v10 = vmul.f32 %v4303_v15, %v4459_v52  ;;  %v5339_v41 = vld [vmem:[#allocation18_spill] sm:$0xff]  ;;  %v5340_v0 = vld [vmem:[#allocation19_spill] sm:$0xff] }
  0xfa   : > { %v2793_v45 = vadd.f32 %v2761_v20, %v2693_v28  ;;  %v2494_v59 = vadd.f32 %v2462_v6, %v2394_v16  ;;  %v2094_v23 = vadd.f32 %v2062_v43, %v1994_v27  ;;  %v2162_v57 = vmul.f32 %v4434_v5, %v4278_v31  ;;  %v4492_v49 = vld [vmem:[#allocation2 + $0x9c] sm:$0xff] }
  0xfb   : > { %v2762_v2 = vmul.f32 %v4314_v53, %v4466_v39  ;;  %v1694_v12 = vadd.f32 %v1662_v40, %v1594_v55  ;;  %v1762_v54 = vmul.f32 %v4400_v29, %v4236_v30  ;;  %v2262_v63 = vmul.f32 %v4447_v61, %v4282_v32  ;;  %v3053_v16 = vld [vmem:[#allocation2 + $0x82] sm:$0xff] }
  0xfc   : > { %v2832_v7 = vadd.f32 %v4383_v51, %v2793_v45  ;;  %v2594_v36 = vadd.f32 %v2562_v14, %v2494_v59  ;;  %v2194_v62 = vadd.f32 %v2162_v57, %v2094_v23  ;;  %v1395_v56 = vadd.f32 %v5339_v41, %v5338_v58 }
  0xfd   : > { %v2363_v22 = vmul.f32 %v4288_v35, %v2327_v60  ;;  %v2463_v44 = vmul.f32 %v4291_v25, %v2427_v48  ;;  %v1794_v28 = vadd.f32 %v1762_v54, %v1694_v12  ;;  %v1863_v29 = vmul.f32 %v2326_v19, %v4249_v46  ;;  %v2328_v19 = vld [vmem:[#allocation2 + $0xa8] sm:$0xff] }
  0xfe   : > { %2864 = vst.msk [vmem:[%s4397_s9 + $0x18] sm:$0xff] %vm233_vm0, %v2832_v7  ;;  %v2694_v20 = vadd.f32 %v2662_v10, %v2594_v36  ;;  %v2294_v18 = vadd.f32 %v2262_v63, %v2194_v62  ;;  %v1495_v26 = vadd.f32 %v5340_v0, %v1395_v56  ;;  %v1563_v6 = vmul.f32 %v3053_v16, %v4219_v34  ;;  %v2428_v54 = vld [vmem:[#allocation2 + $0xa9] sm:$0xff]  ;;  %v5343_v16 = vld [vmem:[#allocation22_spill] sm:$0xff] }
  0xff   : > { %v2563_v27 = vmul.f32 %v4294_v42, %v2527_v3  ;;  %v2663_v43 = vmul.f32 %v4303_v15, %v4483_v9  ;;  %v1895_v45 = vadd.f32 %v1863_v29, %v1794_v28  ;;  %v1963_v14 = vmul.f32 %v2426_v4, %v4260_v47  ;;  %v2528_v36 = vld [vmem:[#allocation2 + $0xaa] sm:$0xff] }
 0x100   : > { %v2794_v55 = vadd.f32 %v2762_v2, %v2694_v20  ;;  %v2395_v40 = vadd.f32 %v2363_v22, %v2294_v18  ;;  %v1595_v59 = vadd.f32 %v1563_v6, %v1495_v26  ;;  %v1663_v10 = vmul.f32 %v4434_v5, %v4222_v11  ;;  %v4513_v56 = vld [vmem:[#allocation2 + $0xab] sm:$0xff] }
 0x101   : > { %v2763_v23 = vmul.f32 %v4314_v53, %v4492_v49  ;;  %v1995_v57 = vadd.f32 %v1963_v14, %v1895_v45  ;;  %v2063_v7 = vmul.f32 %v2526_v50, %v4275_v17  ;;  %v2163_v12 = vmul.f32 %v4459_v52, %v4278_v31  ;;  %v5341_v50 = vld [vmem:[#allocation20_spill] sm:$0xff]  ;;  %v5342_v22 = vld [vmem:[#allocation21_spill] sm:$0xff] }
 0x102   : > { %v2833_v4 = vadd.f32 %v4383_v51, %v2794_v55  ;;  %v2495_v2 = vadd.f32 %v2463_v44, %v2395_v40  ;;  %v1695_v62 = vadd.f32 %v1663_v10, %v1595_v59  ;;  %v1763_v63 = vmul.f32 %v4447_v61, %v4236_v30  ;;  %v4520_v20 = vld [vmem:[#allocation2 + $0xac] sm:$0xff] }
 0x103   : > { %v2095_v5 = vadd.f32 %v2063_v7, %v1995_v57  ;;  %v2263_v58 = vmul.f32 %v4466_v39, %v4282_v32  ;;  %v2364_v41 = vmul.f32 %v4288_v35, %v2328_v19  ;;  %v1396_v28 = vadd.f32 %v5342_v22, %v5341_v50  ;;  %v3054_v45 = vld [vmem:[#allocation2 + $0x92] sm:$0xff]  ;;  %v5344_v50 = vld [vmem:[#allocation23_spill] sm:$0xff] }
 0x104   : > { %2865 = vst.msk [vmem:[%s4397_s9 + $0x20] sm:$0xff] %vm233_vm0, %v2833_v4  ;;  %v2595_v29 = vadd.f32 %v2563_v27, %v2495_v2  ;;  %v2464_v44 = vmul.f32 %v4291_v25, %v2428_v54  ;;  %v1795_v18 = vadd.f32 %v1763_v63, %v1695_v62  ;;  %v1864_v61 = vmul.f32 %v2327_v60, %v4249_v46  ;;  %v2329_v63 = vld [vmem:[#allocation2 + $0xb0] sm:$0xff] }
 0x105   : > { %v2195_v0 = vadd.f32 %v2163_v12, %v2095_v5  ;;  %v2564_v26 = vmul.f32 %v4294_v42, %v2528_v36  ;;  %v1496_v6 = vadd.f32 %v5343_v16, %v1396_v28  ;;  %v1564_v14 = vmul.f32 %v3054_v45, %v4219_v34  ;;  %v2429_v5 = vld [vmem:[#allocation2 + $0xb1] sm:$0xff]  ;;  %v3055_v45 = vld [vmem:[#allocation2 + $0x9a] sm:$0xff] }
 0x106   : > { %v2695_v55 = vadd.f32 %v2663_v43, %v2595_v29  ;;  %v2664_v40 = vmul.f32 %v4303_v15, %v4513_v56  ;;  %v1896_v27 = vadd.f32 %v1864_v61, %v1795_v18  ;;  %v1964_v59 = vmul.f32 %v2427_v48, %v4260_v47  ;;  %v5345_v22 = vld [vmem:[#allocation25_spill] sm:$0xff]  ;;  %v5346_v16 = vld [vmem:[#allocation26_spill] sm:$0xff] }
 0x107   : > { %v2295_v10 = vadd.f32 %v2263_v58, %v2195_v0  ;;  %v2764_v57 = vmul.f32 %v4314_v53, %v4520_v20  ;;  %v1596_v60 = vadd.f32 %v1564_v14, %v1496_v6  ;;  %v1664_v7 = vmul.f32 %v4459_v52, %v4222_v11  ;;  %v4544_v61 = vld [vmem:[#allocation2 + $0xb3] sm:$0xff] }
 0x108   : > { %v2795_v12 = vadd.f32 %v2763_v23, %v2695_v55  ;;  %v1996_v4 = vadd.f32 %v1964_v59, %v1896_v27  ;;  %v2064_v2 = vmul.f32 %v2527_v3, %v4275_v17  ;;  %v2164_v43 = vmul.f32 %v4483_v9, %v4278_v31 }
 0x109   : > { %v2396_v62 = vadd.f32 %v2364_v41, %v2295_v10  ;;  %v1696_v48 = vadd.f32 %v1664_v7, %v1596_v60  ;;  %v1764_v58 = vmul.f32 %v4466_v39, %v4236_v30  ;;  %v1397_v28 = vadd.f32 %v5345_v22, %v5344_v50  ;;  %v2529_v41 = vld [vmem:[#allocation2 + $0xb2] sm:$0xff]  ;;  %v5347_v22 = vld [vmem:[#allocation24_spill] sm:$0xff] }
 0x10a   : > { %v2834_v52 = vadd.f32 %v4383_v51, %v2795_v12  ;;  %v2096_v23 = vadd.f32 %v2064_v2, %v1996_v4  ;;  %v2264_v3 = vmul.f32 %v4492_v49, %v4282_v32  ;;  %v1865_v29 = vmul.f32 %v2328_v19, %v4249_v46 }
 0x10b   : > { %v2496_v18 = vadd.f32 %v2464_v44, %v2396_v62  ;;  %v1796_v0 = vadd.f32 %v1764_v58, %v1696_v48  ;;  %v1497_v6 = vadd.f32 %v5346_v16, %v1397_v28  ;;  %v1565_v39 = vmul.f32 %v3055_v45, %v4219_v34  ;;  %v4553_v44 = vld [vmem:[#allocation2 + $0xb4] sm:$0xff]  ;;  %v5348_v28 = vld [vmem:[#allocation27_spill] sm:$0xff]  ;;  %v5349_v16 = vld [vmem:[#allocation28_spill] sm:$0xff] }
 0x10c   : > { %2866 = vst.msk [vmem:[%s4397_s9 + $0x28] sm:$0xff] %vm233_vm0, %v2834_v52  ;;  %v2196_v14 = vadd.f32 %v2164_v43, %v2096_v23  ;;  %v2365_v55 = vmul.f32 %v4288_v35, %v2329_v63  ;;  %v2465_v27 = vmul.f32 %v4291_v25, %v2429_v5  ;;  %v1965_v59 = vmul.f32 %v2428_v54, %v4260_v47  ;;  %v3056_v45 = vld [vmem:[#allocation2 + $0xaa] sm:$0xff] }
 0x10d   : > { %v2596_v19 = vadd.f32 %v2564_v26, %v2496_v18  ;;  %v1897_v10 = vadd.f32 %v1865_v29, %v1796_v0  ;;  %v1597_v60 = vadd.f32 %v1565_v39, %v1497_v6  ;;  %v1665_v7 = vmul.f32 %v4483_v9, %v4222_v11  ;;  %v2330_v29 = vld [vmem:[#allocation2 + $0xc0] sm:$0xff] }
 0x10e   : > { %v2296_v12 = vadd.f32 %v2264_v3, %v2196_v14  ;;  %v2565_v4 = vmul.f32 %v4294_v42, %v2529_v41  ;;  %v2665_v2 = vmul.f32 %v4303_v15, %v4544_v61  ;;  %v2065_v43 = vmul.f32 %v2528_v36, %v4275_v17  ;;  %v2430_v0 = vld [vmem:[#allocation2 + $0xc1] sm:$0xff] }
 0x10f   : > { %v2696_v62 = vadd.f32 %v2664_v40, %v2596_v19  ;;  %v1997_v48 = vadd.f32 %v1965_v59, %v1897_v10  ;;  %v1697_v58 = vadd.f32 %v1665_v7, %v1597_v60  ;;  %v1765_v54 = vmul.f32 %v4492_v49, %v4236_v30 }
 0x110   : > { %v2397_v26 = vadd.f32 %v2365_v55, %v2296_v12  ;;  %v2765_v50 = vmul.f32 %v4314_v53, %v4553_v44  ;;  %v2165_v9 = vmul.f32 %v4513_v56, %v4278_v31  ;;  %v1398_v52 = vadd.f32 %v5348_v28, %v5347_v22 }
 0x111   : > { %v2796_v23 = vadd.f32 %v2764_v57, %v2696_v62  ;;  %v2097_v3 = vadd.f32 %v2065_v43, %v1997_v48  ;;  %v1797_v36 = vadd.f32 %v1765_v54, %v1697_v58  ;;  %v1866_v40 = vmul.f32 %v2329_v63, %v4249_v46  ;;  %v2530_v57 = vld [vmem:[#allocation2 + $0xc2] sm:$0xff] }
 0x112   : > { %v2497_v18 = vadd.f32 %v2465_v27, %v2397_v26  ;;  %v2265_v49 = vmul.f32 %v4520_v20, %v4282_v32  ;;  %v1498_v6 = vadd.f32 %v5349_v16, %v1398_v52  ;;  %v1566_v39 = vmul.f32 %v3056_v45, %v4219_v34  ;;  %v4577_v27 = vld [vmem:[#allocation2 + $0xc3] sm:$0xff] }
 0x113   : > { %v2835_v14 = vadd.f32 %v4383_v51, %v2796_v23  ;;  %v2197_v55 = vadd.f32 %v2165_v9, %v2097_v3  ;;  %v1898_v59 = vadd.f32 %v1866_v40, %v1797_v36  ;;  %v1966_v19 = vmul.f32 %v2429_v5, %v4260_v47  ;;  %v4592_v52 = vld [vmem:[#allocation2 + $0xc4] sm:$0xff]  ;;  %v5350_v3 = vld [vmem:[#allocation29_spill] sm:$0xff]  ;;  %v5351_v36 = vld [vmem:[#allocation30_spill] sm:$0xff] }
 0x114   : > { %v2597_v10 = vadd.f32 %v2565_v4, %v2497_v18  ;;  %v2366_v63 = vmul.f32 %v4288_v35, %v2330_v29  ;;  %v1598_v60 = vadd.f32 %v1566_v39, %v1498_v6  ;;  %v1666_v7 = vmul.f32 %v4513_v56, %v4222_v11  ;;  %v2331_v23 = vld [vmem:[#allocation2 + $0xc8] sm:$0xff] }
 0x115   : > { %2867 = vst.msk [vmem:[%s4397_s9 + $0x30] sm:$0xff] %vm233_vm0, %v2835_v14  ;;  %v2297_v12 = vadd.f32 %v2265_v49, %v2197_v55  ;;  %v2466_v43 = vmul.f32 %v4291_v25, %v2430_v0  ;;  %v1998_v62 = vadd.f32 %v1966_v19, %v1898_v59  ;;  %v2066_v48 = vmul.f32 %v2529_v41, %v4275_v17  ;;  %v2531_v45 = vld [vmem:[#allocation2 + $0xca] sm:$0xff]  ;;  %v5352_v14 = vld [vmem:[#allocation31_spill] sm:$0xff]  ;;  %v3057_v59 = vld [vmem:[#allocation2 + $0xb2] sm:$0xff] }
 0x116   : > { %v2697_v58 = vadd.f32 %v2665_v2, %v2597_v10  ;;  %v2566_v5 = vmul.f32 %v4294_v42, %v2530_v57  ;;  %v1698_v4 = vadd.f32 %v1666_v7, %v1598_v60  ;;  %v1766_v54 = vmul.f32 %v4520_v20, %v4236_v30 }
 0x117   : > { %v2398_v26 = vadd.f32 %v2366_v63, %v2297_v12  ;;  %v2666_v9 = vmul.f32 %v4303_v15, %v4577_v27  ;;  %v2098_v56 = vadd.f32 %v2066_v48, %v1998_v62  ;;  %v2166_v22 = vmul.f32 %v4544_v61, %v4278_v31 }
 0x118   : > { %v2797_v28 = vadd.f32 %v2765_v50, %v2697_v58  ;;  %v1798_v41 = vadd.f32 %v1766_v54, %v1698_v4  ;;  %v1867_v2 = vmul.f32 %v2330_v29, %v4249_v46  ;;  %v1399_v40 = vadd.f32 %v5351_v36, %v5350_v3  ;;  %v2431_v50 = vld [vmem:[#allocation2 + $0xc9] sm:$0xff]  ;;  %v2432_v36 = vld [vmem:[#allocation2 + $0xd9] sm:$0xff] }
 0x119   : > { %v2498_v20 = vadd.f32 %v2466_v43, %v2398_v26  ;;  %v2198_v18 = vadd.f32 %v2166_v22, %v2098_v56  ;;  %v2266_v49 = vmul.f32 %v4553_v44, %v4282_v32  ;;  %v1967_v16 = vmul.f32 %v2430_v0, %v4260_v47  ;;  %v4608_v0 = vld [vmem:[#allocation2 + $0xcb] sm:$0xff]  ;;  %v2332_v56 = vld [vmem:[#allocation2 + $0xd8] sm:$0xff] }
 0x11a   : > { %v2836_v6 = vadd.f32 %v4383_v51, %v2797_v28  ;;  %v1899_v39 = vadd.f32 %v1867_v2, %v1798_v41  ;;  %v1499_v55 = vadd.f32 %v5352_v14, %v1399_v40  ;;  %v1567_v29 = vmul.f32 %v3057_v59, %v4219_v34  ;;  %v4623_v2 = vld [vmem:[#allocation2 + $0xcc] sm:$0xff]  ;;  %v2532_v59 = vld [vmem:[#allocation2 + $0xda] sm:$0xff] }
 0x11b   : > { %v2598_v19 = vadd.f32 %v2566_v5, %v2498_v20  ;;  %v2766_v10 = vmul.f32 %v4314_v53, %v4592_v52  ;;  %v2298_v63 = vadd.f32 %v2266_v49, %v2198_v18  ;;  %v2367_v60 = vmul.f32 %v4288_v35, %v2331_v23  ;;  %v5353_v18 = vld [vmem:[#allocation32_spill] sm:$0xff]  ;;  %v5354_v49 = vld [vmem:[#allocation33_spill] sm:$0xff] }
 0x11c   : > { %2868 = vst.msk [vmem:[%s4397_s9 + $0x38] sm:$0xff] %vm233_vm0, %v2836_v6  ;;  %v1999_v7 = vadd.f32 %v1967_v16, %v1899_v39  ;;  %v2067_v12 = vmul.f32 %v2530_v57, %v4275_v17  ;;  %v1599_v43 = vadd.f32 %v1567_v29, %v1499_v55  ;;  %v1667_v62 = vmul.f32 %v4544_v61, %v4222_v11 }
 0x11d   : > { %v2698_v48 = vadd.f32 %v2666_v9, %v2598_v19  ;;  %v2399_v58 = vadd.f32 %v2367_v60, %v2298_v63  ;;  %v2467_v5 = vmul.f32 %v4291_v25, %v2431_v50  ;;  %v2567_v4 = vmul.f32 %v4294_v42, %v2531_v45  ;;  %v5355_v19 = vld [vmem:[#allocation34_spill] sm:$0xff]  ;;  %v3058_v63 = vld [vmem:[#allocation2 + $0xc2] sm:$0xff] }
 0x11e   : > { %v2099_v54 = vadd.f32 %v2067_v12, %v1999_v7  ;;  %v2167_v26 = vmul.f32 %v4577_v27, %v4278_v31  ;;  %v1699_v22 = vadd.f32 %v1667_v62, %v1599_v43  ;;  %v1767_v28 = vmul.f32 %v4553_v44, %v4236_v30 }
 0x11f   : > { %v2798_v57 = vadd.f32 %v2766_v10, %v2698_v48  ;;  %v2499_v41 = vadd.f32 %v2467_v5, %v2399_v58  ;;  %v2667_v61 = vmul.f32 %v4303_v15, %v4608_v0  ;;  %v2267_v9 = vmul.f32 %v4592_v52, %v4282_v32 }
 0x120   : > { %v2199_v3 = vadd.f32 %v2167_v26, %v2099_v54  ;;  %v1799_v40 = vadd.f32 %v1767_v28, %v1699_v22  ;;  %v1868_v20 = vmul.f32 %v2331_v23, %v4249_v46  ;;  %v1400_v16 = vadd.f32 %v5354_v49, %v5353_v18 }
 0x121   : > { %v2837_v44 = vadd.f32 %v4383_v51, %v2798_v57  ;;  %v2599_v6 = vadd.f32 %v2567_v4, %v2499_v41  ;;  %v2368_v39 = vmul.f32 %v4288_v35, %v2332_v56  ;;  %v1968_v14 = vmul.f32 %v2431_v50, %v4260_v47  ;;  %v4639_v50 = vld [vmem:[#allocation2 + $0xdb] sm:$0xff] }
 0x122   : > { %v2299_v55 = vadd.f32 %v2267_v9, %v2199_v3  ;;  %v1900_v29 = vadd.f32 %v1868_v20, %v1799_v40  ;;  %v1500_v10 = vadd.f32 %v5355_v19, %v1400_v16  ;;  %v1568_v60 = vmul.f32 %v3058_v63, %v4219_v34  ;;  %v2333_v41 = vld [vmem:[#allocation2 + $0xe0] sm:$0xff]  ;;  %v5357_v40 = vld [vmem:[#allocation37_spill] sm:$0xff] }
 0x123   : > { %2869 = vst.msk [vmem:[%s4397_s9 + $0x40] sm:$0xff] %vm233_vm0, %v2837_v44  ;;  %v2699_v23 = vadd.f32 %v2667_v61, %v2599_v6  ;;  %v2767_v7 = vmul.f32 %v4314_v53, %v4623_v2  ;;  %v2468_v12 = vmul.f32 %v4291_v25, %v2432_v36  ;;  %v2068_v43 = vmul.f32 %v2531_v45, %v4275_v17  ;;  %v4650_v45 = vld [vmem:[#allocation2 + $0xdc] sm:$0xff]  ;;  %v3059_v19 = vld [vmem:[#allocation2 + $0xca] sm:$0xff] }
 0x124   : > { %v2400_v62 = vadd.f32 %v2368_v39, %v2299_v55  ;;  %v2000_v48 = vadd.f32 %v1968_v14, %v1900_v29  ;;  %v1600_v58 = vadd.f32 %v1568_v60, %v1500_v10  ;;  %v1668_v5 = vmul.f32 %v4577_v27, %v4222_v11  ;;  %v5356_v3 = vld [vmem:[#allocation35_spill] sm:$0xff]  ;;  %v5358_v55 = vld [vmem:[#allocation38_spill] sm:$0xff] }
 0x125   : > { %v4645_v4 = vadd.f32 %v4239_v33, %v4440_v24  ;;  %v2799_v54 = vadd.f32 %v2767_v7, %v2699_v23  ;;  %v2568_v26 = vmul.f32 %v4294_v42, %v2532_v59  ;;  %v2168_v22 = vmul.f32 %v4608_v0, %v4278_v31  ;;  %v2433_v16 = vld [vmem:[#allocation2 + $0xe1] sm:$0xff] }
 0x126   : > { %v2500_v28 = vadd.f32 %v2468_v12, %v2400_v62  ;;  %v2100_v57 = vadd.f32 %v2068_v43, %v2000_v48  ;;  %v1700_v61 = vadd.f32 %v1668_v5, %v1600_v58  ;;  %v1768_v27 = vmul.f32 %v4592_v52, %v4236_v30  ;;  %v2533_v44 = vld [vmem:[#allocation2 + $0xe2] sm:$0xff] }
 0x127   : > { %v2838_v9 = vadd.f32 %v4383_v51, %v2799_v54  ;;  %v2668_v33 = vmul.f32 %v4303_v15, %v4639_v50  ;;  %v2268_v24 = vmul.f32 %v4623_v2, %v4282_v32  ;;  %v1401_v20 = vadd.f32 %v5357_v40, %v5356_v3  ;;  %v4669_v23 = vld [vmem:[#allocation2 + $0xe3] sm:$0xff] }
 0x128   : > { %v2600_v18 = vadd.f32 %v2568_v26, %v2500_v28  ;;  %v2200_v49 = vadd.f32 %v2168_v22, %v2100_v57  ;;  %v1800_v6 = vadd.f32 %v1768_v27, %v1700_v61  ;;  %v1869_v39 = vmul.f32 %v2332_v56, %v4249_v46  ;;  %v4676_v54 = vld [vmem:[#allocation2 + $0xe4] sm:$0xff] }
 0x129   : > { %2870 = vst.msk [vmem:[%s4397_s9 + $0x48] sm:$0xff] %vm233_vm0, %v2838_v9  ;;  %v2768_v52 = vmul.f32 %v4314_v53, %v4650_v45  ;;  %v2369_v14 = vmul.f32 %v4288_v35, %v2333_v41  ;;  %v1501_v29 = vadd.f32 %v5358_v55, %v1401_v20  ;;  %v1569_v10 = vmul.f32 %v3059_v19, %v4219_v34  ;;  %v5359_v3 = vld [vmem:[#allocation36_spill] sm:$0xff]  ;;  %v5360_v40 = vld [vmem:[#allocation39_spill] sm:$0xff] }
 0x12a   : > { %v2700_v63 = vadd.f32 %v2668_v33, %v2600_v18  ;;  %v2300_v60 = vadd.f32 %v2268_v24, %v2200_v49  ;;  %v1901_v7 = vadd.f32 %v1869_v39, %v1800_v6  ;;  %v1969_v12 = vmul.f32 %v2432_v36, %v4260_v47  ;;  %v2334_v33 = vld [vmem:[#allocation2 + $0xf0] sm:$0xff]  ;;  %v5361_v55 = vld [vmem:[#allocation40_spill] sm:$0xff]  ;;  %v3060_v19 = vld [vmem:[#allocation2 + $0xda] sm:$0xff] }
 0x12b   : > { %v2469_v56 = vmul.f32 %v4291_v25, %v2433_v16  ;;  %v2569_v43 = vmul.f32 %v4294_v42, %v2533_v44  ;;  %v1601_v62 = vadd.f32 %v1569_v10, %v1501_v29  ;;  %v1669_v48 = vmul.f32 %v4608_v0, %v4222_v11  ;;  %v2434_v24 = vld [vmem:[#allocation2 + $0xf1] sm:$0xff] }
 0x12c   : > { %v2800_v58 = vadd.f32 %v2768_v52, %v2700_v63  ;;  %v2401_v5 = vadd.f32 %v2369_v14, %v2300_v60  ;;  %v2001_v26 = vadd.f32 %v1969_v12, %v1901_v7  ;;  %v2069_v22 = vmul.f32 %v2532_v59, %v4275_v17  ;;  %v2534_v52 = vld [vmem:[#allocation2 + $0xf2] sm:$0xff] }
 0x12d   : > { %v2669_v28 = vmul.f32 %v4303_v15, %v4669_v23  ;;  %v2169_v36 = vmul.f32 %v4639_v50, %v4278_v31  ;;  %v1701_v57 = vadd.f32 %v1669_v48, %v1601_v62  ;;  %v1769_v61 = vmul.f32 %v4623_v2, %v4236_v30  ;;  %v4695_v14 = vld [vmem:[#allocation2 + $0xf3] sm:$0xff] }
 0x12e   : > { %v2839_v0 = vadd.f32 %v4383_v51, %v2800_v58  ;;  %v2501_v27 = vadd.f32 %v2469_v56, %v2401_v5  ;;  %v2101_v9 = vadd.f32 %v2069_v22, %v2001_v26  ;;  %v1402_v20 = vadd.f32 %v5360_v40, %v5359_v3  ;;  %v4702_v62 = vld [vmem:[#allocation2 + $0xf4] sm:$0xff] }
 0x12f   : > { %v2769_v59 = vmul.f32 %v4314_v53, %v4676_v54  ;;  %v2269_v18 = vmul.f32 %v4650_v45, %v4282_v32  ;;  %v1801_v49 = vadd.f32 %v1769_v61, %v1701_v57  ;;  %v1870_v6 = vmul.f32 %v2333_v41, %v4249_v46  ;;  %v5363_v3 = vld [vmem:[#allocation42_spill] sm:$0xff] }
 0x130   : > { %2871 = vst.msk [vmem:[%s4397_s9 + $0x50] sm:$0xff] %vm233_vm0, %v2839_v0  ;;  %v2601_v2 = vadd.f32 %v2569_v43, %v2501_v27  ;;  %v2201_v39 = vadd.f32 %v2169_v36, %v2101_v9  ;;  %v1502_v29 = vadd.f32 %v5361_v55, %v1402_v20  ;;  %v1570_v10 = vmul.f32 %v3060_v19, %v4219_v34  ;;  %v2335_v27 = vld [vmem:[#allocation2 + $0xf8] sm:$0xff]  ;;  %v5362_v9 = vld [vmem:[#allocation41_spill] sm:$0xff] }
 0x131   : > { %v2370_v63 = vmul.f32 %v4288_v35, %v2334_v33  ;;  %v2470_v60 = vmul.f32 %v4291_v25, %v2434_v24  ;;  %v1902_v7 = vadd.f32 %v1870_v6, %v1801_v49  ;;  %v1970_v12 = vmul.f32 %v2433_v16, %v4260_v47 }
 0x132   : > { %v2701_v41 = vadd.f32 %v2669_v28, %v2601_v2  ;;  %v2301_v56 = vadd.f32 %v2269_v18, %v2201_v39  ;;  %v1602_v43 = vadd.f32 %v1570_v10, %v1502_v29  ;;  %v1670_v48 = vmul.f32 %v4639_v50, %v4222_v11  ;;  %v2535_v2 = vld [vmem:[#allocation2 + $0xfa] sm:$0xff]  ;;  %v3061_v29 = vld [vmem:[#allocation2 + $0xe2] sm:$0xff] }
 0x133   : > { %v2570_v58 = vmul.f32 %v4294_v42, %v2534_v52  ;;  %v2670_v5 = vmul.f32 %v4303_v15, %v4695_v14  ;;  %v2002_v26 = vadd.f32 %v1970_v12, %v1902_v7  ;;  %v2070_v22 = vmul.f32 %v2533_v44, %v4275_v17  ;;  %v5364_v39 = vld [vmem:[#allocation43_spill] sm:$0xff] }
 0x134   : > { %v2801_v36 = vadd.f32 %v2769_v59, %v2701_v41  ;;  %v2402_v57 = vadd.f32 %v2370_v63, %v2301_v56  ;;  %v1702_v61 = vadd.f32 %v1670_v48, %v1602_v43  ;;  %v1770_v16 = vmul.f32 %v4650_v45, %v4236_v30  ;;  %v2435_v59 = vld [vmem:[#allocation2 + $0xf9] sm:$0xff] }
 0x135   : > { %v2770_v28 = vmul.f32 %v4314_v53, %v4702_v62  ;;  %v2102_v0 = vadd.f32 %v2070_v22, %v2002_v26  ;;  %v2170_v50 = vmul.f32 %v4669_v23, %v4278_v31  ;;  %v1403_v40 = vadd.f32 %v5363_v3, %v5362_v9  ;;  %v5366_v9 = vld [vmem:[#allocation45_spill] sm:$0xff] }
 0x136   : > { %v2840_v44 = vadd.f32 %v4383_v51, %v2801_v36  ;;  %v2502_v20 = vadd.f32 %v2470_v60, %v2402_v57  ;;  %v1802_v18 = vadd.f32 %v1770_v16, %v1702_v61  ;;  %v1871_v49 = vmul.f32 %v2334_v33, %v4249_v46  ;;  %v4727_v60 = vld [vmem:[#allocation2 + $0xfb] sm:$0xff] }
 0x137   : > { %v2202_v45 = vadd.f32 %v2170_v50, %v2102_v0  ;;  %v2270_v6 = vmul.f32 %v4676_v54, %v4282_v32  ;;  %v1503_v55 = vadd.f32 %v5364_v39, %v1403_v40  ;;  %v1571_v19 = vmul.f32 %v3061_v29, %v4219_v34  ;;  %v4739_v0 = vld [vmem:[#allocation2 + $0xfc] sm:$0xff]  ;;  %v3062_v39 = vld [vmem:[#allocation2 + $0xf2] sm:$0xff] }
 0x138   : > { %2872 = vst.msk [vmem:[%s4397_s9 + $0x58] sm:$0xff] %vm233_vm0, %v2840_v44  ;;  %v2602_v10 = vadd.f32 %v2570_v58, %v2502_v20  ;;  %v2371_v63 = vmul.f32 %v4288_v35, %v2335_v27  ;;  %v1903_v7 = vadd.f32 %v1871_v49, %v1802_v18  ;;  %v1971_v33 = vmul.f32 %v2434_v24, %v4260_v47  ;;  %v2336_v44 = vld [vmem:[#allocation2 + $0x108] sm:$0xff] }
 0x139   : > { %v2302_v12 = vadd.f32 %v2270_v6, %v2202_v45  ;;  %v2471_v41 = vmul.f32 %v4291_v25, %v2435_v59  ;;  %v1603_v56 = vadd.f32 %v1571_v19, %v1503_v55  ;;  %v1671_v43 = vmul.f32 %v4669_v23, %v4222_v11  ;;  %v2436_v49 = vld [vmem:[#allocation2 + $0x109] sm:$0xff]  ;;  %v5367_v45 = vld [vmem:[#allocation46_spill] sm:$0xff] }
 0x13a   : > { %v2702_v48 = vadd.f32 %v2670_v5, %v2602_v10  ;;  %v2571_v26 = vmul.f32 %v4294_v42, %v2535_v2  ;;  %v2003_v22 = vadd.f32 %v1971_v33, %v1903_v7  ;;  %v2071_v58 = vmul.f32 %v2534_v52, %v4275_v17  ;;  %v5365_v5 = vld [vmem:[#allocation44_spill] sm:$0xff] }
 0x13b   : > { %v2403_v36 = vadd.f32 %v2371_v63, %v2302_v12  ;;  %v2671_v57 = vmul.f32 %v4303_v15, %v4727_v60  ;;  %v1703_v61 = vadd.f32 %v1671_v43, %v1603_v56  ;;  %v1771_v24 = vmul.f32 %v4676_v54, %v4236_v30  ;;  %v2536_v10 = vld [vmem:[#allocation2 + $0x10a] sm:$0xff] }
 0x13c   : > { %v2802_v16 = vadd.f32 %v2770_v28, %v2702_v48  ;;  %v2103_v50 = vadd.f32 %v2071_v58, %v2003_v22  ;;  %v2171_v23 = vmul.f32 %v4695_v14, %v4278_v31  ;;  %v1404_v3 = vadd.f32 %v5366_v9, %v5365_v5  ;;  %v4757_v12 = vld [vmem:[#allocation2 + $0x10b] sm:$0xff] }
 0x13d   : > { %v2503_v40 = vadd.f32 %v2471_v41, %v2403_v36  ;;  %v2271_v52 = vmul.f32 %v4702_v62, %v4282_v32  ;;  %v1803_v20 = vadd.f32 %v1771_v24, %v1703_v61  ;;  %v1872_v18 = vmul.f32 %v2335_v27, %v4249_v46 }
 0x13e   : > { %v2841_v54 = vadd.f32 %v4383_v51, %v2802_v16  ;;  %v2203_v28 = vadd.f32 %v2171_v23, %v2103_v50  ;;  %v1504_v6 = vadd.f32 %v5367_v45, %v1404_v3  ;;  %v1572_v55 = vmul.f32 %v3062_v39, %v4219_v34  ;;  %v4770_v23 = vld [vmem:[#allocation2 + $0x10c] sm:$0xff]  ;;  %v5368_v3 = vld [vmem:[#allocation47_spill] sm:$0xff] }
 0x13f   : > { %v2603_v29 = vadd.f32 %v2571_v26, %v2503_v40  ;;  %v2771_v19 = vmul.f32 %v4314_v53, %v4739_v0  ;;  %v1904_v63 = vadd.f32 %v1872_v18, %v1803_v20  ;;  %v1972_v7 = vmul.f32 %v2435_v59, %v4260_v47  ;;  %v5369_v40 = vld [vmem:[#allocation49_spill] sm:$0xff] }
 0x140   : > { %2873 = vst.msk [vmem:[%s4397_s9 + $0x60] sm:$0xff] %vm233_vm0, %v2841_v54  ;;  %v2303_v27 = vadd.f32 %v2271_v52, %v2203_v28  ;;  %v2372_v33 = vmul.f32 %v4288_v35, %v2336_v44  ;;  %v1604_v41 = vadd.f32 %v1572_v55, %v1504_v6  ;;  %v1672_v56 = vmul.f32 %v4695_v14, %v4222_v11  ;;  %v2437_v45 = vld [vmem:[#allocation2 + $0x111] sm:$0xff] }
 0x141   : > { %v2703_v43 = vadd.f32 %v2671_v57, %v2603_v29  ;;  %v2472_v48 = vmul.f32 %v4291_v25, %v2436_v49  ;;  %v2004_v26 = vadd.f32 %v1972_v7, %v1904_v63  ;;  %v2072_v22 = vmul.f32 %v2535_v2, %v4275_v17  ;;  %v2337_v2 = vld [vmem:[#allocation2 + $0x110] sm:$0xff]  ;;  %v5370_v55 = vld [vmem:[#allocation50_spill] sm:$0xff] }
 0x142   : > { %v2404_v58 = vadd.f32 %v2372_v33, %v2303_v27  ;;  %v2572_v59 = vmul.f32 %v4294_v42, %v2536_v10  ;;  %v1704_v36 = vadd.f32 %v1672_v56, %v1604_v41  ;;  %v1772_v61 = vmul.f32 %v4702_v62, %v4236_v30  ;;  %v2537_v6 = vld [vmem:[#allocation2 + $0x112] sm:$0xff] }
 0x143   : > { %v2803_v24 = vadd.f32 %v2771_v19, %v2703_v43  ;;  %v2672_v16 = vmul.f32 %v4303_v15, %v4757_v12  ;;  %v2104_v50 = vadd.f32 %v2072_v22, %v2004_v26  ;;  %v2172_v14 = vmul.f32 %v4727_v60, %v4278_v31  ;;  %v3063_v19 = vld [vmem:[#allocation2 + $0xfa] sm:$0xff] }
 0x144   : > { %v2504_v57 = vadd.f32 %v2472_v48, %v2404_v58  ;;  %v1804_v5 = vadd.f32 %v1772_v61, %v1704_v36  ;;  %v1873_v9 = vmul.f32 %v2336_v44, %v4249_v46  ;;  %v1405_v52 = vadd.f32 %v5369_v40, %v5368_v3  ;;  %v4787_v41 = vld [vmem:[#allocation2 + $0x113] sm:$0xff] }
 0x145   : > { %v2842_v62 = vadd.f32 %v4383_v51, %v2803_v24  ;;  %v2204_v20 = vadd.f32 %v2172_v14, %v2104_v50  ;;  %v2272_v18 = vmul.f32 %v4739_v0, %v4282_v32  ;;  %v1973_v54 = vmul.f32 %v2436_v49, %v4260_v47  ;;  %v4795_v61 = vld [vmem:[#allocation2 + $0x114] sm:$0xff] }
 0x146   : > { %v2604_v28 = vadd.f32 %v2572_v59, %v2504_v57  ;;  %v1905_v39 = vadd.f32 %v1873_v9, %v1804_v5  ;;  %v1505_v29 = vadd.f32 %v5370_v55, %v1405_v52  ;;  %v1573_v44 = vmul.f32 %v3063_v19, %v4219_v34  ;;  %v2338_v57 = vld [vmem:[#allocation2 + $0x120] sm:$0xff]  ;;  %v5371_v5 = vld [vmem:[#allocation48_spill] sm:$0xff] }
 0x147   : > { %2874 = vst.msk [vmem:[%s4397_s9 + $0x68] sm:$0xff] %vm233_vm0, %v2842_v62  ;;  %v2772_v63 = vmul.f32 %v4314_v53, %v4770_v23  ;;  %v2304_v7 = vadd.f32 %v2272_v18, %v2204_v20  ;;  %v2373_v27 = vmul.f32 %v4288_v35, %v2337_v2  ;;  %v2073_v33 = vmul.f32 %v2536_v10, %v4275_v17  ;;  %v5372_v9 = vld [vmem:[#allocation51_spill] sm:$0xff] }
 0x148   : > { %v2704_v49 = vadd.f32 %v2672_v16, %v2604_v28  ;;  %v2005_v56 = vadd.f32 %v1973_v54, %v1905_v39  ;;  %v1605_v43 = vadd.f32 %v1573_v44, %v1505_v29  ;;  %v1673_v48 = vmul.f32 %v4727_v60, %v4222_v11  ;;  %v2438_v62 = vld [vmem:[#allocation2 + $0x121] sm:$0xff]  ;;  %v3064_v29 = vld [vmem:[#allocation2 + $0x10a] sm:$0xff] }
 0x149   : > { %v2405_v26 = vadd.f32 %v2373_v27, %v2304_v7  ;;  %v2473_v22 = vmul.f32 %v4291_v25, %v2437_v45  ;;  %v2573_v58 = vmul.f32 %v4294_v42, %v2537_v6  ;;  %v2173_v59 = vmul.f32 %v4757_v12, %v4278_v31  ;;  %v2538_v28 = vld [vmem:[#allocation2 + $0x122] sm:$0xff] }
 0x14a   : > { %v2804_v36 = vadd.f32 %v2772_v63, %v2704_v49  ;;  %v2105_v10 = vadd.f32 %v2073_v33, %v2005_v56  ;;  %v1705_v24 = vadd.f32 %v1673_v48, %v1605_v43  ;;  %v1773_v16 = vmul.f32 %v4739_v0, %v4236_v30  ;;  %v5373_v39 = vld [vmem:[#allocation52_spill] sm:$0xff] }
 0x14b   : > { %v2505_v50 = vadd.f32 %v2473_v22, %v2405_v26  ;;  %v2673_v60 = vmul.f32 %v4303_v15, %v4787_v41  ;;  %v2273_v14 = vmul.f32 %v4770_v23, %v4282_v32  ;;  %v1406_v3 = vadd.f32 %v5372_v9, %v5371_v5  ;;  %v4814_v63 = vld [vmem:[#allocation2 + $0x123] sm:$0xff]  ;;  %v4835_v5 = vld [vmem:[%s5240_s2] ss:$0 sm:$0xff] }
 0x14c   : > { %v2843_v40 = vadd.f32 %v4383_v51, %v2804_v36  ;;  %v2205_v52 = vadd.f32 %v2173_v59, %v2105_v10  ;;  %v1805_v20 = vadd.f32 %v1773_v16, %v1705_v24  ;;  %v1874_v18 = vmul.f32 %v2337_v2, %v4249_v46  ;;  %v4826_v24 = vld [vmem:[#allocation2 + $0x124] sm:$0xff] }
 0x14d   : > { %v2605_v0 = vadd.f32 %v2573_v58, %v2505_v50  ;;  %v2773_v54 = vmul.f32 %v4314_v53, %v4795_v61  ;;  %v1506_v55 = vadd.f32 %v5373_v39, %v1406_v3  ;;  %v1574_v19 = vmul.f32 %v3064_v29, %v4219_v34  ;;  %v2339_v50 = vld [vmem:[#allocation2 + $0x128] sm:$0xff] }
 0x14e   : > { %2875 = vst.msk [vmem:[%s4397_s9 + $0x70] sm:$0xff] %vm233_vm0, %v2843_v40  ;;  %v2305_v44 = vadd.f32 %v2273_v14, %v2205_v52  ;;  %v2374_v51 = vmul.f32 %v4288_v35, %v2338_v57  ;;  %v1906_v7 = vadd.f32 %v1874_v18, %v1805_v20  ;;  %v1974_v2 = vmul.f32 %v2437_v45, %v4260_v47  ;;  %v5375_v14 = vld [vmem:[#allocation54_spill] sm:$0xff]  ;;  %v2439_v18 = vld [vmem:[#allocation2 + $0x129] sm:$0xff] }
 0x14f   : > { %v2705_v27 = vadd.f32 %v2673_v60, %v2605_v0  ;;  %v2474_v33 = vmul.f32 %v4291_v25, %v2438_v62  ;;  %v1606_v49 = vadd.f32 %v1574_v19, %v1506_v55  ;;  %v1674_v56 = vmul.f32 %v4757_v12, %v4222_v11  ;;  %v5374_v60 = vld [vmem:[#allocation53_spill] sm:$0xff] }
 0x150   : > { %v2406_v43 = vadd.f32 %v2374_v51, %v2305_v44  ;;  %v2574_v48 = vmul.f32 %v4294_v42, %v2538_v28  ;;  %v2006_v26 = vadd.f32 %v1974_v2, %v1906_v7  ;;  %v2074_v22 = vmul.f32 %v2537_v6, %v4275_v17  ;;  %v2539_v0 = vld [vmem:[#allocation2 + $0x12a] sm:$0xff]  ;;  %v3066_v55 = vld [vmem:[#allocation2 + $0x112] sm:$0xff] }
 0x151   : > { %v2805_v58 = vadd.f32 %v2773_v54, %v2705_v27  ;;  %v2674_v59 = vmul.f32 %v4303_v15, %v4814_v63  ;;  %v1706_v36 = vadd.f32 %v1674_v56, %v1606_v49  ;;  %v1774_v45 = vmul.f32 %v4770_v23, %v4236_v30  ;;  %v5376_v54 = vld [vmem:[#allocation56_spill] sm:$0xff] }
 0x152   : > { %v2506_v10 = vadd.f32 %v2474_v33, %v2406_v43  ;;  %v2106_v16 = vadd.f32 %v2074_v22, %v2006_v26  ;;  %v2174_v12 = vmul.f32 %v4787_v41, %v4278_v31  ;;  %v1407_v6 = vadd.f32 %v5375_v14, %v5374_v60  ;;  %v4849_v27 = vld [vmem:[#allocation2 + $0x12b] sm:$0xff] }
 0x153   : > { %v2844_v9 = vadd.f32 %v4835_v5, %v2805_v58  ;;  %v2274_v23 = vmul.f32 %v4795_v61, %v4282_v32  ;;  %v1806_v3 = vadd.f32 %v1774_v45, %v1706_v36  ;;  %v1875_v40 = vmul.f32 %v2338_v57, %v4249_v46  ;;  %v4860_v45 = vld [vmem:[#allocation2 + $0x12c] sm:$0xff] }
 0x154   : > { %v2606_v52 = vadd.f32 %v2574_v48, %v2506_v10  ;;  %v2206_v20 = vadd.f32 %v2174_v12, %v2106_v16  ;;  %v1507_v39 = vadd.f32 %v5376_v54, %v1407_v6  ;;  %v1575_v29 = vmul.f32 %v3066_v55, %v4219_v34  ;;  %v5377_v16 = vld [vmem:[#allocation55_spill] sm:$0xff]  ;;  %v5378_v12 = vld [vmem:[#allocation57_spill] sm:$0xff]  ;;  %v2340_v6 = vld [vmem:[#allocation2 + $0x138] sm:$0xff] }
 0x155   : > { %2876 = vst.msk [vmem:[%s4397_s9 + $0x78] sm:$0xff] %vm233_vm0, %v2844_v9  ;;  %v2774_v19 = vmul.f32 %v4314_v53, %v4826_v24  ;;  %v2375_v44 = vmul.f32 %v4288_v35, %v2339_v50  ;;  %v1907_v51 = vadd.f32 %v1875_v40, %v1806_v3  ;;  %v1975_v7 = vmul.f32 %v2438_v62, %v4260_v47  ;;  %v2440_v40 = vld [vmem:[#allocation2 + $0x139] sm:$0xff]  ;;  %v3067_v54 = vld [vmem:[#allocation2 + $0x122] sm:$0xff] }
 0x156   : > { %v2706_v57 = vadd.f32 %v2674_v59, %v2606_v52  ;;  %v2306_v2 = vadd.f32 %v2274_v23, %v2206_v20  ;;  %v1607_v33 = vadd.f32 %v1575_v29, %v1507_v39  ;;  %v1675_v49 = vmul.f32 %v4787_v41, %v4222_v11  ;;  %v5379_v52 = vld [vmem:[#allocation58_spill] sm:$0xff] }
 0x157   : > { %v2475_v56 = vmul.f32 %v4291_v25, %v2439_v18  ;;  %v2575_v43 = vmul.f32 %v4294_v42, %v2539_v0  ;;  %v2007_v48 = vadd.f32 %v1975_v7, %v1907_v51  ;;  %v2075_v26 = vmul.f32 %v2538_v28, %v4275_v17 }
 0x158   : > { %v2806_v22 = vadd.f32 %v2774_v19, %v2706_v57  ;;  %v2407_v58 = vadd.f32 %v2375_v44, %v2306_v2  ;;  %v1707_v36 = vadd.f32 %v1675_v49, %v1607_v33  ;;  %v1775_v62 = vmul.f32 %v4795_v61, %v4236_v30  ;;  %v2540_v19 = vld [vmem:[#allocation2 + $0x13a] sm:$0xff] }
 0x159   : > { %v2675_v59 = vmul.f32 %v4303_v15, %v4849_v27  ;;  %v2107_v41 = vadd.f32 %v2075_v26, %v2007_v48  ;;  %v2175_v10 = vmul.f32 %v4814_v63, %v4278_v31  ;;  %v1408_v60 = vadd.f32 %v5378_v12, %v5377_v16  ;;  %v4878_v57 = vld [vmem:[#allocation2 + $0x13b] sm:$0xff] }
 0x15a   : > { %v2845_v28 = vadd.f32 %v4835_v5, %v2806_v22  ;;  %v2507_v14 = vadd.f32 %v2475_v56, %v2407_v58  ;;  %v1807_v9 = vadd.f32 %v1775_v62, %v1707_v36  ;;  %v1876_v61 = vmul.f32 %v2339_v50, %v4249_v46 }
 0x15b   : > { %v2207_v23 = vadd.f32 %v2175_v10, %v2107_v41  ;;  %v2275_v3 = vmul.f32 %v4826_v24, %v4282_v32  ;;  %v1508_v20 = vadd.f32 %v5379_v52, %v1408_v60  ;;  %v1576_v39 = vmul.f32 %v3067_v54, %v4219_v34  ;;  %v4891_v10 = vld [vmem:[#allocation2 + $0x13c] sm:$0xff] }
 0x15c   : > { %2877 = vst.msk [vmem:[%s4397_s9 + $0x80] sm:$0xff] %vm233_vm0, %v2845_v28  ;;  %v2607_v55 = vadd.f32 %v2575_v43, %v2507_v14  ;;  %v2775_v29 = vmul.f32 %v4314_v53, %v4860_v45  ;;  %v1908_v44 = vadd.f32 %v1876_v61, %v1807_v9  ;;  %v1976_v50 = vmul.f32 %v2439_v18, %v4260_v47  ;;  %v5380_v60 = vld [vmem:[#allocation59_spill] sm:$0xff]  ;;  %v5381_v28 = vld [vmem:[#allocation60_spill] sm:$0xff] }
 0x15d   : > { %v2307_v51 = vadd.f32 %v2275_v3, %v2207_v23  ;;  %v2376_v7 = vmul.f32 %v4288_v35, %v2340_v6  ;;  %v1608_v2 = vadd.f32 %v1576_v39, %v1508_v20  ;;  %v1676_v33 = vmul.f32 %v4814_v63, %v4222_v11  ;;  %v2441_v52 = vld [vmem:[#allocation2 + $0x141] sm:$0xff]  ;;  %v5382_v39 = vld [vmem:[#allocation62_spill] sm:$0xff] }
 0x15e   : > { %v2707_v49 = vadd.f32 %v2675_v59, %v2607_v55  ;;  %v2476_v56 = vmul.f32 %v4291_v25, %v2440_v40  ;;  %v2008_v43 = vadd.f32 %v1976_v50, %v1908_v44  ;;  %v2076_v48 = vmul.f32 %v2539_v0, %v4275_v17  ;;  %v2341_v0 = vld [vmem:[#allocation2 + $0x140] sm:$0xff] }
 0x15f   : > { %v2408_v26 = vadd.f32 %v2376_v7, %v2307_v51  ;;  %v2576_v22 = vmul.f32 %v4294_v42, %v2540_v19  ;;  %v1708_v58 = vadd.f32 %v1676_v33, %v1608_v2  ;;  %v1776_v18 = vmul.f32 %v4826_v24, %v4236_v30  ;;  %v2541_v20 = vld [vmem:[#allocation2 + $0x142] sm:$0xff] }
 0x160   : > { %v2807_v36 = vadd.f32 %v2775_v29, %v2707_v49  ;;  %v2676_v62 = vmul.f32 %v4303_v15, %v4878_v57  ;;  %v2108_v41 = vadd.f32 %v2076_v48, %v2008_v43  ;;  %v2176_v63 = vmul.f32 %v4849_v27, %v4278_v31  ;;  %v3068_v29 = vld [vmem:[#allocation2 + $0x12a] sm:$0xff] }
 0x161   : > { %v2508_v59 = vadd.f32 %v2476_v56, %v2408_v26  ;;  %v1808_v16 = vadd.f32 %v1776_v18, %v1708_v58  ;;  %v1877_v12 = vmul.f32 %v2340_v6, %v4249_v46  ;;  %v1409_v14 = vadd.f32 %v5381_v28, %v5380_v60  ;;  %v4908_v2 = vld [vmem:[#allocation2 + $0x143] sm:$0xff] }
 0x162   : > { %v2846_v24 = vadd.f32 %v4835_v5, %v2807_v36  ;;  %v2208_v9 = vadd.f32 %v2176_v63, %v2108_v41  ;;  %v2276_v61 = vmul.f32 %v4860_v45, %v4282_v32  ;;  %v1977_v23 = vmul.f32 %v2440_v40, %v4260_v47  ;;  %v4916_v18 = vld [vmem:[#allocation2 + $0x144] sm:$0xff] }
 0x163   : > { %v2608_v3 = vadd.f32 %v2576_v22, %v2508_v59  ;;  %v1909_v54 = vadd.f32 %v1877_v12, %v1808_v16  ;;  %v1509_v55 = vadd.f32 %v5382_v39, %v1409_v14  ;;  %v1577_v6 = vmul.f32 %v3068_v29, %v4219_v34  ;;  %v2342_v59 = vld [vmem:[#allocation2 + $0x150] sm:$0xff]  ;;  %v5384_v12 = vld [vmem:[#allocation63_spill] sm:$0xff] }
 0x164   : > { %2878 = vst.msk [vmem:[%s4397_s9 + $0x88] sm:$0xff] %vm233_vm0, %v2846_v24  ;;  %v2776_v44 = vmul.f32 %v4314_v53, %v4891_v10  ;;  %v2308_v50 = vadd.f32 %v2276_v61, %v2208_v9  ;;  %v2377_v51 = vmul.f32 %v4288_v35, %v2341_v0  ;;  %v2077_v7 = vmul.f32 %v2540_v19, %v4275_v17  ;;  %v5383_v16 = vld [vmem:[#allocation61_spill] sm:$0xff] }
 0x165   : > { %v2708_v40 = vadd.f32 %v2676_v62, %v2608_v3  ;;  %v2009_v33 = vadd.f32 %v1977_v23, %v1909_v54  ;;  %v1609_v49 = vadd.f32 %v1577_v6, %v1509_v55  ;;  %v1677_v56 = vmul.f32 %v4849_v27, %v4222_v11  ;;  %v2442_v24 = vld [vmem:[#allocation2 + $0x151] sm:$0xff]  ;;  %v5385_v54 = vld [vmem:[#allocation64_spill] sm:$0xff]  ;;  %v3069_v55 = vld [vmem:[#allocation2 + $0x13a] sm:$0xff] }
 0x166   : > { %v2409_v43 = vadd.f32 %v2377_v51, %v2308_v50  ;;  %v2477_v48 = vmul.f32 %v4291_v25, %v2441_v52  ;;  %v2577_v26 = vmul.f32 %v4294_v42, %v2541_v20  ;;  %v2177_v22 = vmul.f32 %v4878_v57, %v4278_v31  ;;  %v2542_v3 = vld [vmem:[#allocation2 + $0x152] sm:$0xff] }
 0x167   : > { %v2808_v58 = vadd.f32 %v2776_v44, %v2708_v40  ;;  %v2109_v19 = vadd.f32 %v2077_v7, %v2009_v33  ;;  %v1709_v36 = vadd.f32 %v1677_v56, %v1609_v49  ;;  %v1777_v62 = vmul.f32 %v4860_v45, %v4236_v30  ;;  %v4935_v50 = vld [vmem:[#allocation2 + $0x153] sm:$0xff] }
 0x168   : > { %v2509_v41 = vadd.f32 %v2477_v48, %v2409_v43  ;;  %v2677_v27 = vmul.f32 %v4303_v15, %v4908_v2  ;;  %v2277_v63 = vmul.f32 %v4891_v10, %v4282_v32  ;;  %v1410_v60 = vadd.f32 %v5384_v12, %v5383_v16  ;;  %v5387_v16 = vld [vmem:[#allocation66_spill] sm:$0xff] }
 0x169   : > { %v2847_v28 = vadd.f32 %v4835_v5, %v2808_v58  ;;  %v2209_v14 = vadd.f32 %v2177_v22, %v2109_v19  ;;  %v1809_v9 = vadd.f32 %v1777_v62, %v1709_v36  ;;  %v1878_v61 = vmul.f32 %v2341_v0, %v4249_v46  ;;  %v4947_v62 = vld [vmem:[#allocation2 + $0x154] sm:$0xff] }
 0x16a   : > { %v2609_v45 = vadd.f32 %v2577_v26, %v2509_v41  ;;  %v2777_v23 = vmul.f32 %v4314_v53, %v4916_v18  ;;  %v1510_v39 = vadd.f32 %v5385_v54, %v1410_v60  ;;  %v1578_v29 = vmul.f32 %v3069_v55, %v4219_v34 }
 0x16b   : > { %2879 = vst.msk [vmem:[%s4397_s9 + $0x90] sm:$0xff] %vm233_vm0, %v2847_v28  ;;  %v2309_v6 = vadd.f32 %v2277_v63, %v2209_v14  ;;  %v2378_v44 = vmul.f32 %v4288_v35, %v2342_v59  ;;  %v1910_v51 = vadd.f32 %v1878_v61, %v1809_v9  ;;  %v1978_v0 = vmul.f32 %v2441_v52, %v4260_v47  ;;  %v5386_v63 = vld [vmem:[#allocation65_spill] sm:$0xff]  ;;  %v2443_v61 = vld [vmem:[#allocation2 + $0x159] sm:$0xff] }
 0x16c   : > { %v2709_v7 = vadd.f32 %v2677_v27, %v2609_v45  ;;  %v2478_v40 = vmul.f32 %v4291_v25, %v2442_v24  ;;  %v1610_v33 = vadd.f32 %v1578_v29, %v1510_v39  ;;  %v1678_v49 = vmul.f32 %v4878_v57, %v4222_v11  ;;  %v2343_v27 = vld [vmem:[#allocation2 + $0x158] sm:$0xff]  ;;  %v3070_v39 = vld [vmem:[#allocation2 + $0x142] sm:$0xff] }
 0x16d   : > { %v2410_v56 = vadd.f32 %v2378_v44, %v2309_v6  ;;  %v2578_v43 = vmul.f32 %v4294_v42, %v2542_v3  ;;  %v2010_v48 = vadd.f32 %v1978_v0, %v1910_v51  ;;  %v2078_v26 = vmul.f32 %v2541_v20, %v4275_v17  ;;  %v2543_v45 = vld [vmem:[#allocation2 + $0x15a] sm:$0xff] }
 0x16e   : > { %v2809_v22 = vadd.f32 %v2777_v23, %v2709_v7  ;;  %v2678_v58 = vmul.f32 %v4303_v15, %v4935_v50  ;;  %v1710_v19 = vadd.f32 %v1678_v49, %v1610_v33  ;;  %v1778_v52 = vmul.f32 %v4891_v10, %v4236_v30  ;;  %v5388_v23 = vld [vmem:[#allocation67_spill] sm:$0xff] }
 0x16f   : > { %v2510_v36 = vadd.f32 %v2478_v40, %v2410_v56  ;;  %v2110_v41 = vadd.f32 %v2078_v26, %v2010_v48  ;;  %v2178_v57 = vmul.f32 %v4908_v2, %v4278_v31  ;;  %v1411_v20 = vadd.f32 %v5387_v16, %v5386_v63  ;;  %v4965_v7 = vld [vmem:[#allocation2 + $0x15b] sm:$0xff] }
 0x170   : > { %v2848_v12 = vadd.f32 %v4835_v5, %v2809_v22  ;;  %v2278_v60 = vmul.f32 %v4916_v18, %v4282_v32  ;;  %v1810_v28 = vadd.f32 %v1778_v52, %v1710_v19  ;;  %v1879_v10 = vmul.f32 %v2342_v59, %v4249_v46  ;;  %v4976_v52 = vld [vmem:[#allocation2 + $0x15c] sm:$0xff] }
 0x171   : > { %v2610_v14 = vadd.f32 %v2578_v43, %v2510_v36  ;;  %v2210_v9 = vadd.f32 %v2178_v57, %v2110_v41  ;;  %v1511_v54 = vadd.f32 %v5388_v23, %v1411_v20  ;;  %v1579_v55 = vmul.f32 %v3070_v39, %v4219_v34  ;;  %v5389_v41 = vld [vmem:[#allocation68_spill] sm:$0xff]  ;;  %v5390_v57 = vld [vmem:[#allocation69_spill] sm:$0xff] }
 0x172   : > { %2880 = vst.msk [vmem:[%s4397_s9 + $0x98] sm:$0xff] %vm233_vm0, %v2848_v12  ;;  %v2778_v29 = vmul.f32 %v4314_v53, %v4947_v62  ;;  %v2379_v6 = vmul.f32 %v4288_v35, %v2343_v27  ;;  %v1911_v44 = vadd.f32 %v1879_v10, %v1810_v28  ;;  %v1979_v51 = vmul.f32 %v2442_v24, %v4260_v47  ;;  %v2344_v20 = vld [vmem:[#allocation2 + $0x168] sm:$0xff] }
 0x173   : > { %v2710_v59 = vadd.f32 %v2678_v58, %v2610_v14  ;;  %v2310_v0 = vadd.f32 %v2278_v60, %v2210_v9  ;;  %v1611_v40 = vadd.f32 %v1579_v55, %v1511_v54  ;;  %v1679_v33 = vmul.f32 %v4908_v2, %v4222_v11  ;;  %v2444_v10 = vld [vmem:[#allocation2 + $0x169] sm:$0xff]  ;;  %v3071_v9 = vld [vmem:[#allocation2 + $0x152] sm:$0xff] }
 0x174   : > { %v2479_v49 = vmul.f32 %v4291_v25, %v2443_v61  ;;  %v2579_v56 = vmul.f32 %v4294_v42, %v2543_v45  ;;  %v2011_v43 = vadd.f32 %v1979_v51, %v1911_v44  ;;  %v2079_v48 = vmul.f32 %v2542_v3, %v4275_v17  ;;  %v2544_v55 = vld [vmem:[#allocation2 + $0x16a] sm:$0xff] }
 0x175   : > { %v2810_v26 = vadd.f32 %v2778_v29, %v2710_v59  ;;  %v2411_v22 = vadd.f32 %v2379_v6, %v2310_v0  ;;  %v1711_v19 = vadd.f32 %v1679_v33, %v1611_v40  ;;  %v1779_v24 = vmul.f32 %v4916_v18, %v4236_v30  ;;  %v4994_v51 = vld [vmem:[#allocation2 + $0x16b] sm:$0xff] }
 0x176   : > { %v2679_v58 = vmul.f32 %v4303_v15, %v4965_v7  ;;  %v2111_v2 = vadd.f32 %v2079_v48, %v2011_v43  ;;  %v2179_v36 = vmul.f32 %v4935_v50, %v4278_v31  ;;  %v1412_v63 = vadd.f32 %v5390_v57, %v5389_v41 }
 0x177   : > { %v2849_v3 = vadd.f32 %v4835_v5, %v2810_v26  ;;  %v2511_v16 = vadd.f32 %v2479_v49, %v2411_v22  ;;  %v1811_v12 = vadd.f32 %v1779_v24, %v1711_v19  ;;  %v1880_v18 = vmul.f32 %v2343_v27, %v4249_v46 }
 0x178   : > { %v2211_v60 = vadd.f32 %v2179_v36, %v2111_v2  ;;  %v2279_v28 = vmul.f32 %v4947_v62, %v4282_v32  ;;  %v1512_v14 = vadd.f32 %v4155_v38, %v1412_v63  ;;  %v1580_v23 = vmul.f32 %v3071_v9, %v4219_v34 }
 0x179   : > { %2881 = vst.msk [vmem:[%s4397_s9 + $0xa0] sm:$0xff] %vm233_vm0, %v2849_v3  ;;  %v2611_v54 = vadd.f32 %v2579_v56, %v2511_v16  ;;  %v2779_v39 = vmul.f32 %v4314_v53, %v4976_v52  ;;  %v1912_v29 = vadd.f32 %v1880_v18, %v1811_v12  ;;  %v1980_v27 = vmul.f32 %v2443_v61, %v4260_v47  ;;  %v2445_v12 = vld [vmem:[#allocation2 + $0x171] sm:$0xff] }
 0x17a   : > { %v2311_v6 = vadd.f32 %v2279_v28, %v2211_v60  ;;  %v2380_v44 = vmul.f32 %v4288_v35, %v2344_v20  ;;  %v1612_v59 = vadd.f32 %v1580_v23, %v1512_v14  ;;  %v1680_v38 = vmul.f32 %v4935_v50, %v4222_v11  ;;  %v2545_v18 = vld [vmem:[#allocation2 + $0x172] sm:$0xff]  ;;  %v3072_v14 = vld [vmem:[#allocation2 + $0x15a] sm:$0xff] }
 0x17b   : > { %v2711_v0 = vadd.f32 %v2679_v58, %v2611_v54  ;;  %v2480_v40 = vmul.f32 %v4291_v25, %v2444_v10  ;;  %v2012_v33 = vadd.f32 %v1980_v27, %v1912_v29  ;;  %v2080_v49 = vmul.f32 %v2543_v45, %v4275_v17  ;;  %v5007_v58 = vld [vmem:[#allocation2 + $0x16c] sm:$0xff] }
 0x17c   : > { %v2412_v56 = vadd.f32 %v2380_v44, %v2311_v6  ;;  %v2580_v43 = vmul.f32 %v4294_v42, %v2544_v55  ;;  %v1712_v48 = vadd.f32 %v1680_v38, %v1612_v59  ;;  %v1780_v61 = vmul.f32 %v4947_v62, %v4236_v30  ;;  %v2345_v45 = vld [vmem:[#allocation2 + $0x170] sm:$0xff] }
 0x17d   : > { %v2811_v26 = vadd.f32 %v2779_v39, %v2711_v0  ;;  %v2680_v22 = vmul.f32 %v4303_v15, %v4994_v51  ;;  %v2112_v19 = vadd.f32 %v2080_v49, %v2012_v33  ;;  %v2180_v50 = vmul.f32 %v4965_v7, %v4278_v31  ;;  %v5024_v54 = vld [vmem:[#allocation2 + $0x173] sm:$0xff] }
 0x17e   : > { %v2512_v24 = vadd.f32 %v2480_v40, %v2412_v56  ;;  %v1812_v2 = vadd.f32 %v1780_v61, %v1712_v48  ;;  %v1881_v36 = vmul.f32 %v2344_v20, %v4249_v46  ;;  %v1413_v41 = vadd.f32 %v4173_v1, %v4161_v21  ;;  %v5032_v0 = vld [vmem:[#allocation2 + $0x174] sm:$0xff] }
 0x17f   : > { %v2850_v62 = vadd.f32 %v4835_v5, %v2811_v26  ;;  %v2212_v57 = vadd.f32 %v2180_v50, %v2112_v19  ;;  %v2280_v63 = vmul.f32 %v4976_v52, %v4282_v32  ;;  %v1981_v3 = vmul.f32 %v2444_v10, %v4260_v47 }
 0x180   : > { %v2612_v16 = vadd.f32 %v2580_v43, %v2512_v24  ;;  %v1913_v60 = vadd.f32 %v1881_v36, %v1812_v2  ;;  %v1513_v28 = vadd.f32 %v4177_v13, %v1413_v41  ;;  %v1581_v20 = vmul.f32 %v3072_v14, %v4219_v34  ;;  %v2346_v43 = vld [vmem:[#allocation2 + $0x180] sm:$0xff] }
 0x181   : > { %2882 = vst.msk [vmem:[%s4397_s9 + $0xa8] sm:$0xff] %vm233_vm0, %v2850_v62  ;;  %v2780_v21 = vmul.f32 %v4314_v53, %v5007_v58  ;;  %v2312_v1 = vadd.f32 %v2280_v63, %v2212_v57  ;;  %v2381_v9 = vmul.f32 %v4288_v35, %v2345_v45  ;;  %v2081_v23 = vmul.f32 %v2544_v55, %v4275_v17  ;;  %v2546_v2 = vld [vmem:[#allocation2 + $0x182] sm:$0xff]  ;;  %v3073_v62 = vld [vmem:[#allocation2 + $0x16a] sm:$0xff] }
 0x182   : > { %v2712_v10 = vadd.f32 %v2680_v22, %v2612_v16  ;;  %v2013_v39 = vadd.f32 %v1981_v3, %v1913_v60  ;;  %v1613_v29 = vadd.f32 %v1581_v20, %v1513_v28  ;;  %v1681_v13 = vmul.f32 %v4965_v7, %v4222_v11  ;;  %v2446_v22 = vld [vmem:[#allocation2 + $0x181] sm:$0xff] }
 0x183   : > { %v2413_v27 = vadd.f32 %v2381_v9, %v2312_v1  ;;  %v2481_v6 = vmul.f32 %v4291_v25, %v2445_v12  ;;  %v2581_v44 = vmul.f32 %v4294_v42, %v2545_v18  ;;  %v2181_v59 = vmul.f32 %v4994_v51, %v4278_v31  ;;  %v5391_v36 = vld [vmem:[#allocation71_spill] sm:$0xff] }
 0x184   : > { %v2812_v38 = vadd.f32 %v2780_v21, %v2712_v10  ;;  %v2113_v55 = vadd.f32 %v2081_v23, %v2013_v39  ;;  %v1713_v40 = vadd.f32 %v1681_v13, %v1613_v29  ;;  %v1781_v33 = vmul.f32 %v4976_v52, %v4236_v30  ;;  %v5051_v63 = vld [vmem:[#allocation2 + $0x183] sm:$0xff] }
 0x185   : > { %v2513_v49 = vadd.f32 %v2481_v6, %v2413_v27  ;;  %v2681_v7 = vmul.f32 %v4303_v15, %v5024_v54  ;;  %v2281_v56 = vmul.f32 %v5007_v58, %v4282_v32  ;;  %v1414_v48 = vadd.f32 %v4185_v8, %v4169_v37  ;;  %v5063_v13 = vld [vmem:[#allocation2 + $0x184] sm:$0xff] }
 0x186   : > { %v2851_v61 = vadd.f32 %v4835_v5, %v2812_v38  ;;  %v2213_v26 = vadd.f32 %v2181_v59, %v2113_v55  ;;  %v1813_v19 = vadd.f32 %v1781_v33, %v1713_v40  ;;  %v1882_v50 = vmul.f32 %v2345_v45, %v4249_v46  ;;  %v2347_v6 = vld [vmem:[#allocation2 + $0x188] sm:$0xff] }
 0x187   : > { %v2613_v52 = vadd.f32 %v2581_v44, %v2513_v49  ;;  %v2781_v24 = vmul.f32 %v4314_v53, %v5032_v0  ;;  %v1514_v41 = vadd.f32 %v5391_v36, %v1414_v48  ;;  %v1582_v57 = vmul.f32 %v3073_v62, %v4219_v34  ;;  %v5392_v44 = vld [vmem:[#allocation70_spill] sm:$0xff]  ;;  %v5393_v59 = vld [vmem:[#allocation72_spill] sm:$0xff]  ;;  %v5394_v48 = vld [vmem:[#allocation73_spill] sm:$0xff] }
 0x188   : > { %2883 = vst.msk [vmem:[%s4397_s9 + $0xb0] sm:$0xff] %vm233_vm0, %v2851_v61  ;;  %v2313_v37 = vadd.f32 %v2281_v56, %v2213_v26  ;;  %v2382_v8 = vmul.f32 %v4288_v35, %v2346_v43  ;;  %v1914_v3 = vadd.f32 %v1882_v50, %v1813_v19  ;;  %v1982_v45 = vmul.f32 %v2445_v12, %v4260_v47  ;;  %v2547_v56 = vld [vmem:[#allocation2 + $0x18a] sm:$0xff]  ;;  %v3074_v26 = vld [vmem:[#allocation2 + $0x172] sm:$0xff] }
 0x189   : > { %v2713_v16 = vadd.f32 %v2681_v7, %v2613_v52  ;;  %v2482_v60 = vmul.f32 %v4291_v25, %v2446_v22  ;;  %v1614_v28 = vadd.f32 %v1582_v57, %v1514_v41  ;;  %v1682_v14 = vmul.f32 %v4994_v51, %v4222_v11  ;;  %v2447_v7 = vld [vmem:[#allocation2 + $0x189] sm:$0xff] }
 0x18a   : > { %v2414_v20 = vadd.f32 %v2382_v8, %v2313_v37  ;;  %v2582_v21 = vmul.f32 %v4294_v42, %v2546_v2  ;;  %v2014_v1 = vadd.f32 %v1982_v45, %v1914_v3  ;;  %v2082_v9 = vmul.f32 %v2545_v18, %v4275_v17  ;;  %v5081_v62 = vld [vmem:[#allocation2 + $0x18b] sm:$0xff] }
 0x18b   : > { %v2813_v23 = vadd.f32 %v2781_v24, %v2713_v16  ;;  %v2682_v10 = vmul.f32 %v4303_v15, %v5051_v63  ;;  %v1714_v39 = vadd.f32 %v1682_v14, %v1614_v28  ;;  %v1782_v12 = vmul.f32 %v5007_v58, %v4236_v30 }
 0x18c   : > { %v2514_v29 = vadd.f32 %v2482_v60, %v2414_v20  ;;  %v2114_v27 = vadd.f32 %v2082_v9, %v2014_v1  ;;  %v2182_v51 = vmul.f32 %v5024_v54, %v4278_v31  ;;  %v1415_v18 = vadd.f32 %v5393_v59, %v5392_v44  ;;  %v5395_v9 = vld [vmem:[#allocation75_spill] sm:$0xff]  ;;  %v5397_v59 = vld [vmem:[#allocation76_spill] sm:$0xff] }
 0x18d   : > { %v2852_v38 = vadd.f32 %v4835_v5, %v2813_v23  ;;  %v2282_v55 = vmul.f32 %v5032_v0, %v4282_v32  ;;  %v1814_v40 = vadd.f32 %v1782_v12, %v1714_v39  ;;  %v1883_v58 = vmul.f32 %v2346_v43, %v4249_v46  ;;  %v5396_v23 = vld [vmem:[#allocation74_spill] sm:$0xff] }
 0x18e   : > { %v2614_v33 = vadd.f32 %v2582_v21, %v2514_v29  ;;  %v2214_v49 = vadd.f32 %v2182_v51, %v2114_v27  ;;  %v1515_v61 = vadd.f32 %v5394_v48, %v1415_v18  ;;  %v1583_v19 = vmul.f32 %v3074_v26, %v4219_v34  ;;  %v5092_v21 = vld [vmem:[#allocation2 + $0x18c] sm:$0xff]  ;;  %v2348_v12 = vld [vmem:[#allocation2 + $0x198] sm:$0xff] }
 0x18f   : > { %2884 = vst.msk [vmem:[%s4397_s9 + $0xb8] sm:$0xff] %vm233_vm0, %v2852_v38  ;;  %v2782_v50 = vmul.f32 %v4314_v53, %v5063_v13  ;;  %v2383_v52 = vmul.f32 %v4288_v35, %v2347_v6  ;;  %v1915_v24 = vadd.f32 %v1883_v58, %v1814_v40  ;;  %v1983_v36 = vmul.f32 %v2446_v22, %v4260_v47  ;;  %v2448_v44 = vld [vmem:[#allocation2 + $0x199] sm:$0xff]  ;;  %v3075_v38 = vld [vmem:[#allocation2 + $0x182] sm:$0xff] }
 0x190   : > { %v2714_v43 = vadd.f32 %v2682_v10, %v2614_v33  ;;  %v2314_v41 = vadd.f32 %v2282_v55, %v2214_v49  ;;  %v1615_v57 = vadd.f32 %v1583_v19, %v1515_v61  ;;  %v1683_v37 = vmul.f32 %v5024_v54, %v4222_v11  ;;  %v2548_v33 = vld [vmem:[#allocation2 + $0x19a] sm:$0xff] }
 0x191   : > { %v2483_v8 = vmul.f32 %v4291_v25, %v2447_v7  ;;  %v2583_v3 = vmul.f32 %v4294_v42, %v2547_v56  ;;  %v2015_v45 = vadd.f32 %v1983_v36, %v1915_v24  ;;  %v2083_v16 = vmul.f32 %v2546_v2, %v4275_v17  ;;  %v5110_v26 = vld [vmem:[#allocation2 + $0x19b] sm:$0xff] }
 0x192   : > { %v2814_v60 = vadd.f32 %v2782_v50, %v2714_v43  ;;  %v2415_v28 = vadd.f32 %v2383_v52, %v2314_v41  ;;  %v1715_v14 = vadd.f32 %v1683_v37, %v1615_v57  ;;  %v1783_v22 = vmul.f32 %v5032_v0, %v4236_v30 }
 0x193   : > { %v2683_v20 = vmul.f32 %v4303_v15, %v5081_v62  ;;  %v2115_v54 = vadd.f32 %v2083_v16, %v2015_v45  ;;  %v2183_v1 = vmul.f32 %v5051_v63, %v4278_v31  ;;  %v1416_v10 = vadd.f32 %v5396_v23, %v5395_v9 }
 0x194   : > { %v2853_v2 = vadd.f32 %v4835_v5, %v2814_v60  ;;  %v2515_v39 = vadd.f32 %v2483_v8, %v2415_v28  ;;  %v1815_v29 = vadd.f32 %v1783_v22, %v1715_v14  ;;  %v1884_v0 = vmul.f32 %v2347_v6, %v4249_v46  ;;  %v5123_v60 = vld [vmem:[#allocation2 + $0x19c] sm:$0xff] }
 0x195   : > { %v2215_v27 = vadd.f32 %v2183_v1, %v2115_v54  ;;  %v2283_v51 = vmul.f32 %v5063_v13, %v4282_v32  ;;  %v1516_v18 = vadd.f32 %v5397_v59, %v1416_v10  ;;  %v1584_v55 = vmul.f32 %v3075_v38, %v4219_v34  ;;  %v5398_v22 = vld [vmem:[#allocation79_spill] sm:$0xff] }
 0x196   : > { %2885 = vst.msk [vmem:[%s4397_s9 + $0xc0] sm:$0xff] %vm233_vm0, %v2853_v2  ;;  %v2615_v40 = vadd.f32 %v2583_v3, %v2515_v39  ;;  %v2783_v58 = vmul.f32 %v4314_v53, %v5092_v21  ;;  %v1916_v49 = vadd.f32 %v1884_v0, %v1815_v29  ;;  %v1984_v6 = vmul.f32 %v2447_v7, %v4260_v47  ;;  %v2449_v2 = vld [vmem:[#allocation2 + $0x1a1] sm:$0xff]  ;;  %v5400_v0 = vld [vmem:[#allocation78_spill] sm:$0xff] }
 0x197   : > { %v2315_v48 = vadd.f32 %v2283_v51, %v2215_v27  ;;  %v2384_v61 = vmul.f32 %v4288_v35, %v2348_v12  ;;  %v1616_v19 = vadd.f32 %v1584_v55, %v1516_v18  ;;  %v1684_v50 = vmul.f32 %v5051_v63, %v4222_v11  ;;  %v2549_v39 = vld [vmem:[#allocation2 + $0x1a2] sm:$0xff]  ;;  %v3076_v51 = vld [vmem:[#allocation2 + $0x18a] sm:$0xff] }
 0x198   : > { %v2715_v52 = vadd.f32 %v2683_v20, %v2615_v40  ;;  %v2484_v24 = vmul.f32 %v4291_v25, %v2448_v44  ;;  %v2016_v36 = vadd.f32 %v1984_v6, %v1916_v49  ;;  %v2084_v43 = vmul.f32 %v2547_v56, %v4275_v17  ;;  %v2349_v56 = vld [vmem:[#allocation2 + $0x1a0] sm:$0xff]  ;;  %v5399_v20 = vld [vmem:[#allocation77_spill] sm:$0xff] }
 0x199   : > { %v2416_v41 = vadd.f32 %v2384_v61, %v2315_v48  ;;  %v2584_v57 = vmul.f32 %v4294_v42, %v2548_v33  ;;  %v1716_v37 = vadd.f32 %v1684_v50, %v1616_v19  ;;  %v1784_v7 = vmul.f32 %v5063_v13, %v4236_v30  ;;  %v5140_v40 = vld [vmem:[#allocation2 + $0x1a3] sm:$0xff] }
 0x19a   : > { %v2815_v8 = vadd.f32 %v2783_v58, %v2715_v52  ;;  %v2684_v3 = vmul.f32 %v4303_v15, %v5110_v26  ;;  %v2116_v45 = vadd.f32 %v2084_v43, %v2016_v36  ;;  %v2184_v63 = vmul.f32 %v5081_v62, %v4278_v31  ;;  %v1550_v52 = vld [vmem:[#allocation2 + $0x19a] sm:$0xff]  ;;  %v5148_v36 = vld [vmem:[#allocation2 + $0x1a4] sm:$0xff] }
 0x19b   : > { %v2516_v16 = vadd.f32 %v2484_v24, %v2416_v41  ;;  %v1816_v28 = vadd.f32 %v1784_v7, %v1716_v37  ;;  %v1885_v14 = vmul.f32 %v2348_v12, %v4249_v46  ;;  %v1417_v54 = vadd.f32 %v5399_v20, %v5398_v22  ;;  %v2350_v7 = vld [vmem:[#allocation2 + $0x1b0] sm:$0xff] }
 0x19c   : > { %v2854_v13 = vadd.f32 %v4835_v5, %v2815_v8  ;;  %v2216_v1 = vadd.f32 %v2184_v63, %v2116_v45  ;;  %v2284_v9 = vmul.f32 %v5092_v21, %v4282_v32  ;;  %v1985_v23 = vmul.f32 %v2448_v44, %v4260_v47  ;;  %v5401_v8 = vld [vmem:[#allocation84_spill] sm:$0xff] }
 0x19d   : > { %v2616_v10 = vadd.f32 %v2584_v57, %v2516_v16  ;;  %v1917_v29 = vadd.f32 %v1885_v14, %v1816_v28  ;;  %v1517_v27 = vadd.f32 %v5400_v0, %v1417_v54  ;;  %v1585_v12 = vmul.f32 %v3076_v51, %v4219_v34  ;;  %v2450_v28 = vld [vmem:[#allocation2 + $0x1b1] sm:$0xff] }
 0x19e   : > { %2886 = vst.msk [vmem:[%s4397_s9 + $0xc8] sm:$0xff] %vm233_vm0, %v2854_v13  ;;  %v2784_v59 = vmul.f32 %v4314_v53, %v5123_v60  ;;  %v2316_v18 = vadd.f32 %v2284_v9, %v2216_v1  ;;  %v2385_v38 = vmul.f32 %v4288_v35, %v2349_v56  ;;  %v2085_v55 = vmul.f32 %v2548_v33, %v4275_v17  ;;  %v2550_v54 = vld [vmem:[#allocation2 + $0x1b2] sm:$0xff] }
 0x19f   : > { %v2716_v44 = vadd.f32 %v2684_v3, %v2616_v10  ;;  %v2017_v58 = vadd.f32 %v1985_v23, %v1917_v29  ;;  %v1617_v49 = vadd.f32 %v1585_v12, %v1517_v27  ;;  %v1685_v6 = vmul.f32 %v5081_v62, %v4222_v11  ;;  %v5402_v3 = vld [vmem:[#allocation80_spill] sm:$0xff]  ;;  %v5403_v13 = vld [vmem:[#allocation81_spill] sm:$0xff] }
 0x1a0   : > { %v2417_v48 = vadd.f32 %v2385_v38, %v2316_v18  ;;  %v2485_v61 = vmul.f32 %v4291_v25, %v2449_v2  ;;  %v2585_v19 = vmul.f32 %v4294_v42, %v2549_v39  ;;  %v2185_v50 = vmul.f32 %v5110_v26, %v4278_v31  ;;  %v2650_v38 = vld [vmem:[#allocation2 + $0x1b3] sm:$0xff] }
 0x1a1   : > { %v2816_v24 = vadd.f32 %v2784_v59, %v2716_v44  ;;  %v2117_v33 = vadd.f32 %v2085_v55, %v2017_v58  ;;  %v1717_v43 = vadd.f32 %v1685_v6, %v1617_v49  ;;  %v1785_v41 = vmul.f32 %v5092_v21, %v4236_v30  ;;  %v1551_v58 = vld [vmem:[#allocation2 + $0x1a2] sm:$0xff] }
 0x1a2   : > { %v2517_v57 = vadd.f32 %v2485_v61, %v2417_v48  ;;  %v2685_v62 = vmul.f32 %v4303_v15, %v5140_v40  ;;  %v2285_v37 = vmul.f32 %v5123_v60, %v4282_v32  ;;  %v1418_v45 = vadd.f32 %v5402_v3, %v5401_v8 }
 0x1a3   : > { %v2855_v63 = vadd.f32 %v4835_v5, %v2816_v24  ;;  %v2217_v16 = vadd.f32 %v2185_v50, %v2117_v33  ;;  %v1817_v14 = vadd.f32 %v1785_v41, %v1717_v43  ;;  %v1886_v22 = vmul.f32 %v2349_v56, %v4249_v46  ;;  %v5404_v24 = vld [vmem:[#allocation82_spill] sm:$0xff] }
 0x1a4   : > { %v2617_v21 = vadd.f32 %v2585_v19, %v2517_v57  ;;  %v2785_v20 = vmul.f32 %v4314_v53, %v5148_v36  ;;  %v1518_v1 = vadd.f32 %v5403_v13, %v1418_v45  ;;  %v1586_v9 = vmul.f32 %v4219_v34, %v1550_v52  ;;  %v2750_v19 = vld [vmem:[#allocation2 + $0x1b4] sm:$0xff] }
 0x1a5   : > { %2887 = vst.msk [vmem:[%s4397_s9 + $0xd0] sm:$0xff] %vm233_vm0, %v2855_v63  ;;  %v2317_v23 = vadd.f32 %v2285_v37, %v2217_v16  ;;  %v2386_v10 = vmul.f32 %v4288_v35, %v2350_v7  ;;  %v1918_v29 = vadd.f32 %v1886_v22, %v1817_v14  ;;  %v1986_v0 = vmul.f32 %v2449_v2, %v4260_v47  ;;  %v2351_v52 = vld [vmem:[#allocation2 + $0x1b8] sm:$0xff] }
 0x1a6   : > { %v2717_v27 = vadd.f32 %v2685_v62, %v2617_v21  ;;  %v2486_v56 = vmul.f32 %v4291_v25, %v2450_v28  ;;  %v1618_v51 = vadd.f32 %v1586_v9, %v1518_v1  ;;  %v1686_v12 = vmul.f32 %v5110_v26, %v4222_v11  ;;  %v2451_v37 = vld [vmem:[#allocation2 + $0x1b9] sm:$0xff] }
 0x1a7   : > { %v2418_v59 = vadd.f32 %v2386_v10, %v2317_v23  ;;  %v2586_v18 = vmul.f32 %v4294_v42, %v2550_v54  ;;  %v2018_v55 = vadd.f32 %v1986_v0, %v1918_v29  ;;  %v2086_v44 = vmul.f32 %v2549_v39, %v4275_v17  ;;  %v2551_v1 = vld [vmem:[#allocation2 + $0x1ba] sm:$0xff]  ;;  %v2352_v0 = vld [vmem:[#allocation2 + $0x1c8] sm:$0xff] }
 0x1a8   : > { %v2817_v49 = vadd.f32 %v2785_v20, %v2717_v27  ;;  %v1718_v6 = vadd.f32 %v1686_v12, %v1618_v51  ;;  %v1786_v2 = vmul.f32 %v5123_v60, %v4236_v30  ;;  %v1887_v48 = vmul.f32 %v2350_v7, %v4249_v46  ;;  %v5405_v7 = vld [vmem:[#allocation83_spill] sm:$0xff] }
 0x1a9   : > { %v2518_v61 = vadd.f32 %v2486_v56, %v2418_v59  ;;  %v2118_v50 = vadd.f32 %v2086_v44, %v2018_v55  ;;  %v2186_v26 = vmul.f32 %v5140_v40, %v4278_v31  ;;  %v1419_v33 = vadd.f32 %v5404_v24, %v4645_v4  ;;  %v2651_v56 = vld [vmem:[#allocation2 + $0x1bb] sm:$0xff]  ;;  %v2353_v24 = vld [vmem:[#allocation2 + $0x1d0] sm:$0xff] }
 0x1aa   : > { %v2856_v39 = vadd.f32 %v4835_v5, %v2817_v49  ;;  %v2686_v43 = vmul.f32 %v4303_v15, %v2650_v38  ;;  %v2286_v60 = vmul.f32 %v5148_v36, %v4282_v32  ;;  %v1818_v41 = vadd.f32 %v1786_v2, %v1718_v6 }
 0x1ab   : > { %v2618_v57 = vadd.f32 %v2586_v18, %v2518_v61  ;;  %v2218_v62 = vadd.f32 %v2186_v26, %v2118_v50  ;;  %v1519_v8 = vadd.f32 %v5405_v7, %v1419_v33  ;;  %v1587_v3 = vmul.f32 %v4219_v34, %v1551_v58  ;;  %v2751_v18 = vld [vmem:[#allocation2 + $0x1bc] sm:$0xff]  ;;  %v2452_v58 = vld [vmem:[#allocation2 + $0x1c9] sm:$0xff] }
 0x1ac   : > { %2888 = vst.msk [vmem:[%s4397_s9 + $0xd8] sm:$0xff] %vm233_vm0, %v2856_v39  ;;  %v2786_v45 = vmul.f32 %v4314_v53, %v2750_v19  ;;  %v2387_v4 = vmul.f32 %v4288_v35, %v2351_v52  ;;  %v1919_v63 = vadd.f32 %v1887_v48, %v1818_v41  ;;  %v1987_v16 = vmul.f32 %v2450_v28, %v4260_v47  ;;  %v2552_v61 = vld [vmem:[#allocation2 + $0x1ca] sm:$0xff] }
 0x1ad   : > { %v2718_v14 = vadd.f32 %v2686_v43, %v2618_v57  ;;  %v2318_v22 = vadd.f32 %v2286_v60, %v2218_v62  ;;  %v1619_v21 = vadd.f32 %v1587_v3, %v1519_v8  ;;  %v1687_v20 = vmul.f32 %v5140_v40, %v4222_v11  ;;  %v2652_v39 = vld [vmem:[#allocation2 + $0x1cb] sm:$0xff] }
 0x1ae   : > { %v2487_v13 = vmul.f32 %v4291_v25, %v2451_v37  ;;  %v2019_v9 = vadd.f32 %v1987_v16, %v1919_v63  ;;  %v2087_v34 = vmul.f32 %v2550_v54, %v4275_v17  ;;  %v1787_v23 = vmul.f32 %v5148_v36, %v4236_v30  ;;  %v2752_v62 = vld [vmem:[#allocation2 + $0x1cc] sm:$0xff] }
 0x1af   : > { %v2818_v10 = vadd.f32 %v2786_v45, %v2718_v14  ;;  %v2419_v29 = vadd.f32 %v2387_v4, %v2318_v22  ;;  %v1719_v28 = vadd.f32 %v1687_v20, %v1619_v21  ;;  %v1888_v27 = vmul.f32 %v2351_v52, %v4249_v46  ;;  %v2453_v45 = vld [vmem:[#allocation2 + $0x1d1] sm:$0xff] }
 0x1b0   : > { %v2119_v51 = vadd.f32 %v2087_v34, %v2019_v9  ;;  %v2187_v11 = vmul.f32 %v2650_v38, %v4278_v31  ;;  %v2587_v59 = vmul.f32 %v4294_v42, %v2551_v1  ;;  %v2287_v30 = vmul.f32 %v2750_v19, %v4282_v32  ;;  %v2553_v16 = vld [vmem:[#allocation2 + $0x1d2] sm:$0xff] }
 0x1b1   : > { %v2857_v40 = vadd.f32 %v4835_v5, %v2818_v10  ;;  %v2519_v12 = vadd.f32 %v2487_v13, %v2419_v29  ;;  %v1819_v54 = vadd.f32 %v1787_v23, %v1719_v28  ;;  %v2388_v36 = vmul.f32 %v4288_v35, %v2352_v0 }
 0x1b2   : > { %v2219_v55 = vadd.f32 %v2187_v11, %v2119_v51  ;;  %v2687_v46 = vmul.f32 %v4303_v15, %v2651_v56  ;;  %v1988_v38 = vmul.f32 %v2451_v37, %v4260_v47  ;;  %v2787_v48 = vmul.f32 %v4314_v53, %v2751_v18 }
 0x1b3   : > { %2889 = vst.msk [vmem:[%s4397_s9 + $0xe0] sm:$0xff] %vm233_vm0, %v2857_v40  ;;  %v2619_v44 = vadd.f32 %v2587_v59, %v2519_v12  ;;  %v1920_v49 = vadd.f32 %v1888_v27, %v1819_v54  ;;  %v2088_v26 = vmul.f32 %v2551_v1, %v4275_v17  ;;  %v2488_v52 = vmul.f32 %v4291_v25, %v2452_v58  ;;  %v2753_v1 = vld [vmem:[#allocation2 + $0x1d4] sm:$0xff] }
 0x1b4   : > { %v2319_v6 = vadd.f32 %v2287_v30, %v2219_v55  ;;  %v2188_v60 = vmul.f32 %v2651_v56, %v4278_v31  ;;  %v2588_v47 = vmul.f32 %v4294_v42, %v2552_v61  ;;  %v2288_v7 = vmul.f32 %v2751_v18, %v4282_v32  ;;  %v2653_v32 = vld [vmem:[#allocation2 + $0x1d3] sm:$0xff] }
 0x1b5   : > { %v2719_v2 = vadd.f32 %v2687_v46, %v2619_v44  ;;  %v2020_v50 = vadd.f32 %v1988_v38, %v1920_v49  ;;  %v2389_v17 = vmul.f32 %v4288_v35, %v2353_v24  ;;  %v2688_v3 = vmul.f32 %v4303_v15, %v2652_v39 }
 0x1b6   : > { %v2420_v19 = vadd.f32 %v2388_v36, %v2319_v6  ;;  %v2788_v63 = vmul.f32 %v4314_v53, %v2752_v62  ;;  %v2489_v22 = vmul.f32 %v4291_v25, %v2453_v45  ;;  %v2589_v35 = vmul.f32 %v4294_v42, %v2553_v16 }
 0x1b7   : > { %v2819_v33 = vadd.f32 %v2787_v48, %v2719_v2  ;;  %v2120_v43 = vadd.f32 %v2088_v26, %v2020_v50  ;;  %v2689_v34 = vmul.f32 %v4303_v15, %v2653_v32  ;;  %v2789_v10 = vmul.f32 %v4314_v53, %v2753_v1 }
 0x1b8   : > { %v2520_v41 = vadd.f32 %v2488_v52, %v2420_v19 }
 0x1b9   : > { %v2858_v57 = vadd.f32 %v4835_v5, %v2819_v33  ;;  %v2220_v37 = vadd.f32 %v2188_v60, %v2120_v43 }
 0x1ba   : > { %v2620_v8 = vadd.f32 %v2588_v47, %v2520_v41 }
 0x1bb   : > { %2890 = vst.msk [vmem:[%s4397_s9 + $0xe8] sm:$0xff] %vm233_vm0, %v2858_v57  ;;  %v2320_v4 = vadd.f32 %v2288_v7, %v2220_v37 }
 0x1bc   : > { %v2720_v31 = vadd.f32 %v2688_v3, %v2620_v8 }
 0x1bd   : > { %v2421_v14 = vadd.f32 %v2389_v17, %v2320_v4 }
 0x1be   : > { %v2820_v21 = vadd.f32 %v2788_v63, %v2720_v31 }
 0x1bf   : > { %v2521_v20 = vadd.f32 %v2489_v22, %v2421_v14 }
 0x1c0   : > { %v2859_v13 = vadd.f32 %v4835_v5, %v2820_v21 }
 0x1c1   : > { %v2621_v9 = vadd.f32 %v2589_v35, %v2521_v20 }
 0x1c2   : > { %2891 = vst.msk [vmem:[%s4397_s9 + $0xf0] sm:$0xff] %vm233_vm0, %v2859_v13 }
 0x1c3   : > { %v2721_v23 = vadd.f32 %v2689_v34, %v2621_v9 }
 0x1c5   : > { %v2821_v29 = vadd.f32 %v2789_v10, %v2721_v23 }
 0x1c7   : > { %v2860_v0 = vadd.f32 %v4835_v5, %v2821_v29 }
 0x1c9   : > { %2892 = vst.msk [vmem:[%s4397_s9 + $0xf8] sm:$0xff] %vm233_vm0, %v2860_v0 }
 0x1ca PF: > { %s13_s14 = sadd.s32 1, %s3099_s14   ;;  %s5406_s12 = smov %s3095_s13 }
 0x1cb   : > { %p10_p5 = scmp.ge.s32.totalorder %s13_s14, 4   ;;  %s5407_s13 = smov %s5409_s15 }
 0x1cd   :  { %12 = sbr.rel (!%p10_p5) target bundleno = 2 (0x2), region = 73 }

</bundles_post_ra>
